<compile_context>
chip_gen: v7x
topology: tpu7x:2x2x1
jax: 0.10.0
libtpu: 0.0.40
codegen_flags: <defaults>
</compile_context>

<pallas_src>
import functools

import jax
import jax.numpy as jnp
from jax import lax
from jax.experimental import pallas as pl
from jax.experimental.pallas import tpu as pltpu


def _round_up(x, m):
    return (x + m - 1) // m * m


def _row_tile(h):
    if h == 56:
        return 28
    if h % 16 == 0 and h >= 32:
        return 16
    return h


def _pool_row_tile(hp):
    for t in (14, 16, 8):
        if hp % t == 0:
            return t
    return hp


# ---------------------------------------------------------------------------
# Fused Conv3x3 (pad=1, no bias) + folded-BN shift + LeakyReLU
# (+ optional vertical half of MaxPool2d(2)) kernel.
#
# grid = (j, b, i) = (Cout tiles, batch, row tiles).  All operands are
# auto-pipelined BlockSpecs; the row halo comes from two extra 1-row input specs
# whose index_maps clamp at the image borders (the kernel zeroes those rows).
# ---------------------------------------------------------------------------
def _conv_kernel(body_ref, top_ref, bot_ref, w_ref, shift_ref, o_ref, xpad, patch,
                 *, th, W, Win, Wc, Cin, pool):
    i = pl.program_id(2)
    ni = pl.num_programs(2)
    C = Cin

    # One-time (first step of each (j, b) group on each core) zeroing of the
    # left/right halo + alignment columns of the staging strip.  Nothing below
    # ever writes these columns, so the zeros persist across grid steps.
    @pl.when(i == 0)
    def _():
        xpad[:, 0:8, :] = jnp.zeros((th + 2, 8, C), xpad.dtype)
        xpad[:, 8 + Win:, :] = jnp.zeros((th + 2, Wc + 16 - (8 + Win), C), xpad.dtype)

    # Stage the body rows and the two single-row halos (zeroed at image borders)
    # into the sublane-aligned window [8, 8+Win) of the padded strip.
    xpad[1:th + 1, 8:8 + Win, :] = body_ref[0]
    top = top_ref[0, 0]
    bot = bot_ref[0, 0]
    xpad[0, 8:8 + Win, :] = jnp.where(i == 0, jnp.zeros_like(top), top)
    xpad[th + 1, 8:8 + Win, :] = jnp.where(i == ni - 1, jnp.zeros_like(bot), bot)

    # kw-patch: 3 column-shifted copies laid side by side on the lane dim
    # (K order inside each kh block is (kw, cin), matching the weight layout).
    for kw in range(3):
        patch[:, :, kw * C:(kw + 1) * C] = xpad[:, 7 + kw:7 + kw + Wc, :]

    # 3 accumulating MXU matmuls over kh; the LHS row windows are 8-aligned
    # (Wc is a multiple of 8) so the slices are free views.
    p2 = patch[...].reshape((th + 2) * Wc, 3 * C)
    acc = None
    for kh in range(3):
        lhs = p2[kh * Wc:(kh + th) * Wc, :]
        rhs = w_ref[kh * 3 * C:(kh + 1) * 3 * C, :]
        d = jnp.dot(lhs, rhs, preferred_element_type=jnp.float32)
        acc = d if acc is None else acc + d

    y = acc + shift_ref[...]                       # folded-BN shift
    y = jnp.where(y > 0, y, 0.01 * y)              # torch LeakyReLU default slope
    y = y.reshape(th, Wc, -1)
    if W < Wc:
        # Zero the lane-alignment columns so the next layer's zero-pad invariant
        # (and the pooled pad columns) stay exact.
        col = lax.broadcasted_iota(jnp.int32, (th, Wc, 1), 1)
        y = jnp.where(col < W, y, 0.0)
    if pool:
        # Vertical half of MaxPool2d(2); horizontal half is done by hpool().
        y = y.reshape(th // 2, 2, Wc, y.shape[-1])
        y = jnp.maximum(y[:, 0], y[:, 1])
    o_ref[0] = y.astype(o_ref.dtype)


def conv_block(x, w, shift, *, width, pool):
    """x: (B, H, Wstored, Cin) bf16 with columns [width, Wstored) exactly zero.
    w: (9*Cin, Cout) bf16, K order (kh, kw, cin), BN scale folded in.
    shift: (1, Cout) f32.
    Returns (B, H, Wc, Cout) bf16 (or (B, H//2, Wc, Cout) if pool) with columns
    [width, Wc) exactly zero, Wc = round_up(width, 8) (2*round_up(width//2, 8) if pool).
    """
    B, H, Win, Cin = x.shape
    Cout = w.shape[1]
    assert w.shape[0] == 9 * Cin and Win == _round_up(width, 8)
    th = _row_tile(H)
    assert H % th == 0
    if pool:
        assert th % 2 == 0 and width % 2 == 0
        Wc = 2 * _round_up(width // 2, 8)
    else:
        Wc = _round_up(width, 8)
    tn = 256 if Cout % 256 == 0 else 128
    th_out = th // 2 if pool else th
    H_out = H // 2 if pool else H

    grid = (Cout // tn, B, H // th)
    kernel = functools.partial(_conv_kernel, th=th, W=width, Win=Win, Wc=Wc,
                               Cin=Cin, pool=pool)

    # Per-layer VMEM budget: double-buffered pipeline blocks + scratch + slack.
    blk = (th * Win * Cin * 2 + 2 * Win * Cin * 2 + 9 * Cin * tn * 2
           + th_out * Wc * tn * 2 + tn * 4)
    scratch = ((th + 2) * (Wc + 16) * Cin * 2 + (th + 2) * Wc * 3 * Cin * 2
               + 3 * th * Wc * tn * 4)
    vmem_limit = min(max(int((2 * blk + scratch) * 1.3) + (2 << 20), 32 << 20),
                     100 << 20)

    return pl.pallas_call(
        kernel,
        out_shape=jax.ShapeDtypeStruct((B, H_out, Wc, Cout), jnp.bfloat16),
        grid_spec=pltpu.PrefetchScalarGridSpec(
            num_scalar_prefetch=0,
            grid=grid,
            in_specs=[
                pl.BlockSpec((1, th, Win, Cin), lambda j, b, i: (b, i, 0, 0)),
                pl.BlockSpec((1, 1, Win, Cin),
                             lambda j, b, i: (b, jnp.maximum(i * th - 1, 0), 0, 0)),
                pl.BlockSpec((1, 1, Win, Cin),
                             lambda j, b, i: (b, jnp.minimum(i * th + th, H - 1), 0, 0)),
                pl.BlockSpec((9 * Cin, tn), lambda j, b, i: (0, j)),
                pl.BlockSpec((1, tn), lambda j, b, i: (0, j)),
            ],
            out_specs=pl.BlockSpec((1, th_out, Wc, tn), lambda j, b, i: (b, i, 0, j)),
            scratch_shapes=[
                pltpu.VMEM((th + 2, Wc + 16, Cin), jnp.bfloat16),   # padded staging strip
                pltpu.VMEM((th + 2, Wc, 3 * Cin), jnp.bfloat16),    # kw-patch
            ],
        ),
        compiler_params=pltpu.CompilerParams(
            dimension_semantics=("parallel", "parallel", "arbitrary"),
            vmem_limit_bytes=vmem_limit),
    )(x, x, x, w, shift)


# ---------------------------------------------------------------------------
# Horizontal half of MaxPool2d(2): adjacent columns are paired by a free
# row-major lane-merge view, the max is a plain VPU maximum of lane halves.
# ---------------------------------------------------------------------------
def _hpool_kernel(x_ref, o_ref):
    C = o_ref.shape[3]
    v = x_ref[0]
    o_ref[0] = jnp.maximum(v[:, :, :C], v[:, :, C:])


def hpool(x):
    B, Hp, Wc, C = x.shape
    Wo = Wc // 2
    xr = x.reshape(B, Hp, Wo, 2 * C)                 # free view, no HBM copy
    tp = _pool_row_tile(Hp)
    return pl.pallas_call(
        _hpool_kernel,
        out_shape=jax.ShapeDtypeStruct((B, Hp, Wo, C), x.dtype),
        grid_spec=pltpu.PrefetchScalarGridSpec(
            num_scalar_prefetch=0,
            grid=(B, Hp // tp),
            in_specs=[pl.BlockSpec((1, tp, Wo, 2 * C), lambda b, i: (b, i, 0, 0))],
            out_specs=pl.BlockSpec((1, tp, Wo, C), lambda b, i: (b, i, 0, 0)),
        ),
        compiler_params=pltpu.CompilerParams(
            dimension_semantics=("parallel", "parallel")),
    )(xr)


# ---------------------------------------------------------------------------
# Final Linear(6272, latent) + Tanh (latent padded to 128 lanes).
# ---------------------------------------------------------------------------
def _linear_tanh_kernel(x_ref, w_ref, b_ref, o_ref):
    y = jnp.dot(x_ref[...], w_ref[...], preferred_element_type=jnp.float32)
    o_ref[...] = jnp.tanh(y + b_ref[...])


def linear_tanh(x, w, b):
    M, K = x.shape
    _, N = w.shape
    return pl.pallas_call(
        _linear_tanh_kernel,
        out_shape=jax.ShapeDtypeStruct((M, N), jnp.float32),
        grid_spec=pltpu.PrefetchScalarGridSpec(
            num_scalar_prefetch=0,
            grid=(1,),
            in_specs=[pl.BlockSpec((M, K), lambda i: (0, 0)),
                      pl.BlockSpec((K, N), lambda i: (0, 0)),
                      pl.BlockSpec((1, N), lambda i: (0, 0))],
            out_specs=pl.BlockSpec((M, N), lambda i: (0, 0)),
        ),
        compiler_params=pltpu.CompilerParams(dimension_semantics=("arbitrary",)),
    )(x, w, b)


# ---------------------------------------------------------------------------
# Encoder architecture
# ---------------------------------------------------------------------------
def _conv_layers(c0):
    return [
        (c0, 128, False), (128, 128, True),
        (128, 256, False), (256, 256, True),
        (256, 512, False), (512, 512, True),
        (512, 1024, False), (1024, 1024, True),
        (1024, 2048, False), (2048, 2048, True),
        (2048, 1024, False), (1024, 512, False),
        (512, 256, False), (256, 128, False),
    ]


def init_params(key, num_domains, num_contents, latent_size):
    c0 = 3 + num_contents + num_domains
    eps = 1e-5
    convs = []
    for cin, cout, _pool in _conv_layers(c0):
        cin_pad = _round_up(cin, 128)
        key, kw_, kg, kb, km, kv = jax.random.split(key, 6)
        # Weight laid out with K order (kh, kw, cin); a real torch Conv2d weight
        # (Cout, Cin, kh, kw) maps here via transpose(2, 3, 1, 0).reshape(9*Cin, Cout).
        w = jax.random.normal(kw_, (9, cin, cout), jnp.float32) * (2.0 / (9 * cin)) ** 0.5
        gamma = jax.random.uniform(kg, (cout,), jnp.float32, 0.8, 1.2)
        beta = 0.05 * jax.random.normal(kb, (cout,), jnp.float32)
        mean = 0.05 * jax.random.normal(km, (cout,), jnp.float32)
        var = jax.random.uniform(kv, (cout,), jnp.float32, 0.9, 1.1)
        scale = gamma / jnp.sqrt(var + eps)
        w = w * scale                                  # eval-mode BN scale folded in
        shift = beta - mean * scale
        if cin_pad != cin:                             # lane-align first layer's channels
            w = jnp.pad(w, ((0, 0), (0, cin_pad - cin), (0, 0)))
        convs.append({
            "w": w.reshape(9 * cin_pad, cout).astype(jnp.bfloat16),
            "shift": shift.reshape(1, cout).astype(jnp.float32),
        })
    key, kl, kb2 = jax.random.split(key, 3)
    lin_in = 128 * 7 * 7                               # Linear(6272) => 224x224 input, 5 pools
    n_pad = _round_up(latent_size, 128)
    w_lin = jax.random.normal(kl, (lin_in, latent_size), jnp.float32) * (1.0 / lin_in) ** 0.5
    b_lin = 0.01 * jax.random.normal(kb2, (latent_size,), jnp.float32)
    w_lin = jnp.pad(w_lin, ((0, 0), (0, n_pad - latent_size))).astype(jnp.bfloat16)
    b_lin = jnp.pad(b_lin, (0, n_pad - latent_size)).reshape(1, n_pad).astype(jnp.float32)
    return {"convs": convs, "w_lin": w_lin, "b_lin": b_lin}


def encoder_forward(params, images, domains, contents, *,
                    num_domains, num_contents, latent_size):
    """images: (B, 3, H, W) NCHW; domains: (B, num_domains); contents: (B, num_contents)."""
    B, _, H, W = images.shape
    x_img = jnp.transpose(images, (0, 2, 3, 1)).astype(jnp.float32)        # NHWC
    dom = jnp.broadcast_to(domains[:, None, None, :].astype(jnp.float32),
                           (B, H, W, num_domains))
    con = jnp.broadcast_to(contents[:, None, None, :].astype(jnp.float32),
                           (B, H, W, num_contents))
    x = jnp.concatenate([x_img, dom, con], axis=-1).astype(jnp.bfloat16)   # torch.cat order
    c0 = x.shape[-1]
    c0p = _round_up(c0, 128)
    if c0p != c0:                                       # lane-align first conv's K
        x = jnp.pad(x, ((0, 0), (0, 0), (0, 0), (0, c0p - c0)))

    width = W
    for li, (_cin, _cout, pool) in enumerate(_conv_layers(c0)):
        p = params["convs"][li]
        x = conv_block(x, p["w"], p["shift"], width=width, pool=pool)
        if pool:
            x = hpool(x)
            width //= 2

    # torch.nn.Flatten on NCHW -> (B, C*H*W) in (C, H, W) order
    x = x[:, :, :width, :]
    Bx, Hx, Wx, Cx = x.shape
    flat = jnp.transpose(x, (0, 3, 1, 2)).reshape(Bx, Cx * Hx * Wx)
    codes = linear_tanh(flat, params["w_lin"], params["b_lin"])
    return codes[:, :latent_size]


# ---------------------------------------------------------------------------
# Small self-checks of the fused conv (+pool) kernels against XLA references.
# ---------------------------------------------------------------------------
def _self_check():
    key = jax.random.PRNGKey(42)

    def ref_conv(x, w, shift):
        Cin, Cout = x.shape[-1], w.shape[1]
        r = lax.conv_general_dilated(
            x.astype(jnp.float32), w.astype(jnp.float32).reshape(3, 3, Cin, Cout),
            (1, 1), ((1, 1), (1, 1)), dimension_numbers=("NHWC", "HWIO", "NHWC"))
        r = r + shift.reshape(1, 1, 1, Cout)
        return jnp.where(r > 0, r, 0.01 * r)

    # 1) Multi-row-tile layer (exercises the clamped halo-row specs), no pool.
    k1, k2, k3 = jax.random.split(key, 3)
    B, H, Wv, Cin, Cout = 1, 32, 32, 128, 128
    x = jax.random.normal(k1, (B, H, Wv, Cin), jnp.float32).astype(jnp.bfloat16)
    w = (jax.random.normal(k2, (9 * Cin, Cout), jnp.float32)
         * (2.0 / (9 * Cin)) ** 0.5).astype(jnp.bfloat16)
    shift = 0.1 * jax.random.normal(k3, (1, Cout), jnp.float32)
    out = conv_block(x, w, shift, width=Wv, pool=False).astype(jnp.float32)
    ref = ref_conv(x, w, shift)
    rel = float(jnp.max(jnp.abs(out - ref)) / (jnp.max(jnp.abs(ref)) + 1e-6))
    assert rel < 3e-2, f"conv self-check failed: rel err {rel}"

    # 2) Fused vertical pool + horizontal pool kernel, W smaller than stored width.
    k4, k5, k6 = jax.random.split(k1, 3)
    B, H, Wv = 1, 12, 12
    xs = jax.random.normal(k4, (B, H, Wv, Cin), jnp.float32).astype(jnp.bfloat16)
    x = jnp.pad(xs, ((0, 0), (0, 0), (0, _round_up(Wv, 8) - Wv), (0, 0)))
    w = (jax.random.normal(k5, (9 * Cin, Cout), jnp.float32)
         * (2.0 / (9 * Cin)) ** 0.5).astype(jnp.bfloat16)
    shift = 0.1 * jax.random.normal(k6, (1, Cout), jnp.float32)
    out = hpool(conv_block(x, w, shift, width=Wv, pool=True)).astype(jnp.float32)
    ref = ref_conv(xs, w, shift)
    refp = jnp.max(ref.reshape(B, H // 2, 2, Wv // 2, 2, Cout), axis=(2, 4))
    rel = float(jnp.max(jnp.abs(out[:, :, :Wv // 2, :] - refp))
                / (jnp.max(jnp.abs(refp)) + 1e-6))
    assert rel < 3e-2, f"pooled conv self-check failed: rel err {rel}"
    assert bool(jnp.all(out[:, :, Wv // 2:, :] == 0.0)), "pad-column invariant violated"


if __name__ == "__main__":
    _self_check()

    # The module hard-codes 224x224 panels and Linear(6272) = 128*7*7, so spatial
    # size must be 224; batch and label dims are kept small.
    num_domains, num_contents, latent_size = 3, 5, 64
    B, H, W = 2, 224, 224

    key = jax.random.PRNGKey(0)
    k_img, k_dom, k_con, k_par = jax.random.split(key, 4)
    images = jax.random.normal(k_img, (B, 3, H, W), jnp.float32)
    domains = jax.random.normal(k_dom, (B, num_domains), jnp.float32)
    contents = jax.random.normal(k_con, (B, num_contents), jnp.float32)
    params = init_params(k_par, num_domains, num_contents, latent_size)

    fwd = jax.jit(functools.partial(encoder_forward,
                                    num_domains=num_domains,
                                    num_contents=num_contents,
                                    latent_size=latent_size))
    codes = jax.block_until_ready(fwd(params, images, domains, contents))

    assert codes.shape == (B, latent_size), codes.shape
    assert bool(jnp.all(jnp.isfinite(codes)))
    assert bool(jnp.all(jnp.abs(codes) <= 1.0 + 1e-6))   # tanh-bounded
    print("KERNEL_OK")
</pallas_src>

<mosaic_0001>
module attributes {stable_mosaic.version = 11 : i64} {
  func.func @_conv_kernel(%arg0: i32, %arg1: i32, %arg2: i32, %arg3: memref<1x16x32x128xbf16, #tpu.memory_space<vmem>>, %arg4: memref<1x1x32x128xbf16, #tpu.memory_space<vmem>>, %arg5: memref<1x1x32x128xbf16, #tpu.memory_space<vmem>>, %arg6: memref<1152x128xbf16, #tpu.memory_space<vmem>>, %arg7: memref<1x128xf32, #tpu.memory_space<vmem>>, %arg8: memref<1x16x32x128xbf16, #tpu.memory_space<vmem>>, %arg9: memref<18x48x128xbf16, #tpu.memory_space<vmem>>, %arg10: memref<18x32x384xbf16, #tpu.memory_space<vmem>>) attributes {dimension_semantics = [#tpu.dimension_semantics<parallel>, #tpu.dimension_semantics<parallel>, #tpu.dimension_semantics<arbitrary>], iteration_bounds = array<i64: 1, 1, 2>, scalar_prefetch = 0 : i64, scratch_operands = 2 : i64, tpu.core_type = #tpu.core_type<tc>, window_params = [{transform_indices = @transform_0, window_bounds = array<i64: 1, 16, 32, 128>}, {transform_indices = @transform_1, window_bounds = array<i64: 1, 1, 32, 128>}, {transform_indices = @transform_2, window_bounds = array<i64: 1, 1, 32, 128>}, {transform_indices = @transform_3, window_bounds = array<i64: 1152, 128>}, {transform_indices = @transform_4, window_bounds = array<i64: 1, 128>}, {transform_indices = @transform_5, window_bounds = array<i64: 1, 16, 32, 128>}]} {
    %c0_i32 = arith.constant 0 : i32
    %0 = arith.cmpi eq, %arg2, %c0_i32 : i32
    %1 = arith.extui %0 : i1 to i32
    %c0_i32_0 = arith.constant 0 : i32
    %2 = arith.cmpi ne, %1, %c0_i32_0 : i32
    scf.if %2 {
      %cst_52 = arith.constant 0.000000e+00 : bf16
      %54 = vector.broadcast %cst_52 : bf16 to vector<18x8x128xbf16>
      %c0_53 = arith.constant 0 : index
      %c0_54 = arith.constant 0 : index
      %c0_55 = arith.constant 0 : index
      %55 = vector.load %arg9[%c0_53, %c0_54, %c0_55] : memref<18x48x128xbf16, #tpu.memory_space<vmem>>, vector<18x8x128xbf16>
      tpu.vector_store %arg9[%c0_53, %c0_54, %c0_55], %54 {strides = array<i32>} : memref<18x48x128xbf16, #tpu.memory_space<vmem>>, vector<18x8x128xbf16>,
      %cst_56 = arith.constant 0.000000e+00 : bf16
      %56 = vector.broadcast %cst_56 : bf16 to vector<18x8x128xbf16>
      %c0_57 = arith.constant 0 : index
      %c40 = arith.constant 40 : index
      %c0_58 = arith.constant 0 : index
      %57 = vector.load %arg9[%c0_57, %c40, %c0_58] : memref<18x48x128xbf16, #tpu.memory_space<vmem>>, vector<18x8x128xbf16>
      tpu.vector_store %arg9[%c0_57, %c40, %c0_58], %56 {strides = array<i32>} : memref<18x48x128xbf16, #tpu.memory_space<vmem>>, vector<18x8x128xbf16>,
    } else {
    }
    %c0 = arith.constant 0 : index
    %c0_1 = arith.constant 0 : index
    %c0_2 = arith.constant 0 : index
    %c0_3 = arith.constant 0 : index
    %3 = vector.load %arg3[%c0, %c0_1, %c0_2, %c0_3] : memref<1x16x32x128xbf16, #tpu.memory_space<vmem>>, vector<1x16x32x128xbf16>
    %4 = vector.shape_cast %3 : vector<1x16x32x128xbf16> to vector<16x32x128xbf16>
    %c1 = arith.constant 1 : index
    %c8 = arith.constant 8 : index
    %c0_4 = arith.constant 0 : index
    %5 = vector.load %arg9[%c1, %c8, %c0_4] : memref<18x48x128xbf16, #tpu.memory_space<vmem>>, vector<16x32x128xbf16>
    tpu.vector_store %arg9[%c1, %c8, %c0_4], %4 {strides = array<i32>} : memref<18x48x128xbf16, #tpu.memory_space<vmem>>, vector<16x32x128xbf16>,
    %c0_5 = arith.constant 0 : index
    %c0_6 = arith.constant 0 : index
    %c0_7 = arith.constant 0 : index
    %c0_8 = arith.constant 0 : index
    %6 = vector.load %arg4[%c0_5, %c0_6, %c0_7, %c0_8] : memref<1x1x32x128xbf16, #tpu.memory_space<vmem>>, vector<1x1x32x128xbf16>
    %7 = vector.shape_cast %6 : vector<1x1x32x128xbf16> to vector<32x128xbf16>
    %c0_9 = arith.constant 0 : index
    %c0_10 = arith.constant 0 : index
    %c0_11 = arith.constant 0 : index
    %c0_12 = arith.constant 0 : index
    %8 = vector.load %arg5[%c0_9, %c0_10, %c0_11, %c0_12] : memref<1x1x32x128xbf16, #tpu.memory_space<vmem>>, vector<1x1x32x128xbf16>
    %9 = vector.shape_cast %8 : vector<1x1x32x128xbf16> to vector<32x128xbf16>
    %c0_i32_13 = arith.constant 0 : i32
    %10 = arith.cmpi eq, %arg2, %c0_i32_13 : i32
    %cst = arith.constant 0.000000e+00 : bf16
    %11 = vector.broadcast %cst : bf16 to vector<32x128xbf16>
    %12 = arith.select %10, %11, %7 : vector<32x128xbf16>
    %c0_14 = arith.constant 0 : index
    %c8_15 = arith.constant 8 : index
    %c0_16 = arith.constant 0 : index
    %13 = vector.load %arg9[%c0_14, %c8_15, %c0_16] : memref<18x48x128xbf16, #tpu.memory_space<vmem>>, vector<1x32x128xbf16>
    %14 = vector.shape_cast %13 : vector<1x32x128xbf16> to vector<32x128xbf16>
    %15 = vector.shape_cast %12 : vector<32x128xbf16> to vector<1x32x128xbf16>
    tpu.vector_store %arg9[%c0_14, %c8_15, %c0_16], %15 {strides = array<i32>} : memref<18x48x128xbf16, #tpu.memory_space<vmem>>, vector<1x32x128xbf16>,
    %c1_i32 = arith.constant 1 : i32
    %16 = arith.cmpi eq, %arg2, %c1_i32 : i32
    %cst_17 = arith.constant 0.000000e+00 : bf16
    %17 = vector.broadcast %cst_17 : bf16 to vector<32x128xbf16>
    %18 = arith.select %16, %17, %9 : vector<32x128xbf16>
    %c17 = arith.constant 17 : index
    %c8_18 = arith.constant 8 : index
    %c0_19 = arith.constant 0 : index
    %19 = vector.load %arg9[%c17, %c8_18, %c0_19] : memref<18x48x128xbf16, #tpu.memory_space<vmem>>, vector<1x32x128xbf16>
    %20 = vector.shape_cast %19 : vector<1x32x128xbf16> to vector<32x128xbf16>
    %21 = vector.shape_cast %18 : vector<32x128xbf16> to vector<1x32x128xbf16>
    tpu.vector_store %arg9[%c17, %c8_18, %c0_19], %21 {strides = array<i32>} : memref<18x48x128xbf16, #tpu.memory_space<vmem>>, vector<1x32x128xbf16>,
    %c0_20 = arith.constant 0 : index
    %c7 = arith.constant 7 : index
    %c0_21 = arith.constant 0 : index
    %22 = vector.load %arg9[%c0_20, %c7, %c0_21] : memref<18x48x128xbf16, #tpu.memory_space<vmem>>, vector<18x32x128xbf16>
    %c0_22 = arith.constant 0 : index
    %c0_23 = arith.constant 0 : index
    %c0_24 = arith.constant 0 : index
    %23 = vector.load %arg10[%c0_22, %c0_23, %c0_24] : memref<18x32x384xbf16, #tpu.memory_space<vmem>>, vector<18x32x128xbf16>
    tpu.vector_store %arg10[%c0_22, %c0_23, %c0_24], %22 {strides = array<i32>} : memref<18x32x384xbf16, #tpu.memory_space<vmem>>, vector<18x32x128xbf16>,
    %c0_25 = arith.constant 0 : index
    %c8_26 = arith.constant 8 : index
    %c0_27 = arith.constant 0 : index
    %24 = vector.load %arg9[%c0_25, %c8_26, %c0_27] : memref<18x48x128xbf16, #tpu.memory_space<vmem>>, vector<18x32x128xbf16>
    %c0_28 = arith.constant 0 : index
    %c0_29 = arith.constant 0 : index
    %c128 = arith.constant 128 : index
    %25 = vector.load %arg10[%c0_28, %c0_29, %c128] : memref<18x32x384xbf16, #tpu.memory_space<vmem>>, vector<18x32x128xbf16>
    tpu.vector_store %arg10[%c0_28, %c0_29, %c128], %24 {strides = array<i32>} : memref<18x32x384xbf16, #tpu.memory_space<vmem>>, vector<18x32x128xbf16>,
    %c0_30 = arith.constant 0 : index
    %c9 = arith.constant 9 : index
    %c0_31 = arith.constant 0 : index
    %26 = vector.load %arg9[%c0_30, %c9, %c0_31] : memref<18x48x128xbf16, #tpu.memory_space<vmem>>, vector<18x32x128xbf16>
    %c0_32 = arith.constant 0 : index
    %c0_33 = arith.constant 0 : index
    %c256 = arith.constant 256 : index
    %27 = vector.load %arg10[%c0_32, %c0_33, %c256] : memref<18x32x384xbf16, #tpu.memory_space<vmem>>, vector<18x32x128xbf16>
    tpu.vector_store %arg10[%c0_32, %c0_33, %c256], %26 {strides = array<i32>} : memref<18x32x384xbf16, #tpu.memory_space<vmem>>, vector<18x32x128xbf16>,
    %c0_34 = arith.constant 0 : index
    %c0_35 = arith.constant 0 : index
    %c0_36 = arith.constant 0 : index
    %28 = vector.load %arg10[%c0_34, %c0_35, %c0_36] : memref<18x32x384xbf16, #tpu.memory_space<vmem>>, vector<18x32x384xbf16>
    %29 = vector.shape_cast %28 : vector<18x32x384xbf16> to vector<576x384xbf16>
    %30 = vector.extract_strided_slice %29 {offsets = [0, 0], sizes = [512, 384], strides = [1, 1]} : vector<576x384xbf16> to vector<512x384xbf16>
    %c0_37 = arith.constant 0 : index
    %c0_38 = arith.constant 0 : index
    %31 = vector.load %arg6[%c0_37, %c0_38] : memref<1152x128xbf16, #tpu.memory_space<vmem>>, vector<384x128xbf16>
    %cst_39 = arith.constant dense<0.000000e+00> : vector<512x128xf32>
    %32 = tpu.matmul %30, %31, %cst_39 {dimension_numbers = #tpu.dot_dimension_numbers<[1], [0], [0], [1], [0, 0, 1, 1], [], []>} : vector<512x384xbf16>, vector<384x128xbf16>, vector<512x128xf32> -> vector<512x128xf32>
    %33 = vector.extract_strided_slice %29 {offsets = [32, 0], sizes = [512, 384], strides = [1, 1]} : vector<576x384xbf16> to vector<512x384xbf16>
    %c384 = arith.constant 384 : index
    %c0_40 = arith.constant 0 : index
    %34 = vector.load %arg6[%c384, %c0_40] : memref<1152x128xbf16, #tpu.memory_space<vmem>>, vector<384x128xbf16>
    %cst_41 = arith.constant dense<0.000000e+00> : vector<512x128xf32>
    %35 = tpu.matmul %33, %34, %cst_41 {dimension_numbers = #tpu.dot_dimension_numbers<[1], [0], [0], [1], [0, 0, 1, 1], [], []>} : vector<512x384xbf16>, vector<384x128xbf16>, vector<512x128xf32> -> vector<512x128xf32>
    %36 = arith.addf %32, %35 : vector<512x128xf32>
    %37 = vector.extract_strided_slice %29 {offsets = [64, 0], sizes = [512, 384], strides = [1, 1]} : vector<576x384xbf16> to vector<512x384xbf16>
    %c768 = arith.constant 768 : index
    %c0_42 = arith.constant 0 : index
    %38 = vector.load %arg6[%c768, %c0_42] : memref<1152x128xbf16, #tpu.memory_space<vmem>>, vector<384x128xbf16>
    %cst_43 = arith.constant dense<0.000000e+00> : vector<512x128xf32>
    %39 = tpu.matmul %37, %38, %cst_43 {dimension_numbers = #tpu.dot_dimension_numbers<[1], [0], [0], [1], [0, 0, 1, 1], [], []>} : vector<512x384xbf16>, vector<384x128xbf16>, vector<512x128xf32> -> vector<512x128xf32>
    %40 = arith.addf %36, %39 : vector<512x128xf32>
    %c0_44 = arith.constant 0 : index
    %c0_45 = arith.constant 0 : index
    %41 = vector.load %arg7[%c0_44, %c0_45] : memref<1x128xf32, #tpu.memory_space<vmem>>, vector<1x128xf32>
    %42 = vector.broadcast %41 : vector<1x128xf32> to vector<512x128xf32>
    %43 = arith.addf %40, %42 : vector<512x128xf32>
    %cst_46 = arith.constant 0.000000e+00 : f32
    %44 = vector.broadcast %cst_46 : f32 to vector<512x128xf32>
    %45 = arith.cmpf ogt, %43, %44 : vector<512x128xf32>
    %cst_47 = arith.constant 0.00999999977 : f32
    %46 = vector.broadcast %cst_47 : f32 to vector<512x128xf32>
    %47 = arith.mulf %46, %43 : vector<512x128xf32>
    %48 = arith.select %45, %43, %47 : vector<512x128xi1>, vector<512x128xf32>
    %49 = vector.shape_cast %48 : vector<512x128xf32> to vector<16x32x128xf32>
    %50 = arith.truncf %49 : vector<16x32x128xf32> to vector<16x32x128xbf16>
    %c0_48 = arith.constant 0 : index
    %c0_49 = arith.constant 0 : index
    %c0_50 = arith.constant 0 : index
    %c0_51 = arith.constant 0 : index
    %51 = vector.load %arg8[%c0_48, %c0_49, %c0_50, %c0_51] : memref<1x16x32x128xbf16, #tpu.memory_space<vmem>>, vector<1x16x32x128xbf16>
    %52 = vector.shape_cast %51 : vector<1x16x32x128xbf16> to vector<16x32x128xbf16>
    %53 = vector.shape_cast %50 : vector<16x32x128xbf16> to vector<1x16x32x128xbf16>
    tpu.vector_store %arg8[%c0_48, %c0_49, %c0_50, %c0_51], %53 {strides = array<i32>} : memref<1x16x32x128xbf16, #tpu.memory_space<vmem>>, vector<1x16x32x128xbf16>,
    return
  }
  func.func @transform_0(%arg0: i32, %arg1: i32, %arg2: i32) -> (i32, i32, i32, i32) {
    %c0_i32 = arith.constant 0 : i32
    %c0_i32_0 = arith.constant 0 : i32
    %c0_i32_1 = arith.constant 0 : i32
    return %arg1, %arg2, %c0_i32, %c0_i32_0 : i32, i32, i32, i32
  }
  func.func @transform_1(%arg0: i32, %arg1: i32, %arg2: i32) -> (i32, i32, i32, i32) {
    %c16_i32 = arith.constant 16 : i32
    %0 = arith.muli %arg2, %c16_i32 : i32
    %c1_i32 = arith.constant 1 : i32
    %1 = arith.subi %0, %c1_i32 : i32
    %c0_i32 = arith.constant 0 : i32
    %2 = arith.maxsi %1, %c0_i32 : i32
    %c0_i32_0 = arith.constant 0 : i32
    %c0_i32_1 = arith.constant 0 : i32
    %c0_i32_2 = arith.constant 0 : i32
    return %arg1, %2, %c0_i32_0, %c0_i32_1 : i32, i32, i32, i32
  }
  func.func @transform_2(%arg0: i32, %arg1: i32, %arg2: i32) -> (i32, i32, i32, i32) {
    %c16_i32 = arith.constant 16 : i32
    %0 = arith.muli %arg2, %c16_i32 : i32
    %c16_i32_0 = arith.constant 16 : i32
    %1 = arith.addi %0, %c16_i32_0 : i32
    %c31_i32 = arith.constant 31 : i32
    %2 = arith.minsi %1, %c31_i32 : i32
    %c0_i32 = arith.constant 0 : i32
    %c0_i32_1 = arith.constant 0 : i32
    %c0_i32_2 = arith.constant 0 : i32
    return %arg1, %2, %c0_i32, %c0_i32_1 : i32, i32, i32, i32
  }
  func.func @transform_3(%arg0: i32, %arg1: i32, %arg2: i32) -> (i32, i32) {
    %c0_i32 = arith.constant 0 : i32
    %c0_i32_0 = arith.constant 0 : i32
    return %c0_i32, %arg0 : i32, i32
  }
  func.func @transform_4(%arg0: i32, %arg1: i32, %arg2: i32) -> (i32, i32) {
    %c0_i32 = arith.constant 0 : i32
    %c0_i32_0 = arith.constant 0 : i32
    return %c0_i32, %arg0 : i32, i32
  }
  func.func @transform_5(%arg0: i32, %arg1: i32, %arg2: i32) -> (i32, i32, i32, i32) {
    %c0_i32 = arith.constant 0 : i32
    %c0_i32_0 = arith.constant 0 : i32
    return %arg1, %arg2, %c0_i32, %arg0 : i32, i32, i32, i32
  }
}

</mosaic_0001>

<bundles_post_ra>
// kernel: tpu_custom_call.1
= control target key start
LH: loop header
LB: loop body
LE: loop exit
PB: predicated region body
PF: predicated region fallthrough
CT: control target
= control target key end

     0   :  { %s9322_s0 = inlined_call_operand.hbm [shape: bf16[1,32,32,128], index: 0, kind: input, shape index: {}]   ;;  %s9323_s1 = inlined_call_operand.hbm [shape: bf16[1,32,32,128], index: 1, kind: input, shape index: {}]   ;;  %s9324_s2 = inlined_call_operand.hbm [shape: bf16[1,32,32,128], index: 2, kind: input, shape index: {}]   ;;  %s9325_s3 = inlined_call_operand.hbm [shape: bf16[1152,128], index: 3, kind: input, shape index: {}]   ;;  %s9326_s4 = inlined_call_operand.vmem [shape: f32[1,128], index: 4, kind: input, shape index: {}]   ;;  %s9327_s5 = inlined_call_operand.hbm [shape: bf16[1,32,32,128], index: 5, kind: output, shape index: {}]  }
   0x1   :  { %9437 = sst [smem:[#allocation154_spill]] %s9323_s1 }
   0x2   :  { %9438 = sst [smem:[#allocation155_spill]] %s9324_s2 }
   0x3   :  { %9439 = sst [smem:[#allocation156_spill]] %s9325_s3 }
   0x4   :  { %9440 = sst [smem:[#allocation157_spill]] %s9326_s4 }
   0x5   :  { %9441 = sst [smem:[#allocation158_spill]] %s9327_s5 }
   0x6   :  { %10 = vsyncpa [#allocation5], 0 }
   0x7   :  { %12 = vsyncpa [#allocation5 + $0x1], 0 }
   0x8   :  { %13 = vsyncpa [#allocation8], 0 }
   0x9   :  { %15 = vsyncpa [#allocation8 + $0x1], 0 }
   0xa   :  { %16 = vsyncpa [#allocation11], 0 }
   0xb   :  { %17 = vsyncpa [#allocation6], 0 }
   0xc   :  { %19 = vsyncpa [#allocation6 + $0x1], 0  ;;  %s6997_s18 = smov 0   ;;  %s6999_s19 = smov 0  }
   0xd   :  { %s7001_s20 = smov 0   ;;  %s7003_s21 = smov 0  }
   0xe   :  { %s7005_s22 = smov 0   ;;  %s7007_s23 = smov 0  }
   0xf   :  { %s7009_s24 = smov 0   ;;  %s7011_s25 = smov 0  }
  0x10   :  { %s7013_s26 = smov 0   ;;  %s7015_s27 = smov 0  }
  0x11   :  { %s7017_s28 = smov 0   ;;  %s7019_s29 = smov 0  }
  0x12 LB: > { %9442 = sst [smem:[#allocation18_spill]] %s6942_s26  ;;  %s37_s30 = sadd.s32 1, %s6950_s28  ;;  %s6954_s29 = sphi %s7019_s29, %s25_s29   ;;  %s6950_s28 = sphi %s7017_s28, %s9913_s28   ;;  %s6946_s27 = sphi %s7015_s27, %s9912_s27   ;;  %s6942_s26 = sphi %s7013_s26, %s9911_s26   ;;  %s6938_s25 = sphi %s7011_s25, %s9921_s25   ;;  %s6934_s24 = sphi %s7009_s24, %s9920_s24   ;;  %s6930_s23 = sphi %s7007_s23, %s9919_s23   ;;  %s6926_s22 = sphi %s7005_s22, %s9918_s22   ;;  %s6922_s21 = sphi %s7003_s21, %s9917_s21   ;;  %s6918_s20 = sphi %s7001_s20, %s9916_s20   ;;  %s6914_s19 = sphi %s6999_s19, %s9915_s19   ;;  %s6910_s18 = sphi %s6997_s18, %s9914_s18  }
  0x13   : > { %9443 = sst [smem:[#allocation19_spill]] %s6946_s27  ;;  %p9335_p0 = scmp.eq.s32.totalorder %s6954_s29, 0 }
  0x14   : > { %9444 = sst [smem:[#allocation20_spill]] %s6950_s28  ;;  %p38_p1 = scmp.ge.s32.totalorder %s37_s30, 2 }
  0x15   : > { %s5572_s6 = sshll.u32 %s6950_s28, 4  ;;  %s89_s8 = sadd.s32 1, %s6930_s23 }
  0x16   : > { %s5573_s7 = sadd.s32 4294967295, %s5572_s6  ;;  %s9923_s30 = smov (%p38_p1, %s37_s30), 0 }
  0x17   : > { %9445 = sst [smem:[#allocation21_spill]] %s9923_s30  ;;  %p78_p2 = scmp.gt.s32.totalorder %s5573_s7, 0 }
  0x18   : > { %p96_p3 = scmp.ne.s32.totalorder %s6930_s23, %s6926_s22  ;;  %s49_s9 = ssub.s32 %s6950_s28, %s9923_s30 }
  0x19   : > { %s5574_s10 = sshll.u32 %s9923_s30, 4  ;;  %p7068_p4 = scmp.eq.s32.totalorder %s49_s9, 0 }
  0x1a   : > { %s5575_s12 = sadd.s32 4294967295, %s5574_s10  ;;  %s9925_s7 = smov (!%p78_p2, %s5573_s7), 0 }
  0x1b   : > { %s9446_s11 = scalar_select %p7068_p4, 1, 0 }
  0x1c   : > { %p82_p5 = scmp.gt.s32.totalorder %s5575_s12, 0  ;;  %p7074_p6 = por %p96_p3, %p9335_p0 }
  0x1d   : > { %s7080_s14 = sadd.s32 16, %s5572_s6  ;;  %s7083_s15 = sadd.s32 16, %s5574_s10 }
  0x1e   : > { %s9927_s12 = smov (!%p82_p5, %s5575_s12), 0  ;;  %p9334_p12 = scmp.lt.s32.totalorder %s6954_s29, 2 }
  0x1f   : > { %s85_s16 = ssub.s32 %s9925_s7, %s9927_s12  ;;  %s289_s9 = sand.u32 1, %s6954_s29  }
  0x20   : > { %p87_p10 = scmp.eq.s32.totalorder %s85_s16, 0  ;;  %s291_s30 = sand.u32 1, %s6930_s23  }
  0x21   : > { %s5586_s5 = sshll.u32 %s291_s30, 4  ;;  %s5801_s6 = sshll.u32 %s9925_s7, 8 }
  0x22   : > { %s7088_s17 = scalar_select %p87_p10, %s6930_s23, %s89_s8  }
  0x23   : > { %s9449_s1 = sld [smem:[#allocation154_spill]]  ;;  %s293_s10 = scalar_lea.vmem [#allocation7], %s5586_s5 }
  0x24   : > { %9448 = sst [smem:[#allocation22_spill]] %s7088_s17  ;;  %s306_s12 = sshll.u32 %s293_s10, 4  ;;  %s7106_s12 = int_to_ptr.vmem [resolvable:$true] %s306_s12 }
  0x25   : > { %p7102_p13 = pnand %p9334_p12, %p7074_p6  ;;  %s7108_s30 = scalar_lea.sflag [#allocation8], %s289_s9 }
  0x27   : > { %p6696_p2 = pneg %p7102_p13 }
  0x29   : > { %s7096_s2 = scalar_lea.hbm %s9449_s1, %s5801_s6  ;;  %s6699_s7 = scalar_lea.hbm %s9449_s1, 8192 }
  0x2a   : > { %s6694_s4 = scalar_lea.hbm %s7096_s2, 256  ;;  %p6700_p6 = scmp.lt.u32.totalorder %s7096_s2, %s9449_s1 }
  0x2b   : > { %p6695_p1 = scmp.ne.s32.totalorder %s7096_s2, %s6694_s4  ;;  %p6701_p10 = scmp.lt.u32.totalorder %s6699_s7, %s6694_s4 }
  0x2c   : > { %p6703_p9 = scmp.lt.u32.totalorder %s6694_s4, %s7096_s2 }
  0x2d   : > { %p6697_p3 = pnand %p6696_p2, %p6695_p1  ;;  %p6702_p11 = por %p6701_p10, %p6700_p6 }
  0x2f   : > { %p6698_p5 = pneg %p6697_p3  ;;  %p6704_p8 = por %p6703_p9, %p6702_p11 }
  0x31   : > { %p6705_p12 = pnand %p6704_p8, %p6698_p5 }
  0x33   : > { %6708 = shalt.err (!%p6705_p12)
}
  0x34   : > { %s6709_s9 = scalar_lea.vmem %s7106_s12, 256  ;;  %s6956_s6 = smov [#allocation7]  }
  0x35   : > { %p6710_p1 = scmp.ne.s32.totalorder %s7106_s12, %s6709_s9  ;;  %s6714_s10 = sshll.u32 %s6956_s6, 4  ;;  %s6715_s10 = int_to_ptr.vmem [resolvable:$false] %s6714_s10 }
  0x36   : > { %s6716_s5 = scalar_lea.vmem %s6715_s10, 512  ;;  %p6717_p7 = scmp.lt.s32.totalorder %s7106_s12, %s6715_s10 }
  0x37   : > { %p6712_p3 = pnand %p6710_p1, %p6696_p2  ;;  %p6718_p6 = scmp.lt.s32.totalorder %s6716_s5, %s6709_s9 }
  0x39   : > { %p6713_p0 = pneg %p6712_p3  ;;  %p6719_p10 = por %p6718_p6, %p6717_p7 }
  0x3b   : > { %p6720_p9 = pnand %p6719_p10, %p6713_p0 }
  0x3d   : > { %6723 = shalt.err (!%p6720_p9)
}
  0x3e   : > { %s9336_s4 = smov 64   ;;  %s9338_s27 = smov 4  }
  0x3f   : > { %6458 = dma.hbm_to_vmem [thread:$0]  (!%p7102_p13), %s7096_s2, 256, %s7106_s12, %s7108_s30, %s9336_s4, %s9336_s4, %s9338_s27  }
  0x40   : > { %s7140_s7 = sadd.s32 4294967295, %s6954_s29   ;;  %p5578_p0 = scmp.ge.s32.totalorder %s6954_s29, 1 }
  0x41   : > { %p9340_p7 = scmp.eq.s32.totalorder %s7140_s7, 0  ;;  %p231_p11 = scmp.lt.s32.totalorder %s6954_s29, 3 }
  0x42   : > { %p9451_p12 = scmp.ne.s32.totalorder %s6926_s22, %s6922_s21  ;;  %s6959_s2 = smov [#allocation10]  }
  0x43   : > { %p7155_p5 = pnand %p5578_p0, %p231_p11  ;;  %s245_s12 = sshll.u32 %s6959_s2, 4  ;;  %s246_s12 = int_to_ptr.vmem [resolvable:$true] %s245_s12 }
  0x44   : > { %p7151_p2 = por %p9451_p12, %p9340_p7  ;;  %s5571_s21 = sadd.s32 4294967294, %s6954_s29  }
  0x45   : > { %s9453_s8 = scalar_select %p7155_p5, 1, 0 }
  0x46   : > { %s9452_s13 = scalar_select %p7151_p2, 1, 0 }
  0x47   : > { %p6448_p13 = pneg %p7155_p5  ;;  %s53_s9 = sadd.s32 1, %s6942_s26 }
  0x48   : > { %s9455_s3 = sld [smem:[#allocation156_spill]] }
  0x49   : > { %p7163_p1 = pnand %p6448_p13, %p9340_p7 }
  0x4b   : > { %p6726_p6 = pneg %p7163_p1 }
  0x4e   : > { %s6724_s5 = scalar_lea.hbm %s9455_s3, 9216 }
  0x4f   : > { %p6725_p3 = scmp.ne.s32.totalorder %s9455_s3, %s6724_s5  ;;  %p6731_p0 = scmp.lt.u32.totalorder %s6724_s5, %s9455_s3 }
  0x51   : > { %p6727_p10 = pnand %p6726_p6, %p6725_p3 }
  0x53   : > { %p6728_p9 = pneg %p6727_p10 }
  0x55   : > { %p6733_p11 = pnand %p6731_p0, %p6728_p9 }
  0x57   : > { %6736 = shalt.err (!%p6733_p11)
}
  0x58   : > { %s6737_s17 = scalar_lea.vmem %s246_s12, 9216  ;;  %p6745_p7 = scmp.lt.s32.totalorder %s246_s12, %s246_s12 }
  0x59   : > { %p6738_p12 = scmp.ne.s32.totalorder %s246_s12, %s6737_s17  ;;  %p6746_p2 = scmp.lt.s32.totalorder %s6737_s17, %s6737_s17 }
  0x5b   : > { %p6740_p13 = pnand %p6738_p12, %p6726_p6  ;;  %p6747_p5 = por %p6746_p2, %p6745_p7 }
  0x5d   : > { %p6741_p8 = pneg %p6740_p13 }
  0x5f   : > { %p6748_p4 = pnand %p6747_p5, %p6741_p8 }
  0x61   : > { %6751 = shalt.err (!%p6748_p4)
}
  0x62   : > { %s9456_s4 = smov 4   ;;  %s9457_s27 = smov 64  }
  0x63   : > { %6451 = dma.hbm_to_vmem [thread:$0]  (!%p7163_p1), %s9455_s3, 9216, %s246_s12, [#allocation11], %s9457_s27, %s9457_s27, %s9456_s4  }
  0x64   : > { %p9458_p4 = scmp.ne.s32.totalorder %s9446_s11, 0  ;;  %p60_p7 = scmp.ne.s32.totalorder %s6942_s26, %s6938_s25 }
  0x65   : > { %p66_p8 = scmp.ne.s32.totalorder %s6938_s25, %s6934_s24  ;;  %p224_p2 = scmp.eq.s32.totalorder %s5571_s21, 1 }
  0x66   : > { %s7191_s1 = scalar_select %p9458_p4, %s6942_s26, %s53_s9  }
  0x67   : > { %s265_s17 = sand.u32 1, %s6942_s26   ;;  %p9460_p5 = scmp.eq.s32.totalorder %s6954_s29, 0 }
  0x68   : > { %9459 = sst [smem:[#allocation23_spill]] %s7191_s1  ;;  %p9461_p6 = scmp.eq.s32.totalorder %s7140_s7, 0 }
  0x69   : > { %p62_p3 = por %p9460_p5, %p60_p7  ;;  %p9463_p9 = scmp.eq.s32.totalorder %s7140_s7, 1 }
  0x6a   : > { %p7202_p10 = por %p9461_p6, %p66_p8  ;;  %p7212_p1 = por %p224_p2, %p66_p8 }
  0x6b   : > { %p7208_p0 = por %p9463_p9, %p60_p7  ;;  %s5582_s12 = sshll.u32 %s265_s17, 8 }
  0x6c   : > { %s9465_s11 = scalar_select %p7212_p1, 1, 0 }
  0x6d   : > { %s9464_s5 = scalar_select %p7208_p0, 1, 0 }
  0x6e   : > { %s5800_s9 = sshll.u32 %s6950_s28, 12  ;;  %s269_s10 = scalar_lea.vmem [#allocation4], %s5582_s12 }
  0x6f   : > { %s7220_s6 = scalar_lea.hbm %s9322_s0, %s5800_s9  ;;  %s279_s3 = sshll.u32 %s269_s10, 4  ;;  %s7222_s3 = int_to_ptr.vmem [resolvable:$true] %s279_s3 }
  0x70   : > { %p9466_p11 = scmp.lt.s32.totalorder %s6954_s29, 2  ;;  %s7230_s28 = scalar_lea.sflag [#allocation5], %s265_s17 }
  0x71   : > { %s6752_s21 = scalar_lea.hbm %s7220_s6, 4096  ;;  %s6757_s2 = scalar_lea.hbm %s9322_s0, 8192 }
  0x72   : > { %p7226_p12 = pnand %p9466_p11, %p62_p3  ;;  %p6753_p13 = scmp.ne.s32.totalorder %s7220_s6, %s6752_s21 }
  0x73   : > { %p6758_p2 = scmp.lt.u32.totalorder %s7220_s6, %s9322_s0  ;;  %p6759_p5 = scmp.lt.u32.totalorder %s6757_s2, %s6752_s21 }
  0x74   : > { %p6754_p4 = pneg %p7226_p12  ;;  %p6761_p6 = scmp.lt.u32.totalorder %s6752_s21, %s7220_s6 }
  0x75   : > { %p6760_p3 = por %p6759_p5, %p6758_p2 }
  0x76   : > { %p6755_p7 = pnand %p6754_p4, %p6753_p13 }
  0x77   : > { %p6762_p9 = por %p6761_p6, %p6760_p3 }
  0x78   : > { %p6756_p8 = pneg %p6755_p7 }
  0x7a   : > { %p6763_p11 = pnand %p6762_p9, %p6756_p8 }
  0x7c   : > { %6766 = shalt.err (!%p6763_p11)
}
  0x7d   : > { %s6767_s17 = scalar_lea.vmem %s7222_s3, 4096  ;;  %s6960_s12 = smov [#allocation4]  }
  0x7e   : > { %p6768_p13 = scmp.ne.s32.totalorder %s7222_s3, %s6767_s17  ;;  %s6772_s9 = sshll.u32 %s6960_s12, 4  ;;  %s6773_s9 = int_to_ptr.vmem [resolvable:$false] %s6772_s9 }
  0x7f   : > { %s6774_s26 = scalar_lea.vmem %s6773_s9, 8192  ;;  %p6775_p0 = scmp.lt.s32.totalorder %s7222_s3, %s6773_s9 }
  0x80   : > { %p6770_p7 = pnand %p6768_p13, %p6754_p4  ;;  %p6776_p2 = scmp.lt.s32.totalorder %s6774_s26, %s6767_s17 }
  0x82   : > { %p6771_p1 = pneg %p6770_p7  ;;  %p6777_p5 = por %p6776_p2, %p6775_p0 }
  0x84   : > { %p6778_p3 = pnand %p6777_p5, %p6771_p1 }
  0x86   : > { %6781 = shalt.err (!%p6778_p3)
}
  0x87   : > { %6455 = dma.hbm_to_vmem [thread:$0]  (!%p7226_p12), %s7220_s6, 4096, %s7222_s3, %s7230_s28, %s9457_s27, %s9457_s27, %s9456_s4  }
  0x88   : > { %s125_s1 = sadd.s32 1, %s6918_s20  ;;  %p9468_p0 = scmp.lt.s32.totalorder %s7080_s14, 31 }
  0x89   : > { %p9469_p1 = scmp.lt.s32.totalorder %s7083_s15, 31  ;;  %p132_p4 = scmp.ne.s32.totalorder %s6918_s20, %s6914_s19 }
  0x8a   : > { %s9929_s14 = smov (!%p9468_p0, %s7080_s14), 31  ;;  %p138_p8 = scmp.ne.s32.totalorder %s6914_s19, %s6910_s18 }
  0x8b   : > { %s9931_s15 = smov (!%p9469_p1, %s7083_s15), 31  ;;  %s318_s2 = sand.u32 1, %s6918_s20  }
  0x8c   : > { %s121_s21 = ssub.s32 %s9929_s14, %s9931_s15  ;;  %p9470_p9 = scmp.eq.s32.totalorder %s6954_s29, 0 }
  0x8d   : > { %p123_p6 = scmp.eq.s32.totalorder %s121_s21, 0  ;;  %p9471_p13 = scmp.eq.s32.totalorder %s7140_s7, 0 }
  0x8e   : > { %p134_p11 = por %p132_p4, %p9470_p9  ;;  %s5591_s17 = sshll.u32 %s318_s2, 4 }
  0x8f   : > { %p7277_p7 = por %p138_p8, %p9471_p13  ;;  %s5802_s28 = sshll.u32 %s9929_s14, 8 }
  0x90   : > { %s7282_s3 = scalar_select %p123_p6, %s6918_s20, %s125_s1  }
  0x91   : > { %s9472_s10 = scalar_select %p7277_p7, 1, 0 }
  0x92   : > { %s9473_s9 = sld [smem:[#allocation155_spill]]  ;;  %s320_s18 = scalar_lea.vmem [#allocation9], %s5591_s17 }
  0x93   : > { %s333_s15 = sshll.u32 %s320_s18, 4  ;;  %p9474_p12 = scmp.lt.s32.totalorder %s6954_s29, 2  ;;  %s7289_s15 = int_to_ptr.vmem [resolvable:$true] %s333_s15 }
  0x95   : > { %p7293_p2 = pnand %p9474_p12, %p134_p11 }
  0x97   : > { %p6784_p3 = pneg %p7293_p2 }
  0x98   : > { %s7287_s26 = scalar_lea.hbm %s9473_s9, %s5802_s28  ;;  %s6787_s17 = scalar_lea.hbm %s9473_s9, 8192 }
  0x99   : > { %s6782_s14 = scalar_lea.hbm %s7287_s26, 256  ;;  %p6788_p4 = scmp.lt.u32.totalorder %s7287_s26, %s9473_s9 }
  0x9a   : > { %p6783_p5 = scmp.ne.s32.totalorder %s7287_s26, %s6782_s14  ;;  %p6789_p8 = scmp.lt.u32.totalorder %s6787_s17, %s6782_s14 }
  0x9b   : > { %p6791_p9 = scmp.lt.u32.totalorder %s6782_s14, %s7287_s26 }
  0x9c   : > { %p6785_p0 = pnand %p6784_p3, %p6783_p5  ;;  %p6790_p6 = por %p6789_p8, %p6788_p4 }
  0x9e   : > { %p6786_p1 = pneg %p6785_p0  ;;  %p6792_p11 = por %p6791_p9, %p6790_p6 }
  0xa0   : > { %p6793_p13 = pnand %p6792_p11, %p6786_p1 }
  0xa2   : > { %6796 = shalt.err (!%p6793_p13)
}
  0xa3   : > { %s6797_s12 = scalar_lea.vmem %s7289_s15, 256  ;;  %s6961_s18 = smov [#allocation9]  }
  0xa4   : > { %p6798_p12 = scmp.ne.s32.totalorder %s7289_s15, %s6797_s12  ;;  %s6802_s1 = sshll.u32 %s6961_s18, 4  ;;  %s6803_s1 = int_to_ptr.vmem [resolvable:$false] %s6802_s1 }
  0xa5   : > { %s6804_s2 = scalar_lea.vmem %s6803_s1, 512  ;;  %p6805_p7 = scmp.lt.s32.totalorder %s7289_s15, %s6803_s1 }
  0xa6   : > { %p6800_p5 = pnand %p6798_p12, %p6784_p3  ;;  %p6806_p4 = scmp.lt.s32.totalorder %s6804_s2, %s6797_s12 }
  0xa8   : > { %p6801_p0 = pneg %p6800_p5  ;;  %p6807_p8 = por %p6806_p4, %p6805_p7 }
  0xaa   : > { %p6808_p6 = pnand %p6807_p8, %p6801_p0 }
  0xac   : > { %6811 = shalt.err (!%p6808_p6)
}
  0xad   : > { %6461 = dma.hbm_to_vmem [thread:$0]  (!%p7293_p2), %s7287_s26, 256, %s7289_s15, %s7108_s30, %s9457_s27, %s9457_s27, %s9456_s4  }
  0xae   : > { %p9476_p3 = scmp.ne.s32.totalorder %s9453_s8, 0 }
  0xb0   : > { %345 = sbr.rel (%p9476_p3) target bundleno = 1090 (0x442), region = 40 }
  0xb7   : > { %s7329_s14 = sand.u32 1, %s6938_s25  }
  0xb8   : > { %s5596_s17 = sshll.u32 %s7329_s14, 8  ;;  %s348_s28 = scalar_lea.sflag [#allocation5], %s7329_s14 }
  0xb9   : > { %s7333_s6 = scalar_lea.vmem [#allocation4], %s5596_s17 }
  0xba   : > { %6889 = dma.done.wait (%p7202_p10), %s348_s28, 4096  }
  0xbb   : > { %6891 = vsyncadd (%p7202_p10), %s348_s28, 4294963200  ;;  %s356_s30 = sand.u32 1, %s7140_s7   ;;  %s358_s8 = sand.u32 1, %s6926_s22  }
  0xbc   : > { %s5597_s4 = sshll.u32 %s358_s8, 4  ;;  %s357_s27 = scalar_lea.sflag [#allocation8], %s356_s30 }
  0xbd   : > { %s7341_s26 = scalar_lea.vmem [#allocation7], %s5597_s4  ;;  %p9477_p7 = scmp.ne.s32.totalorder %s9452_s13, 0 }
  0xbf   : > { %6893 = dma.done.wait (%p9477_p7), %s357_s27, 256  }
  0xc0   : > { %6895 = vsyncadd (%p9477_p7), %s357_s27, 4294967040  ;;  %s367_s15 = sand.u32 1, %s6914_s19   ;;  %p9478_p10 = scmp.ne.s32.totalorder %s9472_s10, 0 }
  0xc1   : > { %s5598_s21 = sshll.u32 %s367_s15, 4 }
  0xc2   : > { %s7348_s16 = scalar_lea.vmem [#allocation9], %s5598_s21 }
  0xc3   : > { %6897 = dma.done.wait (%p9478_p10), %s357_s27, 256  }
  0xc4   : > { %6899 = vsyncadd (%p9478_p10), %s357_s27, 4294967040  ;;  %p9479_p2 = scmp.eq.s32.totalorder %s7140_s7, 0 }
  0xc6   : > { %6901 = dma.done.wait (%p9479_p2), [#allocation11], 9216   ;;  %p9480_p1 = pmov %p9479_p2 }
  0xc7   : > { %s9481_s12 = sld [smem:[#allocation19_spill]]  ;;  %s7359_s13 = scalar_lea.vmem [#allocation12], %s5596_s17 }
  0xc8   : > { %6903 = vsyncadd (%p9480_p1), [#allocation11], 4294958080 }
  0xcd   : > { %p427_p9 = scmp.eq.s32.totalorder %s9481_s12, 0  ;;  %p5601_p11 = scmp.ne.s32.totalorder %s9481_s12, 0 }
  0xce   : > { %v6962_v0 = vmov (!%p5601_p11), 0  }
  0xcf   : > { %430 = sbr.rel (%p5601_p11) target bundleno = 225 (0xe1), region = 60  ;;  %431 = vst [vmem:[#allocation2] sm:$0xf] (!%p5601_p11), %v6962_v0  ;;  %432 = vst [vmem:[#allocation2 + $0x18] sm:$0xf] (!%p5601_p11), %v6962_v0 }
  0xd0   : > { %433 = vst [vmem:[#allocation2 + $0x30] sm:$0xf] (!%p5601_p11), %v6962_v0  ;;  %434 = vst [vmem:[#allocation2 + $0x48] sm:$0xf] (!%p5601_p11), %v6962_v0 }
  0xd1   : > { %435 = vst [vmem:[#allocation2 + $0x60] sm:$0xf] (!%p5601_p11), %v6962_v0  ;;  %436 = vst [vmem:[#allocation2 + $0x78] sm:$0xf] (!%p5601_p11), %v6962_v0 }
  0xd2   : > { %437 = vst [vmem:[#allocation2 + $0x90] sm:$0xf] (!%p5601_p11), %v6962_v0  ;;  %438 = vst [vmem:[#allocation2 + $0xa8] sm:$0xf] (!%p5601_p11), %v6962_v0 }
  0xd3   : > { %439 = vst [vmem:[#allocation2 + $0xc0] sm:$0xf] (!%p5601_p11), %v6962_v0  ;;  %440 = vst [vmem:[#allocation2 + $0xd8] sm:$0xf] (!%p5601_p11), %v6962_v0 }
  0xd4   : > { %441 = vst [vmem:[#allocation2 + $0xf0] sm:$0xf] (!%p5601_p11), %v6962_v0  ;;  %442 = vst [vmem:[#allocation2 + $0x108] sm:$0xf] (!%p5601_p11), %v6962_v0 }
  0xd5   : > { %443 = vst [vmem:[#allocation2 + $0x120] sm:$0xf] (!%p5601_p11), %v6962_v0  ;;  %444 = vst [vmem:[#allocation2 + $0x138] sm:$0xf] (!%p5601_p11), %v6962_v0 }
  0xd6   : > { %445 = vst [vmem:[#allocation2 + $0x150] sm:$0xf] %v6962_v0  ;;  %446 = vst [vmem:[#allocation2 + $0x168] sm:$0xf] %v6962_v0 }
  0xd7   : > { %447 = vst [vmem:[#allocation2 + $0x180] sm:$0xf] %v6962_v0  ;;  %448 = vst [vmem:[#allocation2 + $0x198] sm:$0xf] %v6962_v0 }
  0xd8   : > { %449 = vst [vmem:[#allocation2 + $0x10] sm:$0xf0] %v6962_v0  ;;  %450 = vst [vmem:[#allocation2 + $0x28] sm:$0xf0] %v6962_v0 }
  0xd9   : > { %451 = vst [vmem:[#allocation2 + $0x40] sm:$0xf0] %v6962_v0  ;;  %452 = vst [vmem:[#allocation2 + $0x58] sm:$0xf0] %v6962_v0 }
  0xda   : > { %453 = vst [vmem:[#allocation2 + $0x70] sm:$0xf0] %v6962_v0  ;;  %454 = vst [vmem:[#allocation2 + $0x88] sm:$0xf0] %v6962_v0 }
  0xdb   : > { %455 = vst [vmem:[#allocation2 + $0xa0] sm:$0xf0] %v6962_v0  ;;  %456 = vst [vmem:[#allocation2 + $0xb8] sm:$0xf0] %v6962_v0 }
  0xdc   : > { %457 = vst [vmem:[#allocation2 + $0xd0] sm:$0xf0] %v6962_v0  ;;  %458 = vst [vmem:[#allocation2 + $0xe8] sm:$0xf0] %v6962_v0 }
  0xdd   : > { %459 = vst [vmem:[#allocation2 + $0x100] sm:$0xf0] %v6962_v0  ;;  %460 = vst [vmem:[#allocation2 + $0x118] sm:$0xf0] %v6962_v0 }
  0xde   : > { %461 = vst [vmem:[#allocation2 + $0x130] sm:$0xf0] %v6962_v0  ;;  %462 = vst [vmem:[#allocation2 + $0x148] sm:$0xf0] %v6962_v0 }
  0xdf   : > { %463 = vst [vmem:[#allocation2 + $0x160] sm:$0xf0] %v6962_v0  ;;  %464 = vst [vmem:[#allocation2 + $0x178] sm:$0xf0] %v6962_v0 }
  0xe0   : > { %465 = vst [vmem:[#allocation2 + $0x190] sm:$0xf0] %v6962_v0  ;;  %466 = vst [vmem:[#allocation2 + $0x1a8] sm:$0xf0] %v6962_v0 }
  0xe1 PF: > { %v6573_v1 = vld [vmem:[#allocation10 + $0xc0] sm:$0xff]   ;;  %v9347_v2 = vmov 0   ;;  %v6575_v4 = vld [vmem:[#allocation10 + $0xc8] sm:$0xff]   ;;  %v7371_v6 = vld [vmem:[#allocation10 + $0x150] sm:$0xff]   ;;  %vm1782_vm0 = vsmask.f32 3328 }
  0xe2   : > { %2671 = vmatprep.subr.bf16.mxu0 %v9347_v2  ;;  %v7363_v3 = vld [vmem:[#allocation10 + $0x140] sm:$0xff]   ;;  %v7367_v5 = vld [vmem:[#allocation10 + $0x148] sm:$0xff]   ;;  %v6577_v7 = vld [vmem:[#allocation10 + $0xd0] sm:$0xff]   ;;  %vm1565_vm1 = vcmask 1043456   ;;  %vm916_vm2 = vsmask.f32 4352 }
  0xe3   : > { %2672 = vmatpush1.bf16.msra.mxu0 %v6573_v1  ;;  %6420 = vmatprep.subr.bf16.mxu1 %v7363_v3  ;;  %v7376_v8 = vld [vmem:[#allocation10 + $0x158] sm:$0xff]   ;;  %v7381_v10 = vld [vmem:[#allocation10 + $0x160] sm:$0xff]   ;;  %v6583_v12 = vld [vmem:[#allocation10 + $0xe8] sm:$0xff]   ;;  %s9498_s7 = sld [smem:[#allocation19_spill]]  ;;  %s9853_s17 = sld [smem:[#allocation157_spill]] }
  0xe4   : > { %2673 = vmatprep.subr.bf16.mxu0 %v9347_v2  ;;  %6428 = vmatpush3.bf16.msra.mxu1 %v7363_v3  ;;  %v6579_v9 = vld [vmem:[#allocation10 + $0xd8] sm:$0xff]   ;;  %v6581_v11 = vld [vmem:[#allocation10 + $0xe0] sm:$0xff]   ;;  %v7386_v13 = vld [vmem:[#allocation10 + $0x168] sm:$0xff]   ;;  %s812_s10 = scalar_select %p427_p9, 1, 0 }
  0xe5   : > { %6421 = vmatprep.subr.bf16.mxu1 %v7367_v5  ;;  %v6589_v14 = vld [vmem:[%s7333_s6 + $0x60] ss:$0 sps:$4 sm:$0xff]   ;;  %v6590_v15 = vld [vmem:[%s7333_s6 + $0x64] sm:$0xff]   ;;  %v6592_v17 = vld [vmem:[%s7333_s6 + $0x6c] ss:$0 sps:$4 sm:$0xff]   ;;  %s5406_s8 = sshll.u32 %s7359_s13, 4  ;;  %s9254_s8 = int_to_ptr.vmem [resolvable:$true] %s5406_s8 }
  0xe6   : > { %774 = vst [vmem:[#allocation2 + $0xa8] sm:$0xf0] %v6589_v14  ;;  %775 = vst [vmem:[#allocation2 + $0xb0] sm:$0xff] %v6590_v15  ;;  %v1974_v16 = vshrl.u32 %v6590_v15, 16  ;;  %v1977_v18 = vshll.u32 %v6590_v15, 16  ;;  %v6585_v19 = vld [vmem:[#allocation10 + $0xf0] sm:$0xff]  }
  0xe7   : > { %2674 = vmatpush1.bf16.msra.mxu0 %v6575_v4  ;;  %v7394_v20 = vld [vmem:[#allocation10 + $0x170] sm:$0xff]   ;;  %776 = vst [vmem:[#allocation2 + $0xb8] sm:$0xf] %v6592_v17  ;;  %v6587_v23 = vld [vmem:[#allocation10 + $0xf8] sm:$0xff]   ;;  %v6591_v34 = vld [vmem:[#allocation10 + $0x100] sm:$0xff]   ;;  %s6812_s12 = scalar_lea.vmem %s9254_s8, 4096 }
  0xe8   : > { %2675 = vmatprep.subr.bf16.mxu0 %v9347_v2  ;;  %6429 = vmatpush3.bf16.msra.mxu1 %v7367_v5  ;;  %v1976_v21 = vrot.slane %v1974_v16, 4  ;;  %v6596_v22 = vld [vmem:[%s7333_s6 + $0x70] ss:$0 sps:$4 sm:$0xff]   ;;  %v1979_v24 = vrot.slane %v1977_v18, 5  ;;  %v6597_v25 = vld [vmem:[%s7333_s6 + $0x74] sm:$0xff]   ;;  %v6593_v45 = vld [vmem:[#allocation10] sm:$0xff]   ;;  %p6813_p12 = scmp.ne.s32.totalorder %s9254_s8, %s6812_s12 }
  0xe9   : > { %6422 = vmatprep.subr.bf16.mxu1 %v7371_v6  ;;  %v7401_v26 = vld [vmem:[#allocation10 + $0x178] sm:$0xff]   ;;  %777 = vst [vmem:[#allocation2 + $0xc0] sm:$0xf0] %v6596_v22  ;;  %778 = vst [vmem:[#allocation2 + $0xc8] sm:$0xff] %v6597_v25  ;;  %v2000_v29 = vshrl.u32 %v6597_v25, 16  ;;  %v2003_v30 = vshll.u32 %v6597_v25, 16 }
  0xea   : > { %v6599_v27 = vld [vmem:[%s7333_s6 + $0x7c] ss:$0 sps:$4 sm:$0xff]   ;;  %v1980_v33 = vor.u32 %v1979_v24, %v1976_v21  ;;  %v6602_v46 = vld [vmem:[%s7333_s6 + $0x80] ss:$0 sps:$4 sm:$0xff]   ;;  %v6603_v47 = vld [vmem:[%s7333_s6 + $0x84] sm:$0xff]   ;;  %p836_p13 = scmp.eq.s32.totalorder %s9498_s7, 1 }
  0xeb   : > { %2676 = vmatpush1.bf16.msra.mxu0 %v6577_v7  ;;  %779 = vst [vmem:[#allocation2 + $0xd0] sm:$0xf] %v6599_v27  ;;  %v2002_v36 = vrot.slane %v2000_v29, 4  ;;  %v2005_v37 = vrot.slane %v2003_v30, 5  ;;  %v6594_v48 = vld [vmem:[#allocation10 + $0x108] sm:$0xff]   ;;  %781 = vst [vmem:[#allocation2 + $0xe0] sm:$0xff] %v6603_v47 }
  0xec   : > { %2677 = vmatprep.subr.bf16.mxu0 %v9347_v2  ;;  %6430 = vmatpush3.bf16.msra.mxu1 %v7371_v6  ;;  %780 = vst [vmem:[#allocation2 + $0xd8] sm:$0xf0] %v6602_v46  ;;  %v6605_v54 = vld [vmem:[%s7333_s6 + $0x8c] ss:$0 sps:$4 sm:$0xff]   ;;  %v2026_v57 = vshrl.u32 %v6603_v47, 16  ;;  %v2029_v58 = vshll.u32 %v6603_v47, 16 }
  0xed   : > { %6423 = vmatprep.subr.bf16.mxu1 %v7376_v8  ;;  %v1749_v28 = vld [vmem:[#allocation2 + $0xa8] sm:$0xf0]  ;;  %v2006_v55 = vor.u32 %v2005_v37, %v2002_v36  ;;  %782 = vst [vmem:[#allocation2 + $0xe8] sm:$0xf] %v6605_v54  ;;  %v6595_v63 = vld [vmem:[#allocation10 + $0x8] sm:$0xff]   ;;  %v6598_v0 = vld [vmem:[#allocation10 + $0x110] sm:$0xff]  }
  0xee   : > { %v1966_v31 = vshrl.u32 %v1749_v28, 16  ;;  %v1969_v32 = vshll.u32 %v1749_v28, 16  ;;  %v1751_v35 = vld [vmem:[#allocation2 + $0xb8] sm:$0x1f]  ;;  %v2028_v4 = vrot.slane %v2026_v57, 4  ;;  %v6610_v14 = vld [vmem:[%s7333_s6 + $0x94] sm:$0xff]  }
  0xef   : > { %2678 = vmatpush1.bf16.msra.mxu0 %v6579_v9  ;;  %v1983_v40 = vshrl.u32 %v1751_v35, 16  ;;  %v1986_v41 = vshll.u32 %v1751_v35, 16  ;;  %v6609_v16 = vld [vmem:[%s7333_s6 + $0x90] ss:$0 sps:$4 sm:$0xff]   ;;  %784 = vst [vmem:[#allocation2 + $0xf8] sm:$0xff] %v6610_v14  ;;  %v6601_v21 = vld [vmem:[#allocation10 + $0x118] sm:$0xff]  }
  0xf0   : > { %2679 = vmatprep.subr.bf16.mxu0 %v9347_v2  ;;  %6431 = vmatpush3.bf16.msra.mxu1 %v7376_v8  ;;  %v1968_v38 = vrot.slane %v1966_v31, 4  ;;  %v1971_v39 = vrot.slane %v1969_v32, 5  ;;  %v1752_v49 = vld [vmem:[#allocation2 + $0xc0] sm:$0xf0]  ;;  %783 = vst [vmem:[#allocation2 + $0xf0] sm:$0xf0] %v6609_v16 }
  0xf1   : > { %6424 = vmatprep.subr.bf16.mxu1 %v7381_v10  ;;  %v1985_v43 = vrot.slane %v1983_v40, 4  ;;  %v1988_v44 = vrot.slane %v1986_v41, 5  ;;  %v1992_v52 = vshrl.u32 %v1752_v49, 16  ;;  %v1995_v53 = vshll.u32 %v1752_v49, 16  ;;  %v6604_v35 = vld [vmem:[#allocation10 + $0x120] sm:$0xff]   ;;  %s5868_s30 = sshll.u32 %s9498_s7, 12 }
  0xf2   : > { %v1972_v42 = vor.u32 %v1971_v39, %v1968_v38  ;;  %v1754_v56 = vld [vmem:[#allocation2 + $0xd0] sm:$0x1f]  ;;  %v2052_v28 = vshrl.u32 %v6610_v14, 16  ;;  %v2055_v29 = vshll.u32 %v6610_v14, 16  ;;  %v6606_v39 = vld [vmem:[#allocation10 + $0x18] sm:$0xff]   ;;  %p9906_p5 = scmp.ne.s32.totalorder %s9464_s5, 0 }
  0xf3   : > { %2680 = vmatpush1.bf16.msra.mxu0 %v6581_v11  ;;  %v1989_v51 = vor.u32 %v1988_v44, %v1985_v43  ;;  %v1994_v60 = vrot.slane %v1992_v52, 4  ;;  %v1997_v61 = vrot.slane %v1995_v53, 5  ;;  %v2009_v62 = vshrl.u32 %v1754_v56, 16  ;;  %v1755_v18 = vld [vmem:[#allocation2 + $0xd8] sm:$0xf0]  ;;  %v7438_v40 = vld [vmem:[%s7333_s6 + $0x4] sm:$0xff]  }
  0xf4   : > { %2681 = vmatprep.subr.bf16.mxu0 %v9347_v2  ;;  %6432 = vmatpush3.bf16.msra.mxu1 %v7381_v10  ;;  %v7412_v50 = vsel %vm1782_vm0, %v1972_v42, %v1980_v33  ;;  %v2012_v1 = vshll.u32 %v1754_v56, 16  ;;  %v2031_v11 = vrot.slane %v2029_v58, 5  ;;  %v2018_v22 = vshrl.u32 %v1755_v18, 16  ;;  %v1757_v27 = vld [vmem:[#allocation2 + $0xe8] sm:$0x1f]  ;;  %v6608_v43 = vld [vmem:[#allocation10 + $0x20] sm:$0xff]   ;;  %p6814_p0 = pnand %p6813_p12, %p9906_p5 }
  0xf5   : > { %6425 = vmatprep.subr.bf16.mxu1 %v7386_v13  ;;  %9482 = vst [vmem:[#allocation24_spill] sm:$0xff] %v7412_v50  ;;  %6220 = vmatprep.mubr.bf16.mxu1 %v7412_v50  ;;  %v7418_v59 = vsel %vm1782_vm0, %v1980_v33, %v1989_v51  ;;  %v1998_v7 = vor.u32 %v1997_v61, %v1994_v60  ;;  %v2011_v9 = vrot.slane %v2009_v62, 4  ;;  %v2035_v32 = vshrl.u32 %v1757_v27, 16  ;;  %v6615_v46 = vld [vmem:[%s7333_s6] ss:$0 sps:$4 sm:$0xff]   ;;  %v6618_v47 = vld [vmem:[%s7333_s6 + $0xa4] sm:$0xff]  }
  0xf6   : > { %9483 = vst [vmem:[#allocation25_spill] sm:$0xff] %v7418_v59  ;;  %v2032_v25 = vor.u32 %v2031_v11, %v2028_v4  ;;  %v2020_v30 = vrot.slane %v2018_v22, 4  ;;  %v2038_v33 = vshll.u32 %v1757_v27, 16  ;;  %v2054_v44 = vrot.slane %v2052_v28, 4  ;;  %757 = vst [vmem:[#allocation2 + $0x20] sm:$0xff] %v7438_v40  ;;  %v6614_v27 = vld [vmem:[#allocation10 + $0x138] sm:$0xff]   ;;  %p6815_p4 = pneg %p6814_p0 }
  0xf7   : > { %2682 = vmatpush1.bf16.msra.mxu0 %v6583_v12  ;;  %v2014_v12 = vrot.slane %v2012_v1, 5  ;;  %v7426_v15 = vsel %vm1782_vm0, %v1998_v7, %v2006_v55  ;;  %v2037_v37 = vrot.slane %v2035_v32, 4  ;;  %v952_v49 = vshrl.u32 %v7438_v40, 16  ;;  %756 = vst [vmem:[#allocation2 + $0x18] sm:$0xf0] %v6615_v46  ;;  %787 = vst [vmem:[#allocation2 + $0x110] sm:$0xff] %v6618_v47 }
  0xf8   : > { %2683 = vmatprep.subr.bf16.mxu0 %v9347_v2  ;;  %6433 = vmatpush3.bf16.msra.mxu1 %v7386_v13  ;;  %9484 = vst [vmem:[#allocation26_spill] sm:$0xff] %v7426_v15  ;;  %v2040_v38 = vrot.slane %v2038_v33, 5  ;;  %v955_v51 = vshll.u32 %v7438_v40, 16  ;;  %v1572_v56 = vrot.slane %v7438_v40, 4  ;;  %v6617_v57 = vld [vmem:[%s7333_s6 + $0xa0] ss:$0 sps:$4 sm:$0xff]  }
  0xf9   : > { %6426 = vmatprep.subr.bf16.mxu1 %v7394_v20  ;;  %v2015_v17 = vor.u32 %v2014_v12, %v2011_v9  ;;  %v2078_v58 = vshrl.u32 %v6618_v47, 16  ;;  %v2081_v60 = vshll.u32 %v6618_v47, 16  ;;  %v6611_v1 = vld [vmem:[#allocation10 + $0x130] sm:$0xff]   ;;  %v954_v7 = vrot.slane %v952_v49, 3  ;;  %786 = vst [vmem:[#allocation2 + $0x108] sm:$0xf0] %v6617_v57 }
  0xfa   : > { %v2041_v42 = vor.u32 %v2040_v38, %v2037_v37  ;;  %v957_v9 = vrot.slane %v955_v51, 4  ;;  %v6625_v37 = vld [vmem:[%s7333_s6 + $0xbc] ss:$0 sps:$4 sm:$0xff]   ;;  %s837_s18 = scalar_select %p836_p13, 1, 0 }
  0xfb   : > { %2684 = vmatpush1.bf16.msra.mxu0 %v6585_v19  ;;  %v6600_v19 = vld [vmem:[#allocation10 + $0x10] sm:$0xff]   ;;  %v7431_v24 = vsel %vm1782_vm0, %v2006_v55, %v2015_v17  ;;  %v6607_v55 = vld [vmem:[#allocation10 + $0x128] sm:$0xff]   ;;  %v2080_v11 = vrot.slane %v2078_v58, 4  ;;  %v2083_v12 = vrot.slane %v2081_v60, 5  ;;  %791 = vst [vmem:[#allocation2 + $0x130] sm:$0xf] %v6625_v37 }
  0xfc   : > { %2685 = vmatprep.subr.bf16.mxu0 %v9347_v2  ;;  %6434 = vmatpush3.bf16.msra.mxu1 %v7394_v20  ;;  %9485 = vst [vmem:[#allocation27_spill] sm:$0xff] %v7431_v24  ;;  %v7452_v52 = vsel %vm1782_vm0, %v2032_v25, %v2041_v42  ;;  %s6964_s7 = smov [#allocation12]  }
  0xfd   : > { %6427 = vmatprep.subr.bf16.mxu1 %v7401_v26  ;;  %9487 = vst [vmem:[#allocation29_spill] sm:$0xff] %v7452_v52  ;;  %v2084_v51 = vor.u32 %v2083_v12, %v2080_v11  ;;  %v7494_v12 = vld [vmem:[%s7333_s6 + $0x14] sm:$0xff]  }
  0xfe   : > { %v1460_v28 = vld [vmem:[#allocation2 + $0x18] sm:$0xf0]  ;;  %760 = vst [vmem:[#allocation2 + $0x38] sm:$0xff] %v7494_v12 }
  0xff   : > { %2686 = vmatpush1.bf16.msra.mxu0 %v6587_v23  ;;  %v2021_v23 = vshll.u32 %v1755_v18, 16  ;;  %v6620_v18 = vld [vmem:[%s7333_s6 + $0xac] ss:$0 sps:$4 sm:$0xff]  }
 0x100   : > { %2687 = vmatprep.subr.bf16.mxu0 %v9347_v2  ;;  %6435 = vmatpush3.bf16.msra.mxu1 %v7401_v26  ;;  %788 = vst [vmem:[#allocation2 + $0x118] sm:$0xf] %v6620_v18 }
 0x101   : > { %3393 = vmatprep.subr.bf16.mxu1 %v9347_v2  ;;  %v2023_v31 = vrot.slane %v2021_v23, 5  ;;  %v6619_v23 = vld [vmem:[#allocation10 + $0x30] sm:$0xff]  }
 0x103   : > { %2688 = vmatpush1.bf16.msra.mxu0 %v6591_v34  ;;  %6221 = vmatmul.mubr.bf16.vlgmr.msra.gmra.mrb[0].mxu1 %v7418_v59  ;;  %v6612_v34 = vld [vmem:[%s7333_s6 + $0x9c] ss:$0 sps:$4 sm:$0xff]   ;;  %v2024_v36 = vor.u32 %v2023_v31, %v2020_v30  ;;  %v1571_v31 = vrot.slane %v1460_v28, 4 }
 0x104   : > { %2689 = vmatprep.subr.bf16.mxu0 %v9347_v2  ;;  %3394 = vmatpush1.bf16.msra.mxu1 %v6593_v45  ;;  %785 = vst [vmem:[#allocation2 + $0x100] sm:$0xf] %v6612_v34  ;;  %v2057_v45 = vrot.slane %v2055_v29, 5  ;;  %v865_v29 = vld [vmem:[#allocation2 + $0x18] sm:$0xf8]  ;;  %v6624_v34 = vld [vmem:[%s7333_s6 + $0xb4] sm:$0xff]  }
 0x105   : > { %3395 = vmatprep.subr.bf16.mxu1 %v9347_v2  ;;  %6224 = vmatprep.mubr.bf16.mxu1 %v7426_v15  ;;  %v7443_v41 = vsel %vm1782_vm0, %v2024_v36, %v2032_v25  ;;  %v6622_v25 = vld [vmem:[%s7333_s6 + $0xc] ss:$0 sps:$4 sm:$0xff]   ;;  %v944_v32 = vshrl.u32 %v865_v29, 16  ;;  %v947_v33 = vshll.u32 %v865_v29, 16  ;;  %v6623_v36 = vld [vmem:[%s7333_s6 + $0xb0] ss:$0 sps:$4 sm:$0xff]  }
 0x106   : > { %9486 = vst [vmem:[#allocation28_spill] sm:$0xff] %v7443_v41  ;;  %758 = vst [vmem:[#allocation2 + $0x28] sm:$0xf] %v6622_v25  ;;  %v2104_v47 = vshrl.u32 %v6624_v34, 16  ;;  %v978_v25 = vshrl.u32 %v7494_v12, 16 }
 0x107   : > { %2690 = vmatpush1.bf16.msra.mxu0 %v6594_v48  ;;  %v1758_v48 = vld [vmem:[#allocation2 + $0xf0] sm:$0xf0]  ;;  %v946_v42 = vrot.slane %v944_v32, 3  ;;  %790 = vst [vmem:[#allocation2 + $0x128] sm:$0xff] %v6624_v34  ;;  %789 = vst [vmem:[#allocation2 + $0x120] sm:$0xf0] %v6623_v36 }
 0x108   : > { %2691 = vmatprep.subr.bf16.mxu0 %v9347_v2  ;;  %3396 = vmatpush1.bf16.msra.mxu1 %v6595_v63  ;;  %v2044_v53 = vshrl.u32 %v1758_v48, 16  ;;  %v2047_v54 = vshll.u32 %v1758_v48, 16  ;;  %v2058_v63 = vor.u32 %v2057_v45, %v2054_v44  ;;  %v1761_v44 = vld [vmem:[#allocation2 + $0x108] sm:$0xf0]  ;;  %v2107_v48 = vshll.u32 %v6624_v34, 16 }
 0x109   : > { %3397 = vmatprep.subr.bf16.mxu1 %v9347_v2  ;;  %v2070_v45 = vshrl.u32 %v1761_v44, 16  ;;  %v2073_v46 = vshll.u32 %v1761_v44, 16  ;;  %v1763_v57 = vld [vmem:[#allocation2 + $0x118] sm:$0x1f]  ;;  %v2106_v58 = vrot.slane %v2104_v47, 4  ;;  %v981_v32 = vshll.u32 %v7494_v12, 16 }
 0x10a   : > { %v2046_v61 = vrot.slane %v2044_v53, 4  ;;  %v2049_v62 = vrot.slane %v2047_v54, 5  ;;  %v6621_v53 = vld [vmem:[#allocation10 + $0x38] sm:$0xff]   ;;  %v2109_v60 = vrot.slane %v2107_v48, 5  ;;  %v6631_v44 = vld [vmem:[%s7333_s6 + $0xc4] sm:$0xff]  }
 0x10b   : > { %2692 = vmatpush1.bf16.msra.mxu0 %v6598_v0  ;;  %6225 = vmatmul.mubr.bf16.gmra.mrb[4].mxu1 %v7431_v24  ;;  %v6613_v0 = vld [vmem:[#allocation10 + $0x28] sm:$0xff]   ;;  %v1760_v4 = vld [vmem:[#allocation2 + $0x100] sm:$0x1f]  ;;  %v2072_v54 = vrot.slane %v2070_v45, 4  ;;  %793 = vst [vmem:[#allocation2 + $0x140] sm:$0xff] %v6631_v44 }
 0x10c   : > { %2693 = vmatprep.subr.bf16.mxu0 %v9347_v2  ;;  %3398 = vmatpush1.bf16.msra.mxu1 %v6600_v19  ;;  %v2050_v14 = vor.u32 %v2049_v62, %v2046_v61  ;;  %v2061_v16 = vshrl.u32 %v1760_v4, 16  ;;  %v2064_v17 = vshll.u32 %v1760_v4, 16  ;;  %v2087_v62 = vshrl.u32 %v1763_v57, 16 }
 0x10d   : > { %3399 = vmatprep.subr.bf16.mxu1 %v9347_v2  ;;  %6228 = vmatprep.mubr.bf16.mxu1 %v7443_v41  ;;  %v7491_v11 = vor.u32 %v2109_v60, %v2106_v58 }
 0x10e   : > { %v7463_v19 = vsel %vm1782_vm0, %v2050_v14, %v2058_v63  ;;  %v2066_v22 = vrot.slane %v2064_v17, 5  ;;  %v2089_v14 = vrot.slane %v2087_v62, 4 }
 0x10f   : > { %2694 = vmatpush1.bf16.msra.mxu0 %v6601_v21  ;;  %9488 = vst [vmem:[#allocation30_spill] sm:$0xff] %v7463_v19  ;;  %v2063_v21 = vrot.slane %v2061_v16, 4 }
 0x110   : > { %2695 = vmatprep.subr.bf16.mxu0 %v9347_v2  ;;  %3400 = vmatpush1.bf16.msra.mxu1 %v6606_v39  ;;  %v7480_v39 = vsel %vm1565_vm1, %v1571_v31, %v1572_v56  ;;  %v6629_v31 = vld [vmem:[#allocation10 + $0x48] sm:$0xff]  }
 0x111   : > { %3401 = vmatprep.subr.bf16.mxu1 %v9347_v2  ;;  %v2067_v30 = vor.u32 %v2066_v22, %v2063_v21  ;;  %2703 = vmatprep.mubr.bf16.mxu0 %v7480_v39 }
 0x113   : > { %2696 = vmatpush1.bf16.msra.mxu0 %v6604_v35  ;;  %6229 = vmatmul.mubr.bf16.gmra.mrb[8].mxu1 %v7452_v52  ;;  %v7469_v35 = vor.u32 %v957_v9, %v954_v7  ;;  %v7474_v38 = vsel %vm1782_vm0, %v2058_v63, %v2067_v30  ;;  %v2090_v63 = vshll.u32 %v1763_v57, 16  ;;  %v1462_v7 = vld [vmem:[#allocation2 + $0x28] sm:$0xf]  ;;  %v1766_v30 = vld [vmem:[#allocation2 + $0x130] sm:$0x1f] }
 0x114   : > { %2697 = vmatprep.subr.bf16.mxu0 %v9347_v2  ;;  %3402 = vmatpush1.bf16.msra.mxu1 %v6608_v43  ;;  %9489 = vst [vmem:[#allocation31_spill] sm:$0xff] %v7474_v38  ;;  %v949_v43 = vrot.slane %v947_v33, 4  ;;  %v867_v9 = vld [vmem:[#allocation2 + $0x28] sm:$0xf]  ;;  %v1574_v17 = vrot.slane %v1462_v7, 4  ;;  %v2113_v37 = vshrl.u32 %v1766_v30, 16 }
 0x115   : > { %3403 = vmatprep.subr.bf16.mxu1 %v9347_v2  ;;  %6232 = vmatprep.mubr.bf16.mxu1 %v7463_v19  ;;  %v2092_v16 = vrot.slane %v2090_v63, 5  ;;  %v961_v18 = vshrl.u32 %v867_v9, 16  ;;  %v964_v22 = vshll.u32 %v867_v9, 16  ;;  %v6632_v7 = vld [vmem:[%s7333_s6 + $0xcc] ss:$0 sps:$4 sm:$0xff]  }
 0x116   : > { %v950_v49 = vor.u32 %v949_v43, %v946_v42  ;;  %v7509_v28 = vsel %vm1565_vm1, %v1572_v56, %v1574_v17  ;;  %v2116_v56 = vshll.u32 %v1766_v30, 16  ;;  %v980_v42 = vrot.slane %v978_v25, 3  ;;  %794 = vst [vmem:[#allocation2 + $0x148] sm:$0xf] %v6632_v7 }
 0x117   : > { %2698 = vmatpush1.bf16.msra.mxu0 %v6607_v55  ;;  %v2075_v55 = vrot.slane %v2073_v46, 5  ;;  %v963_v29 = vrot.slane %v961_v18, 3  ;;  %v966_v33 = vrot.slane %v964_v22, 4  ;;  %v983_v43 = vrot.slane %v981_v32, 4  ;;  %v6637_v32 = vld [vmem:[%s7333_s6 + $0xdc] ss:$0 sps:$4 sm:$0xff]  }
 0x118   : > { %2699 = vmatprep.subr.bf16.mxu0 %v9347_v2  ;;  %3404 = vmatpush1.bf16.msra.mxu1 %v6613_v0  ;;  %v7487_v61 = vsel %vm916_vm2, %v950_v49, %v7469_v35  ;;  %v6626_v0 = vld [vmem:[#allocation10 + $0x40] sm:$0xff]   ;;  %v2115_v48 = vrot.slane %v2113_v37, 4  ;;  %v2118_v49 = vrot.slane %v2116_v56, 5  ;;  %797 = vst [vmem:[#allocation2 + $0x160] sm:$0xf] %v6637_v32 }
 0x119   : > { %3405 = vmatprep.subr.bf16.mxu1 %v9347_v2  ;;  %v2076_v4 = vor.u32 %v2075_v55, %v2072_v54  ;;  %v967_v45 = vor.u32 %v966_v33, %v963_v29  ;;  %v2130_v54 = vshrl.u32 %v6631_v44, 16  ;;  %v6636_v55 = vld [vmem:[%s7333_s6 + $0xd4] sm:$0xff]   ;;  %v7534_v9 = vor.u32 %v983_v43, %v980_v42  ;;  %v6639_v37 = vld [vmem:[#allocation10 + $0x60] sm:$0xff]  }
 0x11a   : > { %v2119_v63 = vor.u32 %v2118_v49, %v2115_v48  ;;  %796 = vst [vmem:[#allocation2 + $0x158] sm:$0xff] %v6636_v55  ;;  %v6638_v29 = vld [vmem:[#allocation10 + $0x58] sm:$0xff]   ;;  %v2156_v30 = vshrl.u32 %v6636_v55, 16  ;;  %v6642_v32 = vld [vmem:[%s7333_s6 + $0xe0] ss:$0 sps:$4 sm:$0xff]  }
 0x11b   : > { %2700 = vmatpush1.bf16.msra.mxu0 %v6611_v1  ;;  %6233 = vmatmul.mubr.bf16.gmra.mrb[12].mxu1 %v7474_v38  ;;  %v6627_v1 = vld [vmem:[%s7333_s6 + $0x10] ss:$0 sps:$4 sm:$0xff]   ;;  %v7498_v21 = vsel %vm1782_vm0, %v2076_v4, %v2084_v51  ;;  %v7525_v57 = vsel %vm916_vm2, %v7469_v35, %v967_v45  ;;  %v6640_v45 = vld [vmem:[%s7333_s6 + $0x20] ss:$0 sps:$4 sm:$0xff]   ;;  %798 = vst [vmem:[#allocation2 + $0x168] sm:$0xf0] %v6642_v32 }
 0x11c   : > { %2701 = vmatprep.subr.bf16.mxu0 %v9347_v2  ;;  %3406 = vmatpush1.bf16.msra.mxu1 %v6619_v23  ;;  %759 = vst [vmem:[#allocation2 + $0x30] sm:$0xf0] %v6627_v1  ;;  %9490 = vst [vmem:[#allocation32_spill] sm:$0xff] %v7498_v21  ;;  %v1577_v23 = vrot.slane %v7494_v12, 4  ;;  %v7540_v17 = vsel %vm1782_vm0, %v7491_v11, %v2119_v63 }
 0x11d   : > { %3407 = vmatprep.subr.bf16.mxu1 %v9347_v2  ;;  %6236 = vmatprep.mubr.bf16.mxu1 %v7498_v21  ;;  %9493 = vst [vmem:[#allocation35_spill] sm:$0xff] %v7540_v17  ;;  %762 = vst [vmem:[#allocation2 + $0x48] sm:$0xf0] %v6640_v45  ;;  %v6644_v45 = vld [vmem:[%s7333_s6 + $0xec] ss:$0 sps:$4 sm:$0xff]  }
 0x11e   : > { %800 = vst [vmem:[#allocation2 + $0x178] sm:$0xf] %v6644_v45 }
 0x11f   : > { %2702 = vmatpush1.bf16.msra.mxu0 %v6614_v27  ;;  %v2093_v27 = vor.u32 %v2092_v16, %v2089_v14  ;;  %v2132_v14 = vrot.slane %v2130_v54, 4 }
 0x120   : > { %6180 = vmatprep.subr.bf16.mxu0 %v7363_v3  ;;  %3408 = vmatpush1.bf16.msra.mxu1 %v6621_v53  ;;  %v6630_v53 = vld [vmem:[%s7333_s6 + $0xc0] ss:$0 sps:$4 sm:$0xff]  }
 0x121   : > { %3409 = vmatprep.subr.bf16.mxu1 %v9347_v2  ;;  %v7515_v40 = vsel %vm1782_vm0, %v2084_v51, %v2093_v27  ;;  %v2133_v51 = vshll.u32 %v6631_v44, 16  ;;  %792 = vst [vmem:[#allocation2 + $0x138] sm:$0xf0] %v6630_v53  ;;  %v6634_v27 = vld [vmem:[%s7333_s6 + $0x1c] ss:$0 sps:$4 sm:$0xff]  }
 0x122   : > { %2704 = vmatmul.mubr.bf16.vlgmr.msra.gmra.mrb[0].mxu0 %v7487_v61  ;;  %9491 = vst [vmem:[#allocation33_spill] sm:$0xff] %v7515_v40  ;;  %761 = vst [vmem:[#allocation2 + $0x40] sm:$0xf] %v6634_v27  ;;  %v1769_v44 = vld [vmem:[#allocation2 + $0x148] sm:$0x1f] }
 0x123   : > { %6181 = vmatpush3.bf16.msra.mxu0 %v7363_v3  ;;  %v1764_v3 = vld [vmem:[#allocation2 + $0x120] sm:$0xf0]  ;;  %2711 = vmatprep.mubr.bf16.mxu0 %v7509_v28  ;;  %v1463_v60 = vld [vmem:[#allocation2 + $0x30] sm:$0xf0]  ;;  %v2135_v16 = vrot.slane %v2133_v51, 5  ;;  %v2139_v48 = vshrl.u32 %v1769_v44, 16 }
 0x124   : > { %6182 = vmatprep.subr.bf16.mxu0 %v7367_v5  ;;  %v2096_v34 = vshrl.u32 %v1764_v3, 16  ;;  %v2099_v36 = vshll.u32 %v1764_v3, 16  ;;  %3410 = vmatpush1.bf16.msra.mxu1 %v6626_v0  ;;  %v868_v62 = vld [vmem:[#allocation2 + $0x30] sm:$0xf8]  ;;  %v1576_v0 = vrot.slane %v1463_v60, 4  ;;  %v2142_v49 = vshll.u32 %v1769_v44, 16 }
 0x125   : > { %6237 = vmatmul.mubr.bf16.gmra.mrb[16].mxu1 %v7515_v40  ;;  %3411 = vmatprep.subr.bf16.mxu1 %v9347_v2  ;;  %v970_v1 = vshrl.u32 %v868_v62, 16  ;;  %v973_v4 = vshll.u32 %v868_v62, 16  ;;  %v2136_v43 = vor.u32 %v2135_v16, %v2132_v14  ;;  %v2141_v62 = vrot.slane %v2139_v48, 4  ;;  %v871_v48 = vld [vmem:[#allocation2 + $0x48] sm:$0xf8] }
 0x126   : > { %v2098_v46 = vrot.slane %v2096_v34, 4  ;;  %v2101_v47 = vrot.slane %v2099_v36, 5  ;;  %v7545_v18 = vsel %vm1565_vm1, %v1576_v0, %v1577_v23  ;;  %v2144_v63 = vrot.slane %v2142_v49, 5 }
 0x127   : > { %6183 = vmatpush3.bf16.msra.mxu0 %v7367_v5  ;;  %v6633_v5 = vld [vmem:[#allocation10 + $0x50] sm:$0xff]   ;;  %v972_v22 = vrot.slane %v970_v1, 3  ;;  %v975_v25 = vrot.slane %v973_v4, 4  ;;  %v7575_v1 = vld [vmem:[%s7333_s6 + $0xe4] sm:$0xff]  }
 0x128   : > { %v2102_v58 = vor.u32 %v2101_v47, %v2098_v46  ;;  %6184 = vmatprep.subr.bf16.mxu0 %v7371_v6  ;;  %3412 = vmatpush1.bf16.msra.mxu1 %v6629_v31  ;;  %v2159_v31 = vshll.u32 %v6636_v55, 16  ;;  %v1767_v34 = vld [vmem:[#allocation2 + $0x138] sm:$0xf0]  ;;  %v7565_v46 = vld [vmem:[%s7333_s6 + $0x24] sm:$0xff]   ;;  %799 = vst [vmem:[#allocation2 + $0x170] sm:$0xff] %v7575_v1  ;;  %v2182_v44 = vshrl.u32 %v7575_v1, 16 }
 0x129   : > { %3413 = vmatprep.subr.bf16.mxu1 %v9347_v2  ;;  %v976_v3 = vor.u32 %v975_v25, %v972_v22  ;;  %v2122_v56 = vshrl.u32 %v1767_v34, 16  ;;  %v2125_v42 = vshll.u32 %v1767_v34, 16  ;;  %v1465_v53 = vld [vmem:[#allocation2 + $0x40] sm:$0xf]  ;;  %763 = vst [vmem:[#allocation2 + $0x50] sm:$0xff] %v7565_v46  ;;  %v1582_v55 = vrot.slane %v7565_v46, 4 }
 0x12a   : > { %2712 = vmatmul.mubr.bf16.gmra.mrb[4].mxu0 %v7525_v57  ;;  %v7532_v35 = vsel %vm1782_vm0, %v2102_v58, %v7491_v11  ;;  %v6635_v11 = vld [vmem:[%s7333_s6 + $0xd0] ss:$0 sps:$4 sm:$0xff]   ;;  %v2161_v36 = vrot.slane %v2159_v31, 5  ;;  %v1004_v58 = vshrl.u32 %v7565_v46, 16  ;;  %v1579_v0 = vrot.slane %v1465_v53, 4 }
 0x12b   : > { %9492 = vst [vmem:[#allocation34_spill] sm:$0xff] %v7532_v35  ;;  %6240 = vmatprep.mubr.bf16.mxu1 %v7532_v35  ;;  %6185 = vmatpush3.bf16.msra.mxu0 %v7371_v6  ;;  %v7557_v33 = vsel %vm916_vm2, %v976_v3, %v7534_v9  ;;  %795 = vst [vmem:[#allocation2 + $0x150] sm:$0xf0] %v6635_v11  ;;  %v2158_v6 = vrot.slane %v2156_v30, 4  ;;  %v2124_v47 = vrot.slane %v2122_v56, 4  ;;  %v1007_v14 = vshll.u32 %v7565_v46, 16 }
 0x12c   : > { %2719 = vmatprep.mubr.bf16.mxu0 %v7545_v18  ;;  %6186 = vmatprep.subr.bf16.mxu0 %v7376_v8  ;;  %v870_v54 = vld [vmem:[#allocation2 + $0x40] sm:$0xf]  ;;  %v2145_v22 = vor.u32 %v2144_v63, %v2141_v62  ;;  %v7585_v25 = vsel %vm1565_vm1, %v1577_v23, %v1579_v0  ;;  %v6645_v3 = vld [vmem:[#allocation10 + $0x68] sm:$0xff]   ;;  %v2185_v49 = vshll.u32 %v7575_v1, 16  ;;  %v999_v63 = vshll.u32 %v871_v48, 16 }
 0x12d   : > { %3414 = vmatpush1.bf16.msra.mxu1 %v6633_v5  ;;  %v7568_v51 = vor.u32 %v2161_v36, %v2158_v6  ;;  %v990_v4 = vshll.u32 %v870_v54, 16  ;;  %v1006_v5 = vrot.slane %v1004_v58, 3  ;;  %v1009_v36 = vrot.slane %v1007_v14, 4 }
 0x12e   : > { %6241 = vmatmul.mubr.bf16.gmra.mrb[20].mxu1 %v7540_v17  ;;  %3415 = vmatprep.subr.bf16.mxu1 %v9347_v2  ;;  %v7593_v23 = vsel %vm1782_vm0, %v2136_v43, %v2145_v22  ;;  %v2184_v0 = vrot.slane %v2182_v44, 4  ;;  %v1001_v22 = vrot.slane %v999_v63, 4  ;;  %v6652_v44 = vld [vmem:[%s7333_s6 + $0x30] ss:$0 sps:$4 sm:$0xff]  }
 0x12f   : > { %6187 = vmatpush3.bf16.msra.mxu0 %v7376_v8  ;;  %v2127_v8 = vrot.slane %v2125_v42, 5  ;;  %v992_v30 = vrot.slane %v990_v4, 4  ;;  %9495 = vst [vmem:[#allocation37_spill] sm:$0xff] %v7593_v23  ;;  %v6646_v4 = vld [vmem:[%s7333_s6 + $0x2c] ss:$0 sps:$4 sm:$0xff]  }
 0x130   : > { %6188 = vmatprep.subr.bf16.mxu0 %v7381_v10  ;;  %764 = vst [vmem:[#allocation2 + $0x58] sm:$0xf] %v6646_v4  ;;  %765 = vst [vmem:[#allocation2 + $0x60] sm:$0xf0] %v6652_v44 }
 0x131   : > { %3416 = vmatpush1.bf16.msra.mxu1 %v6638_v29  ;;  %v2128_v60 = vor.u32 %v2127_v8, %v2124_v47  ;;  %v1772_v29 = vld [vmem:[#allocation2 + $0x160] sm:$0x1f]  ;;  %v1466_v8 = vld [vmem:[#allocation2 + $0x48] sm:$0xf0] }
 0x132   : > { %2720 = vmatmul.mubr.bf16.gmra.mrb[8].mxu0 %v7557_v33  ;;  %3417 = vmatprep.subr.bf16.mxu1 %v9347_v2  ;;  %v1770_v7 = vld [vmem:[#allocation2 + $0x150] sm:$0xf0]  ;;  %v2165_v12 = vshrl.u32 %v1772_v29, 16  ;;  %v2168_v34 = vshll.u32 %v1772_v29, 16  ;;  %v1581_v58 = vrot.slane %v1466_v8, 4  ;;  %v2187_v29 = vrot.slane %v2185_v49, 5 }
 0x133   : > { %6189 = vmatpush3.bf16.msra.mxu0 %v7381_v10  ;;  %v987_v10 = vshrl.u32 %v870_v54, 16  ;;  %v7580_v16 = vsel %vm1782_vm0, %v2128_v60, %v2136_v43  ;;  %v2148_v27 = vshrl.u32 %v1770_v7, 16  ;;  %2727 = vmatprep.mubr.bf16.mxu0 %v7585_v25  ;;  %v2151_v31 = vshll.u32 %v1770_v7, 16  ;;  %v6649_v43 = vld [vmem:[#allocation10 + $0x70] sm:$0xff]   ;;  %v904_v41 = vld [vmem:[#allocation2 + $0x150] sm:$0xf8] }
 0x134   : > { %6190 = vmatprep.subr.bf16.mxu0 %v7386_v13  ;;  %9494 = vst [vmem:[#allocation36_spill] sm:$0xff] %v7580_v16  ;;  %6244 = vmatprep.mubr.bf16.mxu1 %v7580_v16  ;;  %v2167_v42 = vrot.slane %v2165_v12, 4  ;;  %v2170_v47 = vrot.slane %v2168_v34, 5  ;;  %v996_v60 = vshrl.u32 %v871_v48, 16  ;;  %v2188_v34 = vor.u32 %v2187_v29, %v2184_v0  ;;  %v7649_v48 = vld [vmem:[%s7333_s6 + $0x44] sm:$0xff]  }
 0x135   : > { %3418 = vmatpush1.bf16.msra.mxu1 %v6639_v37  ;;  %v989_v11 = vrot.slane %v987_v10, 3  ;;  %v2150_v6 = vrot.slane %v2148_v27, 4  ;;  %v7596_v37 = vld [vmem:[%s7333_s6 + $0xf4] sm:$0xff]   ;;  %v2153_v56 = vrot.slane %v2151_v31, 5  ;;  %v7630_v27 = vor.u32 %v1009_v36, %v1006_v5  ;;  %v1773_v31 = vld [vmem:[#allocation2 + $0x168] sm:$0xf0] }
 0x136   : > { %3419 = vmatprep.subr.bf16.mxu1 %v9347_v2  ;;  %6245 = vmatmul.mubr.bf16.gmra.mrb[24].mxu1 %v7593_v23  ;;  %802 = vst [vmem:[#allocation2 + $0x188] sm:$0xff] %v7596_v37  ;;  %v2171_v62 = vor.u32 %v2170_v47, %v2167_v42  ;;  %v998_v10 = vrot.slane %v996_v60, 3  ;;  %v2208_v7 = vshrl.u32 %v7596_v37, 16  ;;  %v2211_v32 = vshll.u32 %v7596_v37, 16  ;;  %v6650_v5 = vld [vmem:[%s7333_s6 + $0xfc] ss:$0 sps:$4 sm:$0xff]  }
 0x137   : > { %6191 = vmatpush3.bf16.msra.mxu0 %v7386_v13  ;;  %v993_v13 = vor.u32 %v992_v30, %v989_v11  ;;  %v2154_v54 = vor.u32 %v2153_v56, %v2150_v6  ;;  %v7634_v11 = vld [vmem:[%s7333_s6 + $0x34] sm:$0xff]   ;;  %v2177_v6 = vshll.u32 %v1773_v31, 16  ;;  %v1775_v36 = vld [vmem:[#allocation2 + $0x178] sm:$0x1f]  ;;  %803 = vst [vmem:[#allocation2 + $0x190] sm:$0xf] %v6650_v5 }
 0x138   : > { %6192 = vmatprep.subr.bf16.mxu0 %v7394_v20  ;;  %v7627_v14 = vsel %vm1782_vm0, %v7568_v51, %v2171_v62  ;;  %v1002_v30 = vor.u32 %v1001_v22, %v998_v10  ;;  %v2210_v12 = vrot.slane %v2208_v7, 4  ;;  %766 = vst [vmem:[#allocation2 + $0x68] sm:$0xff] %v7634_v11  ;;  %v2191_v56 = vshrl.u32 %v1775_v36, 16  ;;  %v1468_v49 = vld [vmem:[#allocation2 + $0x58] sm:$0xf]  ;;  %769 = vst [vmem:[#allocation2 + $0x80] sm:$0xff] %v7649_v48 }
 0x139   : > { %3420 = vmatpush1.bf16.msra.mxu1 %v6645_v3  ;;  %v7608_v53 = vsel %vm916_vm2, %v7534_v9, %v993_v13  ;;  %v7614_v1 = vsel %vm1782_vm0, %v2154_v54, %v7568_v51  ;;  %v7619_v9 = vsel %vm1565_vm1, %v1581_v58, %v1582_v55  ;;  %9497 = vst [vmem:[#allocation39_spill] sm:$0xff] %v7627_v14  ;;  %v6647_v3 = vld [vmem:[%s7333_s6 + $0xf0] ss:$0 sps:$4 sm:$0xff]   ;;  %v2174_v51 = vshrl.u32 %v1773_v31, 16  ;;  %v873_v54 = vld [vmem:[#allocation2 + $0x58] sm:$0xf] }
 0x13a   : > { %3421 = vmatprep.subr.bf16.mxu1 %v9347_v2  ;;  %2728 = vmatmul.mubr.bf16.gmra.mrb[12].mxu0 %v7608_v53  ;;  %9496 = vst [vmem:[#allocation38_spill] sm:$0xff] %v7614_v1  ;;  %801 = vst [vmem:[#allocation2 + $0x180] sm:$0xf0] %v6647_v3  ;;  %v2179_v13 = vrot.slane %v2177_v6, 5  ;;  %v2194_v42 = vshll.u32 %v1775_v36, 16  ;;  %v2213_v8 = vrot.slane %v2211_v32, 5 }
 0x13b   : > { %6193 = vmatpush3.bf16.msra.mxu0 %v7394_v20  ;;  %v6651_v20 = vld [vmem:[#allocation10 + $0x78] sm:$0xff]   ;;  %6248 = vmatprep.mubr.bf16.mxu1 %v7614_v1  ;;  %v2176_v37 = vrot.slane %v2174_v51, 4  ;;  %v1030_v58 = vshrl.u32 %v7634_v11, 16  ;;  %v1033_v60 = vshll.u32 %v7634_v11, 16  ;;  %v1584_v0 = vrot.slane %v1468_v49, 4 }
 0x13c   : > { %6194 = vmatprep.subr.bf16.mxu0 %v7401_v26  ;;  %2735 = vmatprep.mubr.bf16.mxu0 %v7619_v9  ;;  %v2196_v47 = vrot.slane %v2194_v42, 5  ;;  %v1016_v10 = vshll.u32 %v873_v54, 16  ;;  %v1587_v7 = vrot.slane %v7634_v11, 4  ;;  %v805_v36 = vld [vmem:[%s7341_s26 + $0x4] sm:$0xf]  ;;  %v2214_v44 = vor.u32 %v2213_v8, %v2210_v12 }
 0x13d   : > { %3422 = vmatpush1.bf16.msra.mxu1 %v6649_v43  ;;  %v2180_v45 = vor.u32 %v2179_v13, %v2176_v37  ;;  %v2193_v43 = vrot.slane %v2191_v56, 4  ;;  %v1032_v22 = vrot.slane %v1030_v58, 3  ;;  %v1035_v29 = vrot.slane %v1033_v60, 4  ;;  %v1469_v58 = vld [vmem:[#allocation2 + $0x60] sm:$0xf0] }
 0x13e   : > { %3423 = vmatprep.subr.bf16.mxu1 %v9347_v2  ;;  %6249 = vmatmul.mubr.bf16.gmra.mrb[28].mxu1 %v7627_v14  ;;  %v1018_v51 = vrot.slane %v1016_v10, 4  ;;  %v1778_v5 = vld [vmem:[#allocation2 + $0x190] sm:$0x1f]  ;;  %v813_v13 = vstv %s812_s10  ;;  %v874_v60 = vld [vmem:[#allocation2 + $0x60] sm:$0xf8]  ;;  %v1586_v8 = vrot.slane %v1469_v58, 4 }
 0x13f   : > { %6195 = vmatpush3.bf16.msra.mxu0 %v7401_v26  ;;  %v7644_v26 = vsel %vm916_vm2, %v1002_v30, %v7630_v27  ;;  %v7654_v62 = vsel %vm1782_vm0, %v2180_v45, %v2188_v34  ;;  %v2197_v63 = vor.u32 %v2196_v47, %v2193_v43  ;;  %v7665_v30 = vsel %vm1565_vm1, %v1582_v55, %v1584_v0  ;;  %v806_v45 = vld [vmem:[%s7341_s26 + $0x8] sm:$0xf]  ;;  %v6655_v47 = vld [vmem:[%s7333_s6 + $0x3c] ss:$0 sps:$4 sm:$0xff]   ;;  %v912_v50 = vld [vmem:[#allocation2 + $0x190] sm:$0xf] }
 0x140   : > { %9499 = vst [vmem:[#allocation40_spill] sm:$0xff] %v7654_v62  ;;  %6252 = vmatprep.mubr.bf16.mxu1 %v7654_v62  ;;  %v2217_v37 = vshrl.u32 %v1778_v5, 16  ;;  %v2220_v55 = vshll.u32 %v1778_v5, 16  ;;  %vm7674_vm3 = vcmp.eq.s32.totalorder %v813_v13, 1  ;;  %v807_v0 = vld [vmem:[%s7341_s26 + $0xc] sm:$0xf] }
 0x141   : > { %3424 = vmatpush1.bf16.msra.mxu1 %v6651_v20  ;;  %v1013_v20 = vshrl.u32 %v873_v54, 16  ;;  %v1776_v4 = vld [vmem:[#allocation2 + $0x180] sm:$0xf0]  ;;  %v7660_v3 = vsel %vm1782_vm0, %v2188_v34, %v2197_v63  ;;  %v804_v34 = vld [vmem:[%s7341_s26] sm:$0xf]  ;;  %v7679_v63 = vor.u32 %v1035_v29, %v1032_v22  ;;  %v1022_v10 = vshrl.u32 %v874_v60, 16 }
 0x142   : > { %4163 = vmatprep.subr.bf16.mxu1 %v9347_v2  ;;  %2736 = vmatmul.mubr.bf16.gmra.mrb[16].mxu0 %v7644_v26  ;;  %9500 = vst [vmem:[#allocation41_spill] sm:$0xff] %v7660_v3  ;;  %v2200_v32 = vshrl.u32 %v1776_v4, 16  ;;  %v2203_v6 = vshll.u32 %v1776_v4, 16  ;;  %v2219_v49 = vrot.slane %v2217_v37, 4  ;;  %v2222_v54 = vrot.slane %v2220_v55, 5  ;;  %v7692_v29 = vld [vmem:[%s7333_s6 + $0x54] sm:$0xff]  }
 0x143   : > { %v1015_v31 = vrot.slane %v1013_v20, 3  ;;  %2743 = vmatprep.mubr.bf16.mxu0 %v7665_v30  ;;  %767 = vst [vmem:[#allocation2 + $0x70] sm:$0xf] %v6655_v47  ;;  %v816_v22 = vsel %vm7674_vm3, 0, %v805_v36  ;;  %v817_v5 = vsel %vm7674_vm3, 0, %v806_v45  ;;  %772 = vst [vmem:[#allocation2 + $0x98] sm:$0xff] %v7692_v29 }
 0x144   : > { %v2202_v46 = vrot.slane %v2200_v32, 4  ;;  %v2205_v42 = vrot.slane %v2203_v6, 5  ;;  %v2223_v4 = vor.u32 %v2222_v54, %v2219_v49  ;;  %v815_v32 = vsel %vm7674_vm3, 0, %v804_v34  ;;  %s9904_s26 = sld [smem:[#allocation158_spill]]  ;;  %s6816_s10 = sshll.u32 %s6964_s7, 4  ;;  %s6817_s10 = int_to_ptr.vmem [resolvable:$false] %s6816_s10 }
 0x145   : > { %v1019_v56 = vor.u32 %v1018_v51, %v1015_v31  ;;  %v1025_v31 = vshll.u32 %v874_v60, 16  ;;  %v7700_v51 = vsel %vm1565_vm1, %v1586_v8, %v1587_v7  ;;  %v1024_v6 = vrot.slane %v1022_v10, 3  ;;  %p6819_p8 = scmp.lt.s32.totalorder %s9254_s8, %s6817_s10 }
 0x146   : > { %6253 = vmatmul.mubr.bf16.gmra.mrb[32].mxu1 %v7660_v3  ;;  %v2206_v12 = vor.u32 %v2205_v42, %v2202_v46  ;;  %v6656_v46 = vld [vmem:[%s7333_s6 + $0x40] ss:$0 sps:$4 sm:$0xff]   ;;  %v7707_v34 = vsel %vm1782_vm0, %v2214_v44, %v2223_v4  ;;  %v5650_v37 = vcombine.low %v815_v32, %v815_v32  ;;  %v7710_v55 = vcombine.low %v816_v22, %v817_v5  ;;  %v1486_v3 = vld [vmem:[#allocation2 + $0xe8] sm:$0xf] }
 0x147   : > { %v7684_v20 = vsel %vm916_vm2, %v7630_v27, %v1019_v56  ;;  %9504 = vst [vmem:[#allocation43_spill] sm:$0xff] %v7707_v34  ;;  %v1027_v36 = vrot.slane %v1025_v31, 4  ;;  %v818_v13 = vsel %vm7674_vm3, 0, %v807_v0  ;;  %768 = vst [vmem:[#allocation2 + $0x78] sm:$0xf0] %v6656_v46  ;;  %v1056_v60 = vshrl.u32 %v7649_v48, 16 }
 0x148   : > { %v7695_v27 = vsel %vm1782_vm0, %v2206_v12, %v2214_v44  ;;  %v6659_v56 = vld [vmem:[%s7333_s6 + $0x4c] ss:$0 sps:$4 sm:$0xff]   ;;  %833 = vst [vmem:[#allocation2] sm:$0xf0] %v5650_v37  ;;  %834 = vst [vmem:[#allocation2 + $0x8] sm:$0xff] %v7710_v55  ;;  %v926_v44 = vshrl.u32 %v7710_v55, 16  ;;  %v5652_v47 = vcombine.low %v818_v13, %v818_v13 }
 0x149   : > { %9503 = vst [vmem:[#allocation42_spill] sm:$0xff] %v7695_v27  ;;  %6256 = vmatprep.mubr.bf16.mxu1 %v7695_v27  ;;  %v1028_v42 = vor.u32 %v1027_v36, %v1024_v6  ;;  %v929_v45 = vshll.u32 %v7710_v55, 16  ;;  %770 = vst [vmem:[#allocation2 + $0x88] sm:$0xf] %v6659_v56  ;;  %v1059_v0 = vshll.u32 %v7649_v48, 16  ;;  %v1567_v12 = vrot.slane %v7710_v55, 4 }
 0x14a   : > { %2744 = vmatmul.mubr.bf16.gmra.mrb[20].mxu0 %v7684_v20  ;;  %v1471_v43 = vld [vmem:[#allocation2 + $0x70] sm:$0xf]  ;;  %835 = vst [vmem:[#allocation2 + $0x10] sm:$0xf] %v5652_v47  ;;  %v6660_v31 = vld [vmem:[%s7333_s6 + $0x50] ss:$0 sps:$4 sm:$0xff]   ;;  %s9905_s15 = smov %s9904_s26  ;;  %s9252_s21 = scalar_lea.hbm %s9904_s26, %s5868_s30 }
 0x14b   : > { %2751 = vmatprep.mubr.bf16.mxu0 %v7700_v51  ;;  %v7723_v54 = vsel %vm916_vm2, %v1028_v42, %v7679_v63  ;;  %v876_v58 = vld [vmem:[#allocation2 + $0x70] sm:$0xf]  ;;  %v1589_v8 = vrot.slane %v1471_v43, 4  ;;  %v928_v32 = vrot.slane %v926_v44, 3  ;;  %v931_v22 = vrot.slane %v929_v45, 4 }
 0x14c   : > { %v1039_v10 = vshrl.u32 %v876_v58, 16  ;;  %v1042_v4 = vshll.u32 %v876_v58, 16  ;;  %771 = vst [vmem:[#allocation2 + $0x90] sm:$0xf0] %v6660_v31  ;;  %v6663_v36 = vld [vmem:[%s7333_s6 + $0x5c] ss:$0 sps:$4 sm:$0xff]  }
 0x14d   : > { %v7733_v6 = vsel %vm1565_vm1, %v1587_v7, %v1589_v8  ;;  %v1058_v13 = vrot.slane %v1056_v60, 3  ;;  %v1061_v56 = vrot.slane %v1059_v0, 4  ;;  %773 = vst [vmem:[#allocation2 + $0xa0] sm:$0xf] %v6663_v36 }
 0x14e   : > { %6257 = vmatmul.mubr.bf16.gmra.mrb[36].mxu1 %v7707_v34  ;;  %9505 = vst [vmem:[#allocation44_spill] sm:$0xff] %v7733_v6  ;;  %v1041_v5 = vrot.slane %v1039_v10, 3  ;;  %v1044_v46 = vrot.slane %v1042_v4, 4  ;;  %v1472_v37 = vld [vmem:[#allocation2 + $0x78] sm:$0xf0]  ;;  %v932_v10 = vor.u32 %v931_v22, %v928_v32 }
 0x14f   : > { %v877_v55 = vld [vmem:[#allocation2 + $0x78] sm:$0xf8]  ;;  %v1457_v42 = vld [vmem:[#allocation2] sm:$0xf0]  ;;  %v1591_v44 = vrot.slane %v1472_v37, 4 }
 0x150   : > { %v862_v47 = vld [vmem:[#allocation2] sm:$0xf8]  ;;  %v1045_v43 = vor.u32 %v1044_v46, %v1041_v5  ;;  %v1048_v45 = vshrl.u32 %v877_v55, 16  ;;  %v1566_v11 = vrot.slane %v1457_v42, 4  ;;  %v1051_v8 = vshll.u32 %v877_v55, 16 }
 0x151   : > { %v918_v58 = vshrl.u32 %v862_v47, 16  ;;  %v921_v7 = vshll.u32 %v862_v47, 16  ;;  %v879_v2 = vld [vmem:[#allocation2 + $0x88] sm:$0xf]  ;;  %v1459_v34 = vld [vmem:[#allocation2 + $0x10] sm:$0xf] }
 0x152   : > { %2752 = vmatmul.mubr.bf16.gmra.mrb[24].mxu0 %v7723_v54  ;;  %v7739_v4 = vsel %vm916_vm2, %v7679_v63, %v1045_v43  ;;  %v1050_v31 = vrot.slane %v1048_v45, 3  ;;  %v1568_v60 = vsel %vm1565_vm1, %v1566_v11, %v1567_v12  ;;  %v864_v5 = vld [vmem:[#allocation2 + $0x10] sm:$0xf]  ;;  %v9507_v46 = vrot.slane %v7649_v48, 4  ;;  %v1474_v63 = vld [vmem:[#allocation2 + $0x88] sm:$0xf] }
 0x153   : > { %2759 = vmatprep.mubr.bf16.mxu0 %v7733_v6  ;;  %9506 = vst [vmem:[#allocation45_spill] sm:$0xff] %v7739_v4  ;;  %v920_v0 = vrot.slane %v918_v58, 3  ;;  %v923_v49 = vrot.slane %v921_v7, 4  ;;  %3425 = vmatprep.mubr.bf16.mxu1 %v1568_v60  ;;  %v1569_v37 = vrot.slane %v1459_v34, 4  ;;  %v935_v32 = vshrl.u32 %v864_v5, 16  ;;  %v6654_v47 = vld [vmem:[#allocation10 + $0x180] sm:$0xff]  }
 0x154   : > { %v7745_v36 = vsel %vm1565_vm1, %v1591_v44, %v9507_v46  ;;  %v938_v22 = vshll.u32 %v864_v5, 16  ;;  %v1053_v55 = vrot.slane %v1051_v8, 4  ;;  %v1062_v43 = vor.u32 %v1061_v56, %v1058_v13  ;;  %v6658_v8 = vld [vmem:[#allocation10 + $0x188] sm:$0xff]  }
 0x155   : > { %9508 = vst [vmem:[#allocation46_spill] sm:$0xff] %v7745_v36  ;;  %v924_v42 = vor.u32 %v923_v49, %v920_v0  ;;  %v1065_v45 = vshrl.u32 %v879_v2, 16  ;;  %v1068_v11 = vshll.u32 %v879_v2, 16  ;;  %v1570_v58 = vsel %vm1565_vm1, %v1567_v12, %v1569_v37 }
 0x156   : > { %v937_v7 = vrot.slane %v935_v32, 3  ;;  %v940_v27 = vrot.slane %v938_v22, 4  ;;  %v1054_v44 = vor.u32 %v1053_v55, %v1050_v31  ;;  %v1594_v60 = vrot.slane %v1474_v63, 4  ;;  %v880_v31 = vld [vmem:[#allocation2 + $0x90] sm:$0xf8]  ;;  %v6662_v32 = vld [vmem:[#allocation10 + $0x190] sm:$0xff]  }
 0x157   : > { %v933_v34 = vsel %vm916_vm2, %v924_v42, %v932_v10  ;;  %v9510_v13 = vmov 0   ;;  %v1067_v2 = vrot.slane %v1065_v45, 3  ;;  %v1070_v12 = vrot.slane %v1068_v11, 4  ;;  %v6664_v45 = vld [vmem:[#allocation10 + $0x198] sm:$0xff]  }
 0x158   : > { %3426 = vmatmul.mubr.bf16.vlgmr.msra.gmra.mrb[40].mxu1 %v933_v34  ;;  %v941_v49 = vor.u32 %v940_v27, %v937_v7  ;;  %v7752_v0 = vsel %vm916_vm2, %v1054_v44, %v1062_v43  ;;  %v9511_v56 = vmov %v9507_v46  ;;  %v1475_v46 = vld [vmem:[#allocation2 + $0x90] sm:$0xf0]  ;;  %v1082_v27 = vshrl.u32 %v7692_v29, 16 }
 0x159   : > { %4164 = vmatpush1.bf16.msra.mxu1 %v6654_v47  ;;  %3433 = vmatprep.mubr.bf16.mxu1 %v1570_v58  ;;  %9509 = vst [vmem:[#allocation47_spill] sm:$0xff] %v7752_v0  ;;  %v7758_v5 = vsel %vm1565_vm1, %v9511_v56, %v1594_v60  ;;  %v1071_v22 = vor.u32 %v1070_v12, %v1067_v2  ;;  %v1074_v55 = vshrl.u32 %v880_v31, 16  ;;  %v1077_v63 = vshll.u32 %v880_v31, 16  ;;  %v882_v60 = vld [vmem:[#allocation2 + $0xa0] sm:$0xf]  ;;  %v6666_v56 = vld [vmem:[#allocation10 + $0x1a8] sm:$0xff]  }
 0x15a   : > { %2760 = vmatmul.mubr.bf16.gmra.mrb[28].mxu0 %v7739_v4  ;;  %4165 = vmatprep.subr.bf16.mxu1 %v9510_v13  ;;  %9512 = vst [vmem:[#allocation48_spill] sm:$0xff] %v7758_v5  ;;  %v942_v37 = vsel %vm916_vm2, %v932_v10, %v941_v49  ;;  %v1085_v48 = vshll.u32 %v7692_v29, 16  ;;  %v1596_v42 = vrot.slane %v1475_v46, 4  ;;  %v1597_v47 = vrot.slane %v7692_v29, 4  ;;  %v1477_v49 = vld [vmem:[#allocation2 + $0xa0] sm:$0xf] }
 0x15b   : > { %2767 = vmatprep.mubr.bf16.mxu0 %v7745_v36  ;;  %v1084_v10 = vrot.slane %v1082_v27, 3  ;;  %v7769_v11 = vsel %vm916_vm2, %v1062_v43, %v1071_v22  ;;  %v1076_v58 = vrot.slane %v1074_v55, 3  ;;  %v1079_v7 = vrot.slane %v1077_v63, 4  ;;  %v883_v27 = vld [vmem:[#allocation2 + $0xa8] sm:$0xf8]  ;;  %v1479_v22 = vld [vmem:[#allocation2 + $0xb0] sm:$0xff] }
 0x15c   : > { %9513 = vst [vmem:[#allocation49_spill] sm:$0xff] %v7769_v11  ;;  %v1087_v44 = vrot.slane %v1085_v48, 4  ;;  %v7773_v34 = vsel %vm1565_vm1, %v1596_v42, %v1597_v47  ;;  %v1091_v43 = vshrl.u32 %v882_v60, 16  ;;  %v1094_v2 = vshll.u32 %v882_v60, 16  ;;  %v1478_v55 = vld [vmem:[#allocation2 + $0xa8] sm:$0xf0] }
 0x15d   : > { %4166 = vmatpush1.bf16.msra.mxu1 %v6658_v8  ;;  %9514 = vst [vmem:[#allocation50_spill] sm:$0xff] %v7773_v34  ;;  %v1080_v29 = vor.u32 %v1079_v7, %v1076_v58  ;;  %v1599_v12 = vrot.slane %v1477_v49, 4  ;;  %v1103_v48 = vshll.u32 %v883_v27, 16  ;;  %v1108_v42 = vshrl.u32 %v1479_v22, 16  ;;  %v6668_v7 = vld [vmem:[#allocation10 + $0x1b8] sm:$0xff]  }
 0x15e   : > { %4167 = vmatprep.subr.bf16.mxu1 %v9510_v13  ;;  %v1088_v8 = vor.u32 %v1087_v44, %v1084_v10  ;;  %v1093_v46 = vrot.slane %v1091_v43, 3  ;;  %v1111_v10 = vshll.u32 %v1479_v22, 16  ;;  %v1602_v58 = vrot.slane %v1479_v22, 4  ;;  %v885_v43 = vld [vmem:[#allocation2 + $0xb8] sm:$0xf] }
 0x15f   : > { %v1105_v60 = vrot.slane %v1103_v48, 4  ;;  %v1110_v49 = vrot.slane %v1108_v42, 3  ;;  %v1482_v48 = vld [vmem:[#allocation2 + $0xc8] sm:$0xff]  ;;  %v1481_v42 = vld [vmem:[#allocation2 + $0xc0] sm:$0xf0] }
 0x160   : > { %3434 = vmatmul.mubr.bf16.gmra.mrb[44].mxu1 %v942_v37  ;;  %v7781_v31 = vsel %vm916_vm2, %v1080_v29, %v1088_v8  ;;  %v1096_v37 = vrot.slane %v1094_v2, 4  ;;  %v1480_v2 = vld [vmem:[#allocation2 + $0xb8] sm:$0xf] }
 0x161   : > { %3441 = vmatprep.mubr.bf16.mxu1 %v7480_v39  ;;  %4168 = vmatpush1.bf16.msra.mxu1 %v6662_v32  ;;  %v6665_v39 = vld [vmem:[#allocation10 + $0x1a0] sm:$0xff]   ;;  %9515 = vst [vmem:[#allocation51_spill] sm:$0xff] %v7781_v31  ;;  %v7785_v32 = vsel %vm1565_vm1, %v1597_v47, %v1599_v12 }
 0x162   : > { %2768 = vmatmul.mubr.bf16.gmra.mrb[32].mxu0 %v7752_v0  ;;  %4169 = vmatprep.subr.bf16.mxu1 %v9510_v13  ;;  %9516 = vst [vmem:[#allocation52_spill] sm:$0xff] %v7785_v32  ;;  %v1097_v63 = vor.u32 %v1096_v37, %v1093_v46  ;;  %v1120_v46 = vshll.u32 %v885_v43, 16  ;;  %v1604_v37 = vrot.slane %v1480_v2, 4 }
 0x163   : > { %2775 = vmatprep.mubr.bf16.mxu0 %v7758_v5 }
 0x164   : > { %v7793_v44 = vsel %vm916_vm2, %v1088_v8, %v1097_v63  ;;  %v1117_v8 = vshrl.u32 %v885_v43, 16  ;;  %v7809_v63 = vsel %vm1565_vm1, %v1602_v58, %v1604_v37  ;;  %v1607_v43 = vrot.slane %v1482_v48, 4  ;;  %v888_v37 = vld [vmem:[#allocation2 + $0xd0] sm:$0xf] }
 0x165   : > { %4170 = vmatpush1.bf16.msra.mxu1 %v6664_v45  ;;  %v1601_v45 = vrot.slane %v1478_v55, 4  ;;  %9517 = vst [vmem:[#allocation53_spill] sm:$0xff] %v7793_v44  ;;  %9520 = vst [vmem:[#allocation56_spill] sm:$0xff] %v7809_v63 }
 0x166   : > { %4171 = vmatprep.subr.bf16.mxu1 %v9510_v13  ;;  %v1119_v55 = vrot.slane %v1117_v8, 3 }
 0x167   : > { %v7797_v29 = vsel %vm1565_vm1, %v1601_v45, %v1602_v58 }
 0x168   : > { %3442 = vmatmul.mubr.bf16.gmra.mrb[48].mxu1 %v7487_v61  ;;  %v1100_v61 = vshrl.u32 %v883_v27, 16  ;;  %9518 = vst [vmem:[#allocation54_spill] sm:$0xff] %v7797_v29  ;;  %v6670_v27 = vld [vmem:[#allocation10 + $0x1c8] sm:$0xff]  }
 0x169   : > { %3449 = vmatprep.mubr.bf16.mxu1 %v7509_v28  ;;  %4172 = vmatpush1.bf16.msra.mxu1 %v6665_v39  ;;  %v6667_v28 = vld [vmem:[#allocation10 + $0x1b0] sm:$0xff]   ;;  %v1113_v39 = vrot.slane %v1111_v10, 4 }
 0x16a   : > { %2776 = vmatmul.mubr.bf16.gmra.mrb[36].mxu0 %v7769_v11  ;;  %4173 = vmatprep.subr.bf16.mxu1 %v9510_v13  ;;  %v1102_v47 = vrot.slane %v1100_v61, 3  ;;  %v1122_v61 = vrot.slane %v1120_v46, 4 }
 0x16b   : > { %2783 = vmatprep.mubr.bf16.mxu0 %v7773_v34 }
 0x16c   : > { %v1106_v12 = vor.u32 %v1105_v60, %v1102_v47  ;;  %v6671_v47 = vld [vmem:[#allocation10 + $0x1d0] sm:$0xff]   ;;  %v1134_v60 = vshrl.u32 %v1482_v48, 16 }
 0x16d   : > { %4174 = vmatpush1.bf16.msra.mxu1 %v6666_v56  ;;  %v1114_v56 = vor.u32 %v1113_v39, %v1110_v49  ;;  %v1137_v49 = vshll.u32 %v1482_v48, 16  ;;  %v1606_v39 = vrot.slane %v1481_v42, 4  ;;  %v1146_v48 = vshll.u32 %v888_v37, 16 }
 0x16e   : > { %4175 = vmatprep.subr.bf16.mxu1 %v9510_v13 }
 0x16f   : > { %v7805_v22 = vsel %vm916_vm2, %v1106_v12, %v1114_v56  ;;  %v1136_v12 = vrot.slane %v1134_v60, 3  ;;  %v1139_v8 = vrot.slane %v1137_v49, 4  ;;  %v7821_v46 = vsel %vm1565_vm1, %v1606_v39, %v1607_v43  ;;  %v1485_v49 = vld [vmem:[#allocation2 + $0xe0] sm:$0xff]  ;;  %v1484_v39 = vld [vmem:[#allocation2 + $0xd8] sm:$0xf0] }
 0x170   : > { %3450 = vmatmul.mubr.bf16.gmra.mrb[52].mxu1 %v7525_v57  ;;  %v6669_v57 = vld [vmem:[#allocation10 + $0x1c0] sm:$0xff]   ;;  %9519 = vst [vmem:[#allocation55_spill] sm:$0xff] %v7805_v22  ;;  %9522 = vst [vmem:[#allocation58_spill] sm:$0xff] %v7821_v46 }
 0x171   : > { %3457 = vmatprep.mubr.bf16.mxu1 %v7545_v18  ;;  %4176 = vmatpush1.bf16.msra.mxu1 %v6667_v28  ;;  %v886_v28 = vld [vmem:[#allocation2 + $0xc0] sm:$0xf8] }
 0x172   : > { %2784 = vmatmul.mubr.bf16.gmra.mrb[40].mxu0 %v7781_v31  ;;  %4177 = vmatprep.subr.bf16.mxu1 %v9510_v13  ;;  %v1126_v10 = vshrl.u32 %v886_v28, 16  ;;  %v1129_v45 = vshll.u32 %v886_v28, 16  ;;  %v1143_v28 = vshrl.u32 %v888_v37, 16  ;;  %v1163_v37 = vshll.u32 %v1485_v49, 16 }
 0x173   : > { %2791 = vmatprep.mubr.bf16.mxu0 %v7785_v32 }
 0x174   : > { %v1128_v58 = vrot.slane %v1126_v10, 3  ;;  %v1131_v2 = vrot.slane %v1129_v45, 4  ;;  %v889_v10 = vld [vmem:[#allocation2 + $0xd8] sm:$0xf8] }
 0x175   : > { %4178 = vmatpush1.bf16.msra.mxu1 %v6668_v7  ;;  %v1123_v7 = vor.u32 %v1122_v61, %v1119_v55  ;;  %v1140_v61 = vor.u32 %v1139_v8, %v1136_v12  ;;  %v1160_v8 = vshrl.u32 %v1485_v49, 16 }
 0x176   : > { %4179 = vmatprep.subr.bf16.mxu1 %v9510_v13  ;;  %v1132_v55 = vor.u32 %v1131_v2, %v1128_v58  ;;  %v1152_v58 = vshrl.u32 %v889_v10, 16  ;;  %v1155_v2 = vshll.u32 %v889_v10, 16 }
 0x178   : > { %3458 = vmatmul.mubr.bf16.gmra.mrb[56].mxu1 %v7557_v33  ;;  %v7828_v45 = vsel %vm916_vm2, %v1132_v55, %v1140_v61  ;;  %v1612_v55 = vrot.slane %v1485_v49, 4 }
 0x179   : > { %3465 = vmatprep.mubr.bf16.mxu1 %v7585_v25  ;;  %4180 = vmatpush1.bf16.msra.mxu1 %v6669_v57  ;;  %v7817_v57 = vsel %vm916_vm2, %v1114_v56, %v1123_v7  ;;  %v6672_v56 = vld [vmem:[#allocation10 + $0x1d8] sm:$0xff]   ;;  %9523 = vst [vmem:[#allocation59_spill] sm:$0xff] %v7828_v45  ;;  %v1148_v7 = vrot.slane %v1146_v48, 4 }
 0x17a   : > { %2792 = vmatmul.mubr.bf16.gmra.mrb[44].mxu0 %v7793_v44  ;;  %4181 = vmatprep.subr.bf16.mxu1 %v9510_v13  ;;  %9521 = vst [vmem:[#allocation57_spill] sm:$0xff] %v7817_v57 }
 0x17b   : > { %2799 = vmatprep.mubr.bf16.mxu0 %v7797_v29 }
 0x17d   : > { %4182 = vmatpush1.bf16.msra.mxu1 %v6670_v27  ;;  %v1483_v27 = vld [vmem:[#allocation2 + $0xd0] sm:$0xf] }
 0x17e   : > { %4183 = vmatprep.subr.bf16.mxu1 %v9510_v13  ;;  %v1609_v42 = vrot.slane %v1483_v27, 4  ;;  %v1611_v27 = vrot.slane %v1484_v39, 4 }
 0x180   : > { %3466 = vmatmul.mubr.bf16.gmra.mrb[60].mxu1 %v7608_v53  ;;  %v7831_v60 = vsel %vm1565_vm1, %v1607_v43, %v1609_v42  ;;  %v1154_v43 = vrot.slane %v1152_v58, 3  ;;  %v1162_v42 = vrot.slane %v1160_v8, 3  ;;  %v7842_v10 = vsel %vm1565_vm1, %v1611_v27, %v1612_v55 }
 0x181   : > { %3473 = vmatprep.mubr.bf16.mxu1 %v7619_v9  ;;  %4184 = vmatpush1.bf16.msra.mxu1 %v6671_v47  ;;  %v1145_v47 = vrot.slane %v1143_v28, 3  ;;  %9524 = vst [vmem:[#allocation60_spill] sm:$0xff] %v7831_v60  ;;  %v1157_v28 = vrot.slane %v1155_v2, 4  ;;  %9526 = vst [vmem:[#allocation62_spill] sm:$0xff] %v7842_v10  ;;  %v1614_v58 = vrot.slane %v1486_v3, 4 }
 0x182   : > { %2800 = vmatmul.mubr.bf16.gmra.mrb[48].mxu0 %v7805_v22  ;;  %4185 = vmatprep.subr.bf16.mxu1 %v9510_v13 }
 0x183   : > { %2807 = vmatprep.mubr.bf16.mxu0 %v7809_v63  ;;  %v1149_v12 = vor.u32 %v1148_v7, %v1145_v47  ;;  %v891_v47 = vld [vmem:[#allocation2 + $0xe8] sm:$0xf]  ;;  %v1158_v7 = vor.u32 %v1157_v28, %v1154_v43  ;;  %v7852_v27 = vsel %vm1565_vm1, %v1612_v55, %v1614_v58  ;;  %v1488_v43 = vld [vmem:[#allocation2 + $0xf8] sm:$0xff]  ;;  %v1487_v28 = vld [vmem:[#allocation2 + $0xf0] sm:$0xf0] }
 0x184   : > { %v1169_v39 = vshrl.u32 %v891_v47, 16  ;;  %v1172_v62 = vshll.u32 %v891_v47, 16  ;;  %9528 = vst [vmem:[#allocation64_spill] sm:$0xff] %v7852_v27  ;;  %v1186_v47 = vshrl.u32 %v1488_v43, 16  ;;  %v7859_v58 = vld [vmem:[#allocation10 + $0x80] sm:$0xff]  }
 0x185   : > { %4186 = vmatpush1.bf16.msra.mxu1 %v6672_v56  ;;  %v7839_v48 = vsel %vm916_vm2, %v1140_v61, %v1149_v12  ;;  %v1165_v56 = vrot.slane %v1163_v37, 4  ;;  %v6673_v61 = vld [vmem:[#allocation10 + $0x1e0] sm:$0xff]   ;;  %6260 = vmatprep.subr.bf16.mxu0 %v7859_v58 }
 0x186   : > { %4187 = vmatprep.subr.bf16.mxu1 %v9510_v13  ;;  %9525 = vst [vmem:[#allocation61_spill] sm:$0xff] %v7839_v48  ;;  %v1171_v12 = vrot.slane %v1169_v39, 3  ;;  %v1174_v8 = vrot.slane %v1172_v62, 4  ;;  %v892_v37 = vld [vmem:[#allocation2 + $0xf0] sm:$0xf8]  ;;  %v1616_v39 = vrot.slane %v1487_v28, 4 }
 0x187   : > { %v1166_v49 = vor.u32 %v1165_v56, %v1162_v42  ;;  %v1178_v3 = vshrl.u32 %v892_v37, 16  ;;  %v1181_v56 = vshll.u32 %v892_v37, 16  ;;  %v1617_v62 = vrot.slane %v1488_v43, 4  ;;  %v1489_v37 = vld [vmem:[#allocation2 + $0x100] sm:$0xf] }
 0x188   : > { %3474 = vmatmul.mubr.bf16.gmra.mrb[64].mxu1 %v7644_v26  ;;  %v1175_v42 = vor.u32 %v1174_v8, %v1171_v12  ;;  %v1188_v1 = vrot.slane %v1186_v47, 3  ;;  %v894_v8 = vld [vmem:[#allocation2 + $0x100] sm:$0xf] }
 0x189   : > { %3481 = vmatprep.mubr.bf16.mxu1 %v7665_v30  ;;  %v7849_v2 = vsel %vm916_vm2, %v1158_v7, %v1166_v49  ;;  %4188 = vmatpush1.bf16.msra.mxu1 %v6673_v61  ;;  %v1189_v7 = vshll.u32 %v1488_v43, 16  ;;  %v1180_v55 = vrot.slane %v1178_v3, 3  ;;  %v1183_v14 = vrot.slane %v1181_v56, 4 }
 0x18a   : > { %2808 = vmatmul.mubr.bf16.gmra.mrb[52].mxu0 %v7817_v57  ;;  %9527 = vst [vmem:[#allocation63_spill] sm:$0xff] %v7849_v2  ;;  %4189 = vmatprep.subr.bf16.mxu1 %v9510_v13  ;;  %v7862_v61 = vsel %vm916_vm2, %v1166_v49, %v1175_v42  ;;  %v7865_v12 = vsel %vm1565_vm1, %v1616_v39, %v1617_v62  ;;  %v1195_v3 = vshrl.u32 %v894_v8, 16  ;;  %v1198_v16 = vshll.u32 %v894_v8, 16  ;;  %v6675_v42 = vld [vmem:[#allocation10 + $0x1e8] sm:$0xff]   ;;  %v895_v39 = vld [vmem:[#allocation2 + $0x108] sm:$0xf8] }
 0x18b   : > { %2815 = vmatprep.mubr.bf16.mxu0 %v7821_v46  ;;  %9529 = vst [vmem:[#allocation65_spill] sm:$0xff] %v7862_v61  ;;  %v1191_v23 = vrot.slane %v1189_v7, 4  ;;  %9530 = vst [vmem:[#allocation66_spill] sm:$0xff] %v7865_v12  ;;  %v1184_v43 = vor.u32 %v1183_v14, %v1180_v55  ;;  %v1619_v49 = vrot.slane %v1489_v37, 4  ;;  %v1491_v14 = vld [vmem:[#allocation2 + $0x110] sm:$0xff]  ;;  %v1207_v8 = vshll.u32 %v895_v39, 16 }
 0x18c   : > { %v1197_v47 = vrot.slane %v1195_v3, 3  ;;  %v1200_v7 = vrot.slane %v1198_v16, 4  ;;  %v1212_v37 = vshrl.u32 %v1491_v14, 16  ;;  %v1622_v16 = vrot.slane %v1491_v14, 4 }
 0x18d   : > { %v1192_v28 = vor.u32 %v1191_v23, %v1188_v1  ;;  %4190 = vmatpush1.bf16.msra.mxu1 %v6675_v42  ;;  %v7876_v17 = vsel %vm1565_vm1, %v1617_v62, %v1619_v49  ;;  %v1490_v23 = vld [vmem:[#allocation2 + $0x108] sm:$0xf0]  ;;  %v1204_v1 = vshrl.u32 %v895_v39, 16  ;;  %v1209_v42 = vrot.slane %v1207_v8, 4 }
 0x18e   : > { %9532 = vst [vmem:[#allocation68_spill] sm:$0xff] %v7876_v17  ;;  %4191 = vmatprep.subr.bf16.mxu1 %v9510_v13  ;;  %v1201_v55 = vor.u32 %v1200_v7, %v1197_v47  ;;  %v1621_v3 = vrot.slane %v1490_v23, 4  ;;  %v1214_v35 = vrot.slane %v1212_v37, 3  ;;  %v897_v47 = vld [vmem:[#allocation2 + $0x118] sm:$0xf] }
 0x18f   : > { %v7873_v56 = vsel %vm916_vm2, %v1184_v43, %v1192_v28  ;;  %v1215_v43 = vshll.u32 %v1491_v14, 16  ;;  %v1206_v62 = vrot.slane %v1204_v1, 3  ;;  %v1492_v7 = vld [vmem:[#allocation2 + $0x118] sm:$0xf]  ;;  %v1221_v23 = vshrl.u32 %v897_v47, 16 }
 0x190   : > { %3482 = vmatmul.mubr.bf16.gmra.mrb[68].mxu1 %v7684_v20  ;;  %9531 = vst [vmem:[#allocation67_spill] sm:$0xff] %v7873_v56  ;;  %v7884_v49 = vsel %vm916_vm2, %v1192_v28, %v1201_v55  ;;  %v7887_v21 = vsel %vm1565_vm1, %v1621_v3, %v1622_v16  ;;  %v1224_v38 = vshll.u32 %v897_v47, 16  ;;  %v1624_v1 = vrot.slane %v1492_v7, 4  ;;  %v6679_v28 = vld [vmem:[#allocation10 + $0x1f0] sm:$0xff]  }
 0x191   : > { %3489 = vmatprep.mubr.bf16.mxu1 %v7700_v51  ;;  %9533 = vst [vmem:[#allocation69_spill] sm:$0xff] %v7884_v49  ;;  %v1217_v40 = vrot.slane %v1215_v43, 4  ;;  %9534 = vst [vmem:[#allocation70_spill] sm:$0xff] %v7887_v21  ;;  %v1210_v39 = vor.u32 %v1209_v42, %v1206_v62  ;;  %v1223_v8 = vrot.slane %v1221_v23, 3  ;;  %v898_v43 = vld [vmem:[#allocation2 + $0x120] sm:$0xf8]  ;;  %4192 = vmatpush1.bf16.msra.mxu1 %v6679_v28 }
 0x192   : > { %2816 = vmatmul.mubr.bf16.gmra.mrb[56].mxu0 %v7828_v45  ;;  %v1226_v37 = vrot.slane %v1224_v38, 4  ;;  %v7897_v3 = vsel %vm1565_vm1, %v1622_v16, %v1624_v1  ;;  %v1494_v62 = vld [vmem:[#allocation2 + $0x128] sm:$0xff]  ;;  %4193 = vmatprep.subr.bf16.mxu1 %v9510_v13  ;;  %v1233_v47 = vshll.u32 %v898_v43, 16 }
 0x193   : > { %2823 = vmatprep.mubr.bf16.mxu0 %v7831_v60  ;;  %v1218_v14 = vor.u32 %v1217_v40, %v1214_v35  ;;  %9536 = vst [vmem:[#allocation72_spill] sm:$0xff] %v7897_v3  ;;  %v1493_v40 = vld [vmem:[#allocation2 + $0x120] sm:$0xf0]  ;;  %v1230_v35 = vshrl.u32 %v898_v43, 16  ;;  %v1238_v7 = vshrl.u32 %v1494_v62, 16  ;;  %v1627_v38 = vrot.slane %v1494_v62, 4 }
 0x194   : > { %v1227_v42 = vor.u32 %v1226_v37, %v1223_v8  ;;  %v1626_v23 = vrot.slane %v1493_v40, 4  ;;  %v1235_v13 = vrot.slane %v1233_v47, 4  ;;  %v900_v8 = vld [vmem:[#allocation2 + $0x130] sm:$0xf] }
 0x195   : > { %v7894_v55 = vsel %vm916_vm2, %v1210_v39, %v1218_v14  ;;  %v1241_v39 = vshll.u32 %v1494_v62, 16  ;;  %v1232_v16 = vrot.slane %v1230_v35, 3  ;;  %v1240_v28 = vrot.slane %v1238_v7, 3  ;;  %v1495_v37 = vld [vmem:[#allocation2 + $0x130] sm:$0xf] }
 0x196   : > { %9535 = vst [vmem:[#allocation71_spill] sm:$0xff] %v7894_v55  ;;  %v7905_v1 = vsel %vm916_vm2, %v1218_v14, %v1227_v42  ;;  %v1247_v40 = vshrl.u32 %v900_v8, 16  ;;  %v1629_v35 = vrot.slane %v1495_v37, 4  ;;  %v6682_v14 = vld [vmem:[#allocation10 + $0x1f8] sm:$0xff]  }
 0x197   : > { %9537 = vst [vmem:[#allocation73_spill] sm:$0xff] %v7905_v1  ;;  %v1236_v43 = vor.u32 %v1235_v13, %v1232_v16  ;;  %4194 = vmatpush1.bf16.msra.mxu1 %v6682_v14  ;;  %v1497_v16 = vld [vmem:[#allocation2 + $0x140] sm:$0xff]  ;;  %v1496_v13 = vld [vmem:[#allocation2 + $0x138] sm:$0xf0] }
 0x198   : > { %3490 = vmatmul.mubr.bf16.gmra.mrb[72].mxu1 %v7723_v54  ;;  %v1249_v47 = vrot.slane %v1247_v40, 3  ;;  %v1264_v40 = vshrl.u32 %v1497_v16, 16  ;;  %v1267_v14 = vshll.u32 %v1497_v16, 16 }
 0x199   : > { %3497 = vmatprep.mubr.bf16.mxu1 %v7733_v6 }
 0x19a   : > { %2824 = vmatmul.mubr.bf16.gmra.mrb[60].mxu0 %v7839_v48  ;;  %v1266_v52 = vrot.slane %v1264_v40, 3 }
 0x19b   : > { %2831 = vmatprep.mubr.bf16.mxu0 %v7842_v10 }
 0x1a0   : > { %3498 = vmatmul.mubr.bf16.gmra.mrb[76].mxu1 %v7739_v4  ;;  %v1501_v4 = vld [vmem:[#allocation2 + $0x160] sm:$0xf] }
 0x1a1   : > { %3505 = vmatprep.mubr.bf16.mxu1 %v7745_v36 }
 0x1a2   : > { %2832 = vmatmul.mubr.bf16.gmra.mrb[64].mxu0 %v7849_v2 }
 0x1a3   : > { %2839 = vmatprep.mubr.bf16.mxu0 %v7852_v27 }
 0x1a8   : > { %3506 = vmatmul.mubr.bf16.gmra.mrb[80].mxu1 %v7752_v0 }
 0x1a9   : > { %3513 = vmatprep.mubr.bf16.mxu1 %v7758_v5 }
 0x1aa   : > { %2840 = vmatmul.mubr.bf16.gmra.mrb[68].mxu0 %v7862_v61 }
 0x1ab   : > { %2847 = vmatprep.mubr.bf16.mxu0 %v7865_v12 }
 0x1b0   : > { %3514 = vmatmul.mubr.bf16.gmra.mrb[84].mxu1 %v7769_v11  ;;  %v1498_v11 = vld [vmem:[#allocation2 + $0x148] sm:$0xf] }
 0x1b1   : > { %3521 = vmatprep.mubr.bf16.mxu1 %v7773_v34  ;;  %v1269_v34 = vrot.slane %v1267_v14, 4  ;;  %v1634_v14 = vrot.slane %v1498_v11, 4 }
 0x1b2   : > { %2848 = vmatmul.mubr.bf16.gmra.mrb[72].mxu0 %v7873_v56 }
 0x1b3   : > { %2855 = vmatprep.mubr.bf16.mxu0 %v7876_v17 }
 0x1b8   : > { %3522 = vmatmul.mubr.bf16.gmra.mrb[88].mxu1 %v7781_v31  ;;  %v7908_v31 = vsel %vm1565_vm1, %v1626_v23, %v1627_v38  ;;  %v7918_v23 = vsel %vm1565_vm1, %v1627_v38, %v1629_v35  ;;  %v1631_v38 = vrot.slane %v1496_v13, 4  ;;  %v1632_v35 = vrot.slane %v1497_v16, 4 }
 0x1b9   : > { %3529 = vmatprep.mubr.bf16.mxu1 %v7785_v32  ;;  %v1243_v32 = vrot.slane %v1241_v39, 4  ;;  %9538 = vst [vmem:[#allocation74_spill] sm:$0xff] %v7908_v31  ;;  %v901_v39 = vld [vmem:[#allocation2 + $0x138] sm:$0xf8]  ;;  %9540 = vst [vmem:[#allocation76_spill] sm:$0xff] %v7918_v23 }
 0x1ba   : > { %2856 = vmatmul.mubr.bf16.gmra.mrb[76].mxu0 %v7884_v49  ;;  %v7954_v24 = vsel %vm1565_vm1, %v1632_v35, %v1634_v14 }
 0x1bb   : > { %2863 = vmatprep.mubr.bf16.mxu0 %v7887_v21  ;;  %v1244_v62 = vor.u32 %v1243_v32, %v1240_v28  ;;  %9544 = vst [vmem:[#allocation80_spill] sm:$0xff] %v7954_v24 }
 0x1bd   : > { %v7915_v42 = vsel %vm916_vm2, %v1236_v43, %v1244_v62 }
 0x1be   : > { %9539 = vst [vmem:[#allocation75_spill] sm:$0xff] %v7915_v42 }
 0x1c0   : > { %3530 = vmatmul.mubr.bf16.gmra.mrb[92].mxu1 %v7793_v44 }
 0x1c1   : > { %3537 = vmatprep.mubr.bf16.mxu1 %v7797_v29  ;;  %v1250_v29 = vshll.u32 %v900_v8, 16  ;;  %v1256_v8 = vshrl.u32 %v901_v39, 16 }
 0x1c2   : > { %2864 = vmatmul.mubr.bf16.gmra.mrb[80].mxu0 %v7894_v55 }
 0x1c3   : > { %2871 = vmatprep.mubr.bf16.mxu0 %v7897_v3  ;;  %v1252_v7 = vrot.slane %v1250_v29, 4  ;;  %v1259_v29 = vshll.u32 %v901_v39, 16 }
 0x1c5   : > { %v1253_v43 = vor.u32 %v1252_v7, %v1249_v47  ;;  %v1261_v19 = vrot.slane %v1259_v29, 4  ;;  %v7936_v47 = vsel %vm1565_vm1, %v1631_v38, %v1632_v35  ;;  %v903_v7 = vld [vmem:[#allocation2 + $0x148] sm:$0xf] }
 0x1c6   : > { %9542 = vst [vmem:[#allocation78_spill] sm:$0xff] %v7936_v47  ;;  %v1276_v29 = vshll.u32 %v903_v7, 16 }
 0x1c7   : > { %v7933_v44 = vsel %vm916_vm2, %v1244_v62, %v1253_v43  ;;  %v1273_v43 = vshrl.u32 %v903_v7, 16 }
 0x1c8   : > { %3538 = vmatmul.mubr.bf16.gmra.mrb[96].mxu1 %v7805_v22  ;;  %v1258_v22 = vrot.slane %v1256_v8, 3  ;;  %9541 = vst [vmem:[#allocation77_spill] sm:$0xff] %v7933_v44  ;;  %v1270_v8 = vor.u32 %v1269_v34, %v1266_v52  ;;  %v1499_v34 = vld [vmem:[#allocation2 + $0x150] sm:$0xf0] }
 0x1c9   : > { %3545 = vmatprep.mubr.bf16.mxu1 %v7809_v63  ;;  %v1636_v35 = vrot.slane %v1499_v34, 4 }
 0x1ca   : > { %2872 = vmatmul.mubr.bf16.gmra.mrb[84].mxu0 %v7905_v1  ;;  %v1262_v62 = vor.u32 %v1261_v19, %v1258_v22  ;;  %v1500_v19 = vld [vmem:[#allocation2 + $0x158] sm:$0xff]  ;;  %v1282_v22 = vshrl.u32 %v904_v41, 16 }
 0x1cb   : > { %2879 = vmatprep.mubr.bf16.mxu0 %v7908_v31  ;;  %v1637_v14 = vrot.slane %v1500_v19, 4 }
 0x1cc   : > { %v7951_v38 = vsel %vm916_vm2, %v1262_v62, %v1270_v8  ;;  %v1284_v5 = vrot.slane %v1282_v22, 3 }
 0x1cd   : > { %9543 = vst [vmem:[#allocation79_spill] sm:$0xff] %v7951_v38 }
 0x1d0   : > { %3546 = vmatmul.mubr.bf16.gmra.mrb[100].mxu1 %v7817_v57  ;;  %v1278_v57 = vrot.slane %v1276_v29, 4  ;;  %v1290_v29 = vshrl.u32 %v1500_v19, 16 }
 0x1d1   : > { %3553 = vmatprep.mubr.bf16.mxu1 %v7821_v46  ;;  %v1275_v46 = vrot.slane %v1273_v43, 3  ;;  %v1285_v43 = vshll.u32 %v904_v41, 16  ;;  %v906_v41 = vld [vmem:[#allocation2 + $0x160] sm:$0xf] }
 0x1d2   : > { %2880 = vmatmul.mubr.bf16.gmra.mrb[88].mxu0 %v7915_v42  ;;  %v1292_v59 = vrot.slane %v1290_v29, 3  ;;  %v1639_v29 = vrot.slane %v1501_v4, 4 }
 0x1d3   : > { %2887 = vmatprep.mubr.bf16.mxu0 %v7918_v23  ;;  %v1279_v62 = vor.u32 %v1278_v57, %v1275_v46  ;;  %v1287_v15 = vrot.slane %v1285_v43, 4  ;;  %v7972_v57 = vsel %vm1565_vm1, %v1636_v35, %v1637_v14  ;;  %v1302_v43 = vshll.u32 %v906_v41, 16 }
 0x1d4   : > { %9548 = vst [vmem:[#allocation84_spill] sm:$0xff] %v7972_v57 }
 0x1d5   : > { %v7969_v0 = vsel %vm916_vm2, %v1270_v8, %v1279_v62  ;;  %v1288_v8 = vor.u32 %v1287_v15, %v1284_v5  ;;  %v1299_v62 = vshrl.u32 %v906_v41, 16  ;;  %v1502_v5 = vld [vmem:[#allocation2 + $0x168] sm:$0xf0] }
 0x1d6   : > { %v7920_v32 = vpop.f32.mrb[0].mxu1  ;;  %9547 = vst [vmem:[#allocation83_spill] sm:$0xff] %v7969_v0 }
 0x1d7   : > { %v7923_v28 = vpop.f32.mrb[1].mxu1 }
 0x1d8   : > { %v7925_v37 = vpop.f32.mrb[2].mxu1  ;;  %3554 = vmatmul.mubr.bf16.gmra.mrb[104].mxu1 %v7828_v45 }
 0x1d9   : > { %v7928_v63 = vpop.f32.mrb[3].mxu1  ;;  %3561 = vmatprep.mubr.bf16.mxu1 %v7831_v60  ;;  %v1293_v60 = vshll.u32 %v1500_v19, 16 }
 0x1da   : > { %2888 = vmatmul.mubr.bf16.gmra.mrb[92].mxu0 %v7933_v44 }
 0x1db   : > { %2895 = vmatprep.mubr.bf16.mxu0 %v7936_v47  ;;  %v1295_v36 = vrot.slane %v1293_v60, 4 }
 0x1dd   : > { %v1296_v22 = vor.u32 %v1295_v36, %v1292_v59  ;;  %v7994_v59 = vsel %vm1565_vm1, %v1637_v14, %v1639_v29  ;;  %v1503_v36 = vld [vmem:[#allocation2 + $0x170] sm:$0xff] }
 0x1de   : > { %v7938_v39 = vpop.f32.mrb[4].mxu1  ;;  %9556 = vst [vmem:[#allocation92_spill] sm:$0xff] %v7994_v59 }
 0x1df   : > { %v7941_v16 = vpop.f32.mrb[5].mxu1 }
 0x1e0   : > { %v7943_v13 = vpop.f32.mrb[6].mxu1  ;;  %3562 = vmatmul.mubr.bf16.gmra.mrb[108].mxu1 %v7839_v48 }
 0x1e1   : > { %v7946_v40 = vpop.f32.mrb[7].mxu1  ;;  %3569 = vmatprep.mubr.bf16.mxu1 %v7842_v10  ;;  %v7989_v10 = vsel %vm916_vm2, %v1288_v8, %v1296_v22 }
 0x1e2   : > { %2896 = vmatmul.mubr.bf16.gmra.mrb[96].mxu0 %v7951_v38  ;;  %9554 = vst [vmem:[#allocation90_spill] sm:$0xff] %v7989_v10 }
 0x1e3   : > { %2903 = vmatprep.mubr.bf16.mxu0 %v7954_v24 }
 0x1e6   : > { %v7956_v52 = vpop.f32.mrb[8].mxu1 }
 0x1e7   : > { %9545 = vst [vmem:[#allocation81_spill] sm:$0xff] %v7956_v52  ;;  %v7959_v11 = vpop.f32.mrb[9].mxu1 }
 0x1e8   : > { %v7961_v7 = vpop.f32.mrb[10].mxu1  ;;  %3570 = vmatmul.mubr.bf16.gmra.mrb[112].mxu1 %v7849_v2  ;;  %v1642_v2 = vrot.slane %v1503_v36, 4 }
 0x1e9   : > { %9546 = vst [vmem:[#allocation82_spill] sm:$0xff] %v7961_v7  ;;  %v7964_v45 = vpop.f32.mrb[11].mxu1  ;;  %3577 = vmatprep.mubr.bf16.mxu1 %v7852_v27 }
 0x1ea   : > { %2904 = vmatmul.mubr.bf16.gmra.mrb[100].mxu0 %v7969_v0 }
 0x1eb   : > { %2911 = vmatprep.mubr.bf16.mxu0 %v7972_v57 }
 0x1ee   : > { %v7974_v46 = vpop.f32.mrb[12].mxu1 }
 0x1ef   : > { %9549 = vst [vmem:[#allocation85_spill] sm:$0xff] %v7974_v46  ;;  %v7977_v19 = vpop.f32.mrb[13].mxu1  ;;  %v1304_v46 = vrot.slane %v1302_v43, 4  ;;  %v1319_v43 = vshll.u32 %v1503_v36, 16 }
 0x1f0   : > { %9550 = vst [vmem:[#allocation86_spill] sm:$0xff] %v7977_v19  ;;  %v7979_v34 = vpop.f32.mrb[14].mxu1  ;;  %v907_v19 = vld [vmem:[#allocation2 + $0x168] sm:$0xf8]  ;;  %3578 = vmatmul.mubr.bf16.gmra.mrb[116].mxu1 %v7862_v61  ;;  %v909_v61 = vld [vmem:[#allocation2 + $0x178] sm:$0xf] }
 0x1f1   : > { %9551 = vst [vmem:[#allocation87_spill] sm:$0xff] %v7979_v34  ;;  %v7982_v60 = vpop.f32.mrb[15].mxu1  ;;  %v1301_v34 = vrot.slane %v1299_v62, 3  ;;  %v1308_v41 = vshrl.u32 %v907_v19, 16  ;;  %v1316_v62 = vshrl.u32 %v1503_v36, 16  ;;  %3585 = vmatprep.mubr.bf16.mxu1 %v7865_v12 }
 0x1f2   : > { %9552 = vst [vmem:[#allocation88_spill] sm:$0xff] %v7982_v60  ;;  %2912 = vmatmul.mubr.bf16.gmra.mrb[104].mxu0 %v7989_v10  ;;  %v1504_v12 = vld [vmem:[#allocation2 + $0x178] sm:$0xf] }
 0x1f3   : > { %2919 = vmatprep.mubr.bf16.mxu0 %v7994_v59  ;;  %v1305_v8 = vor.u32 %v1304_v46, %v1301_v34  ;;  %v1318_v60 = vrot.slane %v1316_v62, 3 }
 0x1f5   : > { %v7986_v35 = vpop.f32.mrb[0].mxu0  ;;  %v8011_v46 = vsel %vm916_vm2, %v1296_v22, %v1305_v8  ;;  %v1325_v8 = vshrl.u32 %v909_v61, 16 }
 0x1f6   : > { %9553 = vst [vmem:[#allocation89_spill] sm:$0xff] %v7986_v35  ;;  %v2707_v48 = vpop.f32.mrb[1].mxu0  ;;  %9562 = vst [vmem:[#allocation98_spill] sm:$0xff] %v8011_v46 }
 0x1f7   : > { %v7991_v15 = vpop.f32.mrb[2].mxu0  ;;  %v1311_v48 = vshll.u32 %v907_v19, 16 }
 0x1f8   : > { %9555 = vst [vmem:[#allocation91_spill] sm:$0xff] %v7991_v15  ;;  %v2710_v4 = vpop.f32.mrb[3].mxu0  ;;  %v7997_v27 = vpop.f32.mrb[16].mxu1  ;;  %v1641_v15 = vrot.slane %v1502_v5, 4  ;;  %3586 = vmatmul.mubr.bf16.gmra.mrb[120].mxu1 %v7873_v56 }
 0x1f9   : > { %9557 = vst [vmem:[#allocation93_spill] sm:$0xff] %v7997_v27  ;;  %v8000_v35 = vpop.f32.mrb[17].mxu1  ;;  %v1310_v27 = vrot.slane %v1308_v41, 3  ;;  %v1313_v34 = vrot.slane %v1311_v48, 4  ;;  %v1328_v48 = vshll.u32 %v909_v61, 16  ;;  %3593 = vmatprep.mubr.bf16.mxu1 %v7876_v17 }
 0x1fa   : > { %9558 = vst [vmem:[#allocation94_spill] sm:$0xff] %v8000_v35  ;;  %v8003_v14 = vpop.f32.mrb[18].mxu1  ;;  %v1321_v35 = vrot.slane %v1319_v43, 4  ;;  %v8016_v36 = vsel %vm1565_vm1, %v1641_v15, %v1642_v2  ;;  %2920 = vmatmul.mubr.bf16.gmra.mrb[108].mxu0 %v8011_v46  ;;  %v1644_v43 = vrot.slane %v1504_v12, 4  ;;  %v910_v61 = vld [vmem:[#allocation2 + $0x180] sm:$0xf8] }
 0x1fb   : > { %9559 = vst [vmem:[#allocation95_spill] sm:$0xff] %v8003_v14  ;;  %v8006_v29 = vpop.f32.mrb[19].mxu1  ;;  %9564 = vst [vmem:[#allocation100_spill] sm:$0xff] %v8016_v36  ;;  %2927 = vmatprep.mubr.bf16.mxu0 %v8016_v36  ;;  %v1314_v22 = vor.u32 %v1313_v34, %v1310_v27  ;;  %v1334_v17 = vshrl.u32 %v910_v61, 16 }
 0x1fc   : > { %9560 = vst [vmem:[#allocation96_spill] sm:$0xff] %v8006_v29  ;;  %v1322_v41 = vor.u32 %v1321_v35, %v1318_v60  ;;  %v1327_v60 = vrot.slane %v1325_v8, 3  ;;  %v1330_v35 = vrot.slane %v1328_v48, 4  ;;  %v8038_v12 = vsel %vm1565_vm1, %v1642_v2, %v1644_v43 }
 0x1fd   : > { %v8008_v4 = vpop.f32.mrb[4].mxu0  ;;  %9572 = vst [vmem:[#allocation108_spill] sm:$0xff] %v8038_v12  ;;  %v1336_v2 = vrot.slane %v1334_v17, 3 }
 0x1fe   : > { %9561 = vst [vmem:[#allocation97_spill] sm:$0xff] %v8008_v4  ;;  %v2715_v19 = vpop.f32.mrb[5].mxu0  ;;  %v1506_v4 = vld [vmem:[#allocation2 + $0x188] sm:$0xff] }
 0x1ff   : > { %v8013_v5 = vpop.f32.mrb[6].mxu0  ;;  %v1647_v48 = vrot.slane %v1506_v4, 4 }
 0x200   : > { %9563 = vst [vmem:[#allocation99_spill] sm:$0xff] %v8013_v5  ;;  %v2718_v14 = vpop.f32.mrb[7].mxu0  ;;  %v8033_v5 = vsel %vm916_vm2, %v1314_v22, %v1322_v41  ;;  %v1337_v22 = vshll.u32 %v910_v61, 16  ;;  %3594 = vmatmul.mubr.bf16.gmra.mrb[124].mxu1 %v7884_v49  ;;  %v1507_v61 = vld [vmem:[#allocation2 + $0x190] sm:$0xf] }
 0x201   : > { %v8019_v29 = vpop.f32.mrb[20].mxu1  ;;  %9570 = vst [vmem:[#allocation106_spill] sm:$0xff] %v8033_v5  ;;  %3601 = vmatprep.mubr.bf16.mxu1 %v7887_v21  ;;  %v1732_v21 = vld [vmem:[#allocation2 + $0x20] sm:$0xff] }
 0x202   : > { %9565 = vst [vmem:[#allocation101_spill] sm:$0xff] %v8019_v29  ;;  %v8022_v62 = vpop.f32.mrb[21].mxu1  ;;  %2928 = vmatmul.mubr.bf16.gmra.mrb[112].mxu0 %v8033_v5  ;;  %v1342_v29 = vshrl.u32 %v1506_v4, 16  ;;  %v1818_v7 = vshrl.u32 %v1732_v21, 16  ;;  %v1821_v52 = vshll.u32 %v1732_v21, 16 }
 0x203   : > { %9566 = vst [vmem:[#allocation102_spill] sm:$0xff] %v8022_v62  ;;  %v8025_v15 = vpop.f32.mrb[22].mxu1  ;;  %2935 = vmatprep.mubr.bf16.mxu0 %v8038_v12 }
 0x204   : > { %9567 = vst [vmem:[#allocation103_spill] sm:$0xff] %v8025_v15  ;;  %v8028_v14 = vpop.f32.mrb[23].mxu1  ;;  %v1505_v15 = vld [vmem:[#allocation2 + $0x180] sm:$0xf0]  ;;  %v1820_v21 = vrot.slane %v1818_v7, 4 }
 0x205   : > { %9568 = vst [vmem:[#allocation104_spill] sm:$0xff] %v8028_v14  ;;  %v8030_v19 = vpop.f32.mrb[8].mxu0  ;;  %v1646_v8 = vrot.slane %v1505_v15, 4  ;;  %v1344_v14 = vrot.slane %v1342_v29, 3  ;;  %v1354_v29 = vshll.u32 %v912_v50, 16 }
 0x206   : > { %9569 = vst [vmem:[#allocation105_spill] sm:$0xff] %v8030_v19  ;;  %v2723_v27 = vpop.f32.mrb[9].mxu0  ;;  %v1331_v19 = vor.u32 %v1330_v35, %v1327_v60 }
 0x207   : > { %v8035_v34 = vpop.f32.mrb[10].mxu0  ;;  %v1345_v27 = vshll.u32 %v1506_v4, 16  ;;  %v8052_v35 = vsel %vm1565_vm1, %v1646_v8, %v1647_v48  ;;  %v1731_v4 = vld [vmem:[#allocation2 + $0x18] sm:$0xf0]  ;;  %v1356_v6 = vrot.slane %v1354_v29, 4 }
 0x208   : > { %9571 = vst [vmem:[#allocation107_spill] sm:$0xff] %v8035_v34  ;;  %v2726_v56 = vpop.f32.mrb[11].mxu0  ;;  %v1339_v34 = vrot.slane %v1337_v22, 4  ;;  %9576 = vst [vmem:[#allocation112_spill] sm:$0xff] %v8052_v35  ;;  %v1810_v8 = vshrl.u32 %v1731_v4, 16  ;;  %3602 = vmatmul.mubr.bf16.gmra.mrb[128].mxu1 %v7894_v55 }
 0x209   : > { %v8044_v43 = vpop.f32.mrb[24].mxu1  ;;  %v8047_v56 = vsel %vm916_vm2, %v1322_v41, %v1331_v19  ;;  %v1347_v62 = vrot.slane %v1345_v27, 4  ;;  %v1351_v19 = vshrl.u32 %v912_v50, 16  ;;  %3609 = vmatprep.mubr.bf16.mxu1 %v7897_v3 }
 0x20a   : > { %9573 = vst [vmem:[#allocation109_spill] sm:$0xff] %v8044_v43  ;;  %9574 = vst [vmem:[#allocation110_spill] sm:$0xff] %v8047_v56  ;;  %v8049_v60 = vpop.f32.mrb[25].mxu1  ;;  %2936 = vmatmul.mubr.bf16.gmra.mrb[116].mxu0 %v8047_v56  ;;  %v1340_v27 = vor.u32 %v1339_v34, %v1336_v2  ;;  %v1813_v43 = vshll.u32 %v1731_v4, 16  ;;  %v1733_v34 = vld [vmem:[#allocation2 + $0x28] sm:$0x1f] }
 0x20b   : > { %9575 = vst [vmem:[#allocation111_spill] sm:$0xff] %v8049_v60  ;;  %v8054_v15 = vpop.f32.mrb[26].mxu1  ;;  %2943 = vmatprep.mubr.bf16.mxu0 %v8052_v35  ;;  %v1348_v49 = vor.u32 %v1347_v62, %v1344_v14  ;;  %v1812_v62 = vrot.slane %v1810_v8, 4  ;;  %v1827_v3 = vshrl.u32 %v1733_v34, 16 }
 0x20c   : > { %9577 = vst [vmem:[#allocation113_spill] sm:$0xff] %v8054_v15  ;;  %v8056_v17 = vpop.f32.mrb[27].mxu1  ;;  %v1649_v15 = vrot.slane %v1507_v61, 4  ;;  %v1815_v14 = vrot.slane %v1813_v43, 5  ;;  %v1823_v61 = vrot.slane %v1821_v52, 5 }
 0x20d   : > { %9578 = vst [vmem:[#allocation114_spill] sm:$0xff] %v8056_v17  ;;  %v8059_v41 = vpop.f32.mrb[12].mxu0 }
 0x20e   : > { %9579 = vst [vmem:[#allocation115_spill] sm:$0xff] %v8059_v41  ;;  %v2731_v22 = vpop.f32.mrb[13].mxu0  ;;  %v1353_v41 = vrot.slane %v1351_v19, 3  ;;  %v8074_v4 = vsel %vm1565_vm1, %v1647_v48, %v1649_v15  ;;  %v1735_v19 = vld [vmem:[#allocation2 + $0x38] sm:$0xff]  ;;  %v1830_v48 = vshll.u32 %v1733_v34, 16  ;;  %v1824_v52 = vor.u32 %v1823_v61, %v1820_v21 }
 0x20f   : > { %v8062_v60 = vpop.f32.mrb[14].mxu0  ;;  %v8069_v22 = vsel %vm916_vm2, %v1340_v27, %v1348_v49  ;;  %9583 = vst [vmem:[#allocation119_spill] sm:$0xff] %v8074_v4 }
 0x210   : > { %9580 = vst [vmem:[#allocation116_spill] sm:$0xff] %v8062_v60  ;;  %v2734_v17 = vpop.f32.mrb[15].mxu0  ;;  %9582 = vst [vmem:[#allocation118_spill] sm:$0xff] %v8069_v22  ;;  %v1357_v8 = vor.u32 %v1356_v6, %v1353_v41  ;;  %v1816_v60 = vor.u32 %v1815_v14, %v1812_v62  ;;  %3610 = vmatmul.mubr.bf16.gmra.mrb[132].mxu1 %v7905_v1  ;;  %v1829_v41 = vrot.slane %v1827_v3, 4  ;;  %v1736_v14 = vld [vmem:[#allocation2 + $0x40] sm:$0x1f] }
 0x211   : > { %v8066_v50 = vpop.f32.mrb[28].mxu1  ;;  %v1734_v17 = vld [vmem:[#allocation2 + $0x30] sm:$0xf0]  ;;  %3617 = vmatprep.mubr.bf16.mxu1 %v7908_v31  ;;  %v1856_v3 = vshll.u32 %v1736_v14, 16 }
 0x212   : > { %9581 = vst [vmem:[#allocation117_spill] sm:$0xff] %v8066_v50  ;;  %v8071_v2 = vpop.f32.mrb[29].mxu1  ;;  %2944 = vmatmul.mubr.bf16.gmra.mrb[120].mxu0 %v8069_v22  ;;  %v1836_v15 = vshrl.u32 %v1734_v17, 16  ;;  %v1839_v55 = vshll.u32 %v1734_v17, 16  ;;  %v1847_v50 = vshll.u32 %v1735_v19, 16  ;;  %v8089_v6 = vsel %vm916_vm2, %v1348_v49, %v1357_v8 }
 0x213   : > { %v8076_v35 = vpop.f32.mrb[30].mxu1  ;;  %2951 = vmatprep.mubr.bf16.mxu0 %v8074_v4  ;;  %9588 = vst [vmem:[#allocation124_spill] sm:$0xff] %v8089_v6  ;;  %v8094_v4 = vsel %vm1782_vm0, %v1816_v60, %v1824_v52  ;;  %v1853_v49 = vshrl.u32 %v1736_v14, 16  ;;  %v1858_v14 = vrot.slane %v1856_v3, 5  ;;  %v1741_v3 = vld [vmem:[#allocation2 + $0x68] sm:$0xff] }
 0x214   : > { %9584 = vst [vmem:[#allocation120_spill] sm:$0xff] %v8076_v35  ;;  %v8078_v29 = vpop.f32.mrb[31].mxu1  ;;  %v1844_v35 = vshrl.u32 %v1735_v19, 16  ;;  %v1838_v62 = vrot.slane %v1836_v15, 4  ;;  %v1841_v21 = vrot.slane %v1839_v55, 5  ;;  %v1849_v17 = vrot.slane %v1847_v50, 5 }
 0x215   : > { %9585 = vst [vmem:[#allocation121_spill] sm:$0xff] %v8078_v29  ;;  %v8081_v27 = vpop.f32.mrb[16].mxu0  ;;  %v1737_v19 = vld [vmem:[#allocation2 + $0x48] sm:$0xf0]  ;;  %v1855_v1 = vrot.slane %v1853_v49, 4 }
 0x216   : > { %9586 = vst [vmem:[#allocation122_spill] sm:$0xff] %v8081_v27  ;;  %v2739_v43 = vpop.f32.mrb[17].mxu0  ;;  %v1846_v61 = vrot.slane %v1844_v35, 4  ;;  %v1862_v60 = vshrl.u32 %v1737_v19, 16  ;;  %v1865_v15 = vshll.u32 %v1737_v19, 16  ;;  %v1842_v55 = vor.u32 %v1841_v21, %v1838_v62 }
 0x217   : > { %v8084_v7 = vpop.f32.mrb[18].mxu0  ;;  %v1832_v43 = vrot.slane %v1830_v48, 5  ;;  %v1739_v21 = vld [vmem:[#allocation2 + $0x58] sm:$0x1f] }
 0x218   : > { %9587 = vst [vmem:[#allocation123_spill] sm:$0xff] %v8084_v7  ;;  %v2742_v29 = vpop.f32.mrb[19].mxu0  ;;  %v1850_v35 = vor.u32 %v1849_v17, %v1846_v61  ;;  %3618 = vmatmul.mubr.bf16.gmra.mrb[136].mxu1 %v7915_v42  ;;  %v1867_v62 = vrot.slane %v1865_v15, 5  ;;  %v1859_v15 = vor.u32 %v1858_v14, %v1855_v1  ;;  %v1896_v42 = vshrl.u32 %v1741_v3, 16  ;;  %v6678_v14 = vld [vmem:[#allocation10 + $0x98] sm:$0xff]  }
 0x219   : > { %v8091_v34 = vpop.f32.mrb[32].mxu1  ;;  %v1738_v29 = vld [vmem:[#allocation2 + $0x50] sm:$0xff]  ;;  %v1833_v48 = vor.u32 %v1832_v43, %v1829_v41  ;;  %3625 = vmatprep.mubr.bf16.mxu1 %v7918_v23  ;;  %v6676_v41 = vld [vmem:[#allocation10 + $0x88] sm:$0xff]   ;;  %v1864_v43 = vrot.slane %v1862_v60, 4 }
 0x21a   : > { %9589 = vst [vmem:[#allocation125_spill] sm:$0xff] %v8091_v34  ;;  %v8096_v22 = vpop.f32.mrb[33].mxu1  ;;  %2952 = vmatmul.mubr.bf16.gmra.mrb[124].mxu0 %v8089_v6  ;;  %v1870_v50 = vshrl.u32 %v1738_v29, 16  ;;  %v1873_v27 = vshll.u32 %v1738_v29, 16  ;;  %v8116_v19 = vsel %vm1782_vm0, %v1842_v55, %v1850_v35  ;;  %v8134_v1 = vsel %vm1782_vm0, %v1850_v35, %v1859_v15 }
 0x21b   : > { %v8098_v7 = vpop.f32.mrb[34].mxu1  ;;  %6196 = vmatprep.mubr.bf16.mxu0 %v8094_v4  ;;  %v8111_v34 = vsel %vm1782_vm0, %v1824_v52, %v1833_v48  ;;  %v1879_v52 = vshrl.u32 %v1739_v21, 16  ;;  %v1882_v48 = vshll.u32 %v1739_v21, 16 }
 0x21c   : > { %9590 = vst [vmem:[#allocation126_spill] sm:$0xff] %v8098_v7  ;;  %v8101_v8 = vpop.f32.mrb[35].mxu1  ;;  %v1872_v29 = vrot.slane %v1870_v50, 4 }
 0x21d   : > { %v8105_v31 = vpop.f32.mrb[20].mxu0 }
 0x21e   : > { %9591 = vst [vmem:[#allocation127_spill] sm:$0xff] %v8105_v31  ;;  %v2747_v6 = vpop.f32.mrb[21].mxu0  ;;  %v1875_v31 = vrot.slane %v1873_v27, 5  ;;  %v6677_v27 = vld [vmem:[#allocation10 + $0x90] sm:$0xff]  }
 0x21f   : > { %v8108_v7 = vpop.f32.mrb[22].mxu0  ;;  %v1740_v6 = vld [vmem:[#allocation2 + $0x60] sm:$0xf0] }
 0x220   : > { %9592 = vst [vmem:[#allocation128_spill] sm:$0xff] %v8108_v7  ;;  %v2750_v17 = vpop.f32.mrb[23].mxu0  ;;  %v1888_v55 = vshrl.u32 %v1740_v6, 16  ;;  %v1891_v50 = vshll.u32 %v1740_v6, 16  ;;  %v1876_v23 = vor.u32 %v1875_v31, %v1872_v29  ;;  %3626 = vmatmul.mubr.bf16.gmra.mrb[140].mxu1 %v7933_v44 }
 0x221   : > { %v8113_v61 = vpop.f32.mrb[36].mxu1  ;;  %v1868_v17 = vor.u32 %v1867_v62, %v1864_v43  ;;  %3633 = vmatprep.mubr.bf16.mxu1 %v7936_v47  ;;  %v1742_v62 = vld [vmem:[#allocation2 + $0x70] sm:$0x1f] }
 0x222   : > { %9593 = vst [vmem:[#allocation129_spill] sm:$0xff] %v8113_v61  ;;  %v8118_v49 = vpop.f32.mrb[37].mxu1  ;;  %6197 = vmatmul.mubr.bf16.vlgmr.msra.gmra.mrb[128].mxu0 %v8111_v34  ;;  %v1899_v61 = vshll.u32 %v1741_v3, 16  ;;  %v1890_v43 = vrot.slane %v1888_v55, 4  ;;  %v1893_v31 = vrot.slane %v1891_v50, 5  ;;  %v1898_v3 = vrot.slane %v1896_v42, 4 }
 0x223   : > { %9594 = vst [vmem:[#allocation130_spill] sm:$0xff] %v8118_v49  ;;  %v8120_v7 = vpop.f32.mrb[38].mxu1  ;;  %6261 = vmatpush3.bf16.msra.mxu0 %v7859_v58  ;;  %6200 = vmatprep.mubr.bf16.mxu0 %v8116_v19  ;;  %v1884_v58 = vrot.slane %v1882_v48, 5  ;;  %v8137_v6 = vsel %vm1782_vm0, %v1868_v17, %v1876_v23  ;;  %v6680_v47 = vld [vmem:[#allocation10 + $0xa0] sm:$0xff]  }
 0x224   : > { %9595 = vst [vmem:[#allocation131_spill] sm:$0xff] %v8120_v7  ;;  %v8123_v60 = vpop.f32.mrb[39].mxu1  ;;  %6262 = vmatprep.subr.bf16.mxu0 %v6676_v41 }
 0x225   : > { %9596 = vst [vmem:[#allocation132_spill] sm:$0xff] %v8123_v60  ;;  %v8128_v7 = vpop.f32.mrb[24].mxu0  ;;  %v1881_v60 = vrot.slane %v1879_v52, 4  ;;  %v1744_v52 = vld [vmem:[#allocation2 + $0x80] sm:$0xff] }
 0x226   : > { %9597 = vst [vmem:[#allocation133_spill] sm:$0xff] %v8128_v7  ;;  %v2755_v21 = vpop.f32.mrb[25].mxu0  ;;  %v1901_v7 = vrot.slane %v1899_v61, 5  ;;  %v1922_v55 = vshrl.u32 %v1744_v52, 16  ;;  %v1925_v50 = vshll.u32 %v1744_v52, 16 }
 0x227   : > { %v8131_v49 = vpop.f32.mrb[26].mxu0  ;;  %6263 = vmatpush3.bf16.msra.mxu0 %v6676_v41  ;;  %v1743_v21 = vld [vmem:[#allocation2 + $0x78] sm:$0xf0]  ;;  %v1885_v48 = vor.u32 %v1884_v58, %v1881_v60  ;;  %v1905_v41 = vshrl.u32 %v1742_v62, 16 }
 0x228   : > { %9598 = vst [vmem:[#allocation134_spill] sm:$0xff] %v8131_v49  ;;  %v2758_v29 = vpop.f32.mrb[27].mxu0  ;;  %6264 = vmatprep.subr.bf16.mxu0 %v6677_v27  ;;  %v1908_v49 = vshll.u32 %v1742_v62, 16  ;;  %v1914_v35 = vshrl.u32 %v1743_v21, 16  ;;  %v1917_v15 = vshll.u32 %v1743_v21, 16  ;;  %v1902_v17 = vor.u32 %v1901_v7, %v1898_v3  ;;  %3634 = vmatmul.mubr.bf16.gmra.mrb[144].mxu1 %v7951_v38 }
 0x229   : > { %v1894_v29 = vor.u32 %v1893_v31, %v1890_v43  ;;  %3641 = vmatprep.mubr.bf16.mxu1 %v7954_v24  ;;  %v8146_v60 = vsel %vm1782_vm0, %v1876_v23, %v1885_v48  ;;  %v1745_v62 = vld [vmem:[#allocation2 + $0x88] sm:$0x1f]  ;;  %v1924_v7 = vrot.slane %v1922_v55, 4  ;;  %v1927_v31 = vrot.slane %v1925_v50, 5  ;;  %v1746_v23 = vld [vmem:[#allocation2 + $0x90] sm:$0xf0] }
 0x22a   : > { %6201 = vmatmul.mubr.bf16.gmra.mrb[132].mxu0 %v8134_v1  ;;  %v1910_v58 = vrot.slane %v1908_v49, 5  ;;  %v1916_v52 = vrot.slane %v1914_v35, 4  ;;  %v1919_v43 = vrot.slane %v1917_v15, 5  ;;  %v1747_v48 = vld [vmem:[#allocation2 + $0x98] sm:$0xff]  ;;  %v1931_v35 = vshrl.u32 %v1745_v62, 16 }
 0x22b   : > { %6265 = vmatpush3.bf16.msra.mxu0 %v6677_v27  ;;  %6204 = vmatprep.mubr.bf16.mxu0 %v8137_v6  ;;  %v1907_v27 = vrot.slane %v1905_v41, 4  ;;  %v8150_v3 = vpop.f32.mrb[40].mxu1  ;;  %v1934_v15 = vshll.u32 %v1745_v62, 16  ;;  %v1943_v50 = vshll.u32 %v1746_v23, 16  ;;  %v1928_v44 = vor.u32 %v1927_v31, %v1924_v7 }
 0x22c   : > { %6266 = vmatprep.subr.bf16.mxu0 %v6678_v14  ;;  %9601 = vst [vmem:[#allocation137_spill] sm:$0xff] %v8150_v3  ;;  %v3429_v41 = vpop.f32.mrb[41].mxu1  ;;  %v1920_v24 = vor.u32 %v1919_v43, %v1916_v52  ;;  %v6683_v3 = vld [vmem:[#allocation10 + $0xb0] sm:$0xff]   ;;  %v1933_v62 = vrot.slane %v1931_v35, 4  ;;  %v1729_v35 = vld [vmem:[#allocation2 + $0x8] sm:$0xff] }
 0x22d   : > { %v8142_v42 = vpop.f32.mrb[28].mxu0  ;;  %v8155_v49 = vpop.f32.mrb[42].mxu1 }
 0x22e   : > { %9599 = vst [vmem:[#allocation135_spill] sm:$0xff] %v8142_v42  ;;  %v2763_v61 = vpop.f32.mrb[29].mxu0  ;;  %v8153_v42 = vsel %vm1782_vm0, %v1894_v29, %v1902_v17  ;;  %9602 = vst [vmem:[#allocation138_spill] sm:$0xff] %v8155_v49  ;;  %v3432_v55 = vpop.f32.mrb[43].mxu1  ;;  %v1948_v29 = vshrl.u32 %v1747_v48, 16  ;;  %v6685_v49 = vld [vmem:[#allocation10 + $0x200] sm:$0xff]  }
 0x22f   : > { %v8148_v21 = vpop.f32.mrb[30].mxu0  ;;  %6267 = vmatpush3.bf16.msra.mxu0 %v6678_v14  ;;  %v6681_v61 = vld [vmem:[#allocation10 + $0xa8] sm:$0xff]   ;;  %v1911_v14 = vor.u32 %v1910_v58, %v1907_v27 }
 0x230   : > { %9600 = vst [vmem:[#allocation136_spill] sm:$0xff] %v8148_v21  ;;  %v2766_v38 = vpop.f32.mrb[31].mxu0  ;;  %6268 = vmatprep.subr.bf16.mxu0 %v6680_v47  ;;  %v1951_v21 = vshll.u32 %v1747_v48, 16  ;;  %3642 = vmatmul.mubr.bf16.gmra.mrb[148].mxu1 %v7969_v0  ;;  %v1945_v48 = vrot.slane %v1943_v50, 5  ;;  %v1950_v52 = vrot.slane %v1948_v29, 4  ;;  %v1792_v0 = vshrl.u32 %v1729_v35, 16 }
 0x231   : > { %v1940_v38 = vshrl.u32 %v1746_v23, 16  ;;  %3649 = vmatprep.mubr.bf16.mxu1 %v7972_v57  ;;  %v8164_v58 = vsel %vm1782_vm0, %v1902_v17, %v1911_v14  ;;  %v6684_v57 = vld [vmem:[#allocation10 + $0xb8] sm:$0xff]   ;;  %v1728_v14 = vld [vmem:[#allocation2] sm:$0xf0] }
 0x232   : > { %6205 = vmatmul.mubr.bf16.gmra.mrb[136].mxu0 %v8146_v60  ;;  %v1953_v43 = vrot.slane %v1951_v21, 5 }
 0x233   : > { %6208 = vmatprep.mubr.bf16.mxu0 %v8153_v42  ;;  %6269 = vmatpush3.bf16.msra.mxu0 %v6680_v47  ;;  %v1936_v47 = vrot.slane %v1934_v15, 5  ;;  %v1942_v23 = vrot.slane %v1940_v38, 4  ;;  %v8168_v7 = vpop.f32.mrb[44].mxu1 }
 0x234   : > { %6270 = vmatprep.subr.bf16.mxu0 %v6681_v61  ;;  %v3437_v17 = vpop.f32.mrb[45].mxu1  ;;  %v1954_v50 = vor.u32 %v1953_v43, %v1950_v52  ;;  %v1730_v43 = vld [vmem:[#allocation2 + $0x10] sm:$0x1f] }
 0x235   : > { %v8160_v41 = vpop.f32.mrb[32].mxu0  ;;  %v8173_v15 = vpop.f32.mrb[46].mxu1  ;;  %v1946_v21 = vor.u32 %v1945_v48, %v1942_v23  ;;  %v1795_v17 = vshll.u32 %v1729_v35, 16 }
 0x236   : > { %9603 = vst [vmem:[#allocation139_spill] sm:$0xff] %v8160_v41  ;;  %v2771_v27 = vpop.f32.mrb[33].mxu0  ;;  %v8171_v41 = vsel %vm1782_vm0, %v1920_v24, %v1928_v44  ;;  %9605 = vst [vmem:[#allocation141_spill] sm:$0xff] %v8173_v15  ;;  %v3440_v38 = vpop.f32.mrb[47].mxu1 }
 0x237   : > { %v8166_v55 = vpop.f32.mrb[34].mxu0  ;;  %6271 = vmatpush3.bf16.msra.mxu0 %v6681_v61  ;;  %v1748_v27 = vld [vmem:[#allocation2 + $0xa0] sm:$0x1f]  ;;  %v1937_v61 = vor.u32 %v1936_v47, %v1933_v62  ;;  %v8187_v23 = vsel %vm1782_vm0, %v1946_v21, %v1954_v50  ;;  %v1801_v21 = vshrl.u32 %v1730_v43, 16 }
 0x238   : > { %9604 = vst [vmem:[#allocation140_spill] sm:$0xff] %v8166_v55  ;;  %v2774_v31 = vpop.f32.mrb[35].mxu0  ;;  %6272 = vmatprep.subr.bf16.mxu0 %v6683_v3  ;;  %v1957_v29 = vshrl.u32 %v1748_v27, 16  ;;  %v1960_v24 = vshll.u32 %v1748_v27, 16  ;;  %v1787_v55 = vshll.u32 %v1728_v14, 16  ;;  %3650 = vmatmul.mubr.bf16.gmra.mrb[152].mxu1 %v7989_v10  ;;  %v1794_v10 = vrot.slane %v1792_v0, 4 }
 0x239   : > { %v1784_v31 = vshrl.u32 %v1728_v14, 16  ;;  %3657 = vmatprep.mubr.bf16.mxu1 %v7994_v59  ;;  %v1797_v59 = vrot.slane %v1795_v17, 5 }
 0x23a   : > { %6209 = vmatmul.mubr.bf16.gmra.mrb[140].mxu0 %v8164_v58  ;;  %v1959_v48 = vrot.slane %v1957_v29, 4  ;;  %v1962_v52 = vrot.slane %v1960_v24, 5  ;;  %v1789_v38 = vrot.slane %v1787_v55, 5 }
 0x23b   : > { %6212 = vmatprep.mubr.bf16.mxu0 %v8171_v41  ;;  %6273 = vmatpush3.bf16.msra.mxu0 %v6683_v3  ;;  %v8184_v3 = vsel %vm1782_vm0, %v1928_v44, %v1937_v61  ;;  %v8189_v27 = vpop.f32.mrb[48].mxu1  ;;  %v1786_v35 = vrot.slane %v1784_v31, 4  ;;  %v1798_v24 = vor.u32 %v1797_v59, %v1794_v10 }
 0x23c   : > { %6274 = vmatprep.subr.bf16.mxu0 %v6684_v57  ;;  %v1963_v61 = vor.u32 %v1962_v52, %v1959_v48 }
 0x23d   : > { %v8178_v15 = vpop.f32.mrb[36].mxu0  ;;  %v1790_v29 = vor.u32 %v1789_v38, %v1786_v35 }
 0x23e   : > { %9606 = vst [vmem:[#allocation142_spill] sm:$0xff] %v8178_v15  ;;  %v2779_v62 = vpop.f32.mrb[37].mxu0  ;;  %v8202_v17 = vsel %vm1782_vm0, %v1954_v50, %v1963_v61 }
 0x23f   : > { %v8181_v47 = vpop.f32.mrb[38].mxu0  ;;  %6275 = vmatpush3.bf16.msra.mxu0 %v6684_v57  ;;  %v3445_v62 = vpop.f32.mrb[49].mxu1  ;;  %v1804_v57 = vshll.u32 %v1730_v43, 16  ;;  %v1799_v52 = vsel %vm1782_vm0, %v1790_v29, %v1798_v24 }
 0x240   : > { %9607 = vst [vmem:[#allocation143_spill] sm:$0xff] %v8181_v47  ;;  %v2782_v14 = vpop.f32.mrb[39].mxu0  ;;  %6340 = vmatprep.subr.bf16.mxu0 %v6685_v49  ;;  %v8191_v47 = vpop.f32.mrb[50].mxu1  ;;  %3658 = vmatmul.mubr.bf16.gmra.mrb[156].mxu1 %v8011_v46  ;;  %v9630_v46 = vld [vmem:[#allocation25_spill] sm:$0xff] }
 0x241   : > { %v3448_v44 = vpop.f32.mrb[51].mxu1  ;;  %3665 = vmatprep.mubr.bf16.mxu1 %v8016_v36  ;;  %v1803_v14 = vrot.slane %v1801_v21, 4  ;;  %v1806_v62 = vrot.slane %v1804_v57, 5 }
 0x242   : > { %6213 = vmatmul.mubr.bf16.gmra.mrb[144].mxu0 %v8184_v3 }
 0x243   : > { %6216 = vmatprep.mubr.bf16.mxu0 %v8187_v23  ;;  %v8204_v44 = vpop.f32.mrb[52].mxu1  ;;  %v1807_v35 = vor.u32 %v1806_v62, %v1803_v14  ;;  %v6687_v62 = vld [vmem:[#allocation10 + $0x210] sm:$0xff]  }
 0x244   : > { %v3453_v10 = vpop.f32.mrb[53].mxu1 }
 0x245   : > { %v8196_v31 = vpop.f32.mrb[40].mxu0  ;;  %v8207_v59 = vpop.f32.mrb[54].mxu1  ;;  %v1808_v21 = vsel %vm1782_vm0, %v1798_v24, %v1807_v35 }
 0x246   : > { %9608 = vst [vmem:[#allocation144_spill] sm:$0xff] %v8196_v31  ;;  %v2787_v0 = vpop.f32.mrb[41].mxu0  ;;  %v3456_v43 = vpop.f32.mrb[55].mxu1  ;;  %v9637_v31 = vld [vmem:[#allocation27_spill] sm:$0xff] }
 0x247   : > { %v8199_v55 = vpop.f32.mrb[42].mxu0  ;;  %v6686_v0 = vld [vmem:[#allocation10 + $0x208] sm:$0xff]  }
 0x248   : > { %9609 = vst [vmem:[#allocation145_spill] sm:$0xff] %v8199_v55  ;;  %v2790_v48 = vpop.f32.mrb[43].mxu0  ;;  %3666 = vmatmul.mubr.bf16.gmra.mrb[160].mxu1 %v8033_v5 }
 0x249   : > { %3673 = vmatprep.mubr.bf16.mxu1 %v8038_v12 }
 0x24a   : > { %6217 = vmatmul.mubr.bf16.gmra.mrb[148].mxu0 %v8202_v17 }
 0x24b   : > { %6276 = vmatprep.mubr.bf16.mxu0 %v1799_v52  ;;  %v8217_v57 = vpop.f32.mrb[56].mxu1 }
 0x24c   : > { %v3461_v48 = vpop.f32.mrb[57].mxu1 }
 0x24d   : > { %v8211_v38 = vpop.f32.mrb[44].mxu0  ;;  %v8219_v10 = vpop.f32.mrb[58].mxu1 }
 0x24e   : > { %9610 = vst [vmem:[#allocation146_spill] sm:$0xff] %v8211_v38  ;;  %v2795_v50 = vpop.f32.mrb[45].mxu0  ;;  %v3464_v14 = vpop.f32.mrb[59].mxu1  ;;  %v9641_v38 = vld [vmem:[#allocation50_spill] sm:$0xff] }
 0x24f   : > { %v8214_v61 = vpop.f32.mrb[46].mxu0 }
 0x250   : > { %9611 = vst [vmem:[#allocation147_spill] sm:$0xff] %v8214_v61  ;;  %v2798_v29 = vpop.f32.mrb[47].mxu0  ;;  %3674 = vmatmul.mubr.bf16.gmra.mrb[164].mxu1 %v8047_v56 }
 0x251   : > { %4195 = vmatprep.mubr.bf16.mxu1 %v7545_v18 }
 0x252   : > { %6277 = vmatmul.mubr.bf16.vlgmr.msra.gmra.mrb[152].mxu0 %v1808_v21 }
 0x253   : > { %6341 = vmatpush3.bf16.msra.mxu0 %v6685_v49  ;;  %6280 = vmatprep.mubr.bf16.mxu0 %v8094_v4  ;;  %v8227_v50 = vpop.f32.mrb[60].mxu1  ;;  %v6688_v4 = vld [vmem:[#allocation10 + $0x218] sm:$0xff]  }
 0x254   : > { %6342 = vmatprep.subr.bf16.mxu0 %v6686_v0  ;;  %v3469_v29 = vpop.f32.mrb[61].mxu1 }
 0x255   : > { %v2801_v52 = vpop.f32.mrb[48].mxu0  ;;  %v8232_v48 = vpop.f32.mrb[62].mxu1 }
 0x256   : > { %v8225_v24 = vadd.f32 %v7923_v28, %v2801_v52  ;;  %v2803_v43 = vpop.f32.mrb[49].mxu0  ;;  %v3472_v18 = vpop.f32.mrb[63].mxu1  ;;  %v6689_v28 = vld [vmem:[#allocation10 + $0x220] sm:$0xff]  }
 0x257   : > { %v2804_v35 = vpop.f32.mrb[50].mxu0  ;;  %6343 = vmatpush3.bf16.msra.mxu0 %v6686_v0 }
 0x258   : > { %v8230_v21 = vadd.f32 %v7928_v63, %v2804_v35  ;;  %v2806_v49 = vpop.f32.mrb[51].mxu0  ;;  %6344 = vmatprep.subr.bf16.mxu0 %v6687_v62  ;;  %4196 = vmatmul.mubr.bf16.vlgmr.msra.gmra.mrb[168].mxu1 %v7557_v33 }
 0x259   : > { %4203 = vmatprep.mubr.bf16.mxu1 %v7585_v25  ;;  %v6691_v25 = vld [vmem:[#allocation10 + $0x230] sm:$0xff]  }
 0x25a   : > { %6281 = vmatmul.mubr.bf16.gmra.mrb[156].mxu0 %v8111_v34 }
 0x25b   : > { %6284 = vmatprep.mubr.bf16.mxu0 %v8116_v19  ;;  %6345 = vmatpush3.bf16.msra.mxu0 %v6687_v62  ;;  %v8241_v43 = vpop.f32.mrb[64].mxu1  ;;  %v6690_v62 = vld [vmem:[#allocation10 + $0x228] sm:$0xff]  }
 0x25c   : > { %6346 = vmatprep.subr.bf16.mxu0 %v6688_v4  ;;  %v3477_v49 = vpop.f32.mrb[65].mxu1 }
 0x25d   : > { %v2809_v0 = vpop.f32.mrb[52].mxu0  ;;  %v8246_v29 = vpop.f32.mrb[66].mxu1 }
 0x25e   : > { %v8239_v63 = vadd.f32 %v7920_v32, %v2809_v0  ;;  %v2811_v14 = vpop.f32.mrb[53].mxu0  ;;  %9612 = vst [vmem:[#allocation148_spill] sm:$0xff] %v8246_v29  ;;  %v3480_v33 = vpop.f32.mrb[67].mxu1  ;;  %v9665_v29 = vld [vmem:[#allocation56_spill] sm:$0xff] }
 0x25f   : > { %v2812_v52 = vpop.f32.mrb[54].mxu0  ;;  %6347 = vmatpush3.bf16.msra.mxu0 %v6688_v4 }
 0x260   : > { %v8244_v34 = vadd.f32 %v7925_v37, %v2812_v52  ;;  %v2814_v35 = vpop.f32.mrb[55].mxu0  ;;  %6348 = vmatprep.subr.bf16.mxu0 %v6689_v28  ;;  %4204 = vmatmul.mubr.bf16.gmra.mrb[172].mxu1 %v7608_v53 }
 0x261   : > { %4211 = vmatprep.mubr.bf16.mxu1 %v7619_v9 }
 0x262   : > { %6285 = vmatmul.mubr.bf16.gmra.mrb[160].mxu0 %v8134_v1 }
 0x263   : > { %6288 = vmatprep.mubr.bf16.mxu0 %v8137_v6  ;;  %6349 = vmatpush3.bf16.msra.mxu0 %v6689_v28  ;;  %v8255_v0 = vpop.f32.mrb[68].mxu1  ;;  %v6692_v28 = vld [vmem:[#allocation10 + $0x238] sm:$0xff]  }
 0x264   : > { %6350 = vmatprep.subr.bf16.mxu0 %v6690_v62  ;;  %v3485_v35 = vpop.f32.mrb[69].mxu1 }
 0x265   : > { %v2817_v32 = vpop.f32.mrb[56].mxu0  ;;  %v8260_v49 = vpop.f32.mrb[70].mxu1 }
 0x266   : > { %v8253_v37 = vadd.f32 %v7941_v16, %v2817_v32  ;;  %v2819_v4 = vpop.f32.mrb[57].mxu0  ;;  %9613 = vst [vmem:[#allocation149_spill] sm:$0xff] %v8260_v49  ;;  %v3488_v53 = vpop.f32.mrb[71].mxu1  ;;  %v810_v49 = vld [vmem:[%s7348_s16 + $0x8] sm:$0xf] }
 0x267   : > { %v2820_v18 = vpop.f32.mrb[58].mxu0  ;;  %6351 = vmatpush3.bf16.msra.mxu0 %v6690_v62 }
 0x268   : > { %v8258_v14 = vadd.f32 %v7946_v40, %v2820_v18  ;;  %v2822_v52 = vpop.f32.mrb[59].mxu0  ;;  %6352 = vmatprep.subr.bf16.mxu0 %v6691_v25  ;;  %4212 = vmatmul.mubr.bf16.gmra.mrb[176].mxu1 %v7644_v26 }
 0x269   : > { %4219 = vmatprep.mubr.bf16.mxu1 %v7665_v30 }
 0x26a   : > { %6289 = vmatmul.mubr.bf16.gmra.mrb[164].mxu0 %v8146_v60 }
 0x26b   : > { %6292 = vmatprep.mubr.bf16.mxu0 %v8153_v42  ;;  %6353 = vmatpush3.bf16.msra.mxu0 %v6691_v25  ;;  %v8269_v33 = vpop.f32.mrb[72].mxu1 }
 0x26c   : > { %6354 = vmatprep.subr.bf16.mxu0 %v6692_v28  ;;  %9614 = vst [vmem:[#allocation150_spill] sm:$0xff] %v8269_v33  ;;  %v3493_v18 = vpop.f32.mrb[73].mxu1 }
 0x26d   : > { %v2825_v9 = vpop.f32.mrb[60].mxu0  ;;  %v8274_v25 = vpop.f32.mrb[74].mxu1 }
 0x26e   : > { %v8267_v16 = vadd.f32 %v7938_v39, %v2825_v9  ;;  %v2827_v40 = vpop.f32.mrb[61].mxu0  ;;  %9615 = vst [vmem:[#allocation151_spill] sm:$0xff] %v8274_v25  ;;  %v3496_v26 = vpop.f32.mrb[75].mxu1 }
 0x26f   : > { %v2828_v62 = vpop.f32.mrb[62].mxu0  ;;  %6355 = vmatpush3.bf16.msra.mxu0 %v6692_v28 }
 0x270   : > { %v8272_v32 = vadd.f32 %v7943_v13, %v2828_v62  ;;  %v2830_v4 = vpop.f32.mrb[63].mxu0  ;;  %4220 = vmatmul.mubr.bf16.gmra.mrb[180].mxu1 %v7684_v20  ;;  %v9619_v62 = vld [vmem:[#allocation81_spill] sm:$0xff] }
 0x271   : > { %4227 = vmatprep.mubr.bf16.mxu1 %v7700_v51 }
 0x272   : > { %6293 = vmatmul.mubr.bf16.gmra.mrb[168].mxu0 %v8164_v58 }
 0x273   : > { %6296 = vmatprep.mubr.bf16.mxu0 %v8171_v41  ;;  %v8283_v28 = vpop.f32.mrb[76].mxu1 }
 0x274   : > { %9616 = vst [vmem:[#allocation152_spill] sm:$0xff] %v8283_v28  ;;  %v3501_v9 = vpop.f32.mrb[77].mxu1  ;;  %v9657_v28 = vld [vmem:[#allocation54_spill] sm:$0xff] }
 0x275   : > { %v2833_v30 = vpop.f32.mrb[64].mxu0  ;;  %v8288_v40 = vpop.f32.mrb[78].mxu1 }
 0x276   : > { %v8281_v39 = vadd.f32 %v7959_v11, %v2833_v30  ;;  %v2835_v52 = vpop.f32.mrb[65].mxu0  ;;  %9617 = vst [vmem:[#allocation153_spill] sm:$0xff] %v8288_v40  ;;  %v3504_v20 = vpop.f32.mrb[79].mxu1  ;;  %v9618_v11 = vld [vmem:[#allocation44_spill] sm:$0xff]  ;;  %v9621_v30 = vld [vmem:[#allocation82_spill] sm:$0xff] }
 0x277   : > { %v2836_v13 = vpop.f32.mrb[66].mxu0  ;;  %v9623_v20 = vld [vmem:[#allocation24_spill] sm:$0xff] }
 0x278   : > { %v8286_v35 = vadd.f32 %v7964_v45, %v2836_v13  ;;  %v2838_v53 = vpop.f32.mrb[67].mxu0  ;;  %4228 = vmatmul.mubr.bf16.gmra.mrb[184].mxu1 %v7723_v54  ;;  %v9649_v40 = vld [vmem:[#allocation52_spill] sm:$0xff] }
 0x279   : > { %4235 = vmatprep.mubr.bf16.mxu1 %v9618_v11  ;;  %v9624_v11 = vld [vmem:[#allocation45_spill] sm:$0xff] }
 0x27a   : > { %6297 = vmatmul.mubr.bf16.gmra.mrb[172].mxu0 %v8184_v3 }
 0x27b   : > { %6300 = vmatprep.mubr.bf16.mxu0 %v8187_v23  ;;  %v8297_v26 = vpop.f32.mrb[80].mxu1 }
 0x27c   : > { %9620 = vst [vmem:[#allocation44_spill] sm:$0xff] %v8297_v26  ;;  %v3509_v53 = vpop.f32.mrb[81].mxu1 }
 0x27d   : > { %v2841_v51 = vpop.f32.mrb[68].mxu0  ;;  %v8302_v9 = vpop.f32.mrb[82].mxu1 }
 0x27e   : > { %v8295_v4 = vadd.f32 %v9619_v62, %v2841_v51  ;;  %v2843_v18 = vpop.f32.mrb[69].mxu0  ;;  %9622 = vst [vmem:[#allocation81_spill] sm:$0xff] %v8302_v9  ;;  %v3512_v54 = vpop.f32.mrb[83].mxu1  ;;  %v9625_v62 = vld [vmem:[#allocation46_spill] sm:$0xff] }
 0x27f   : > { %v2844_v45 = vpop.f32.mrb[70].mxu0  ;;  %v9626_v18 = vld [vmem:[#allocation86_spill] sm:$0xff] }
 0x280   : > { %v8300_v52 = vadd.f32 %v9621_v30, %v2844_v45  ;;  %v2846_v13 = vpop.f32.mrb[71].mxu0  ;;  %4236 = vmatmul.mubr.bf16.gmra.mrb[188].mxu1 %v9624_v11  ;;  %v9631_v9 = vld [vmem:[#allocation26_spill] sm:$0xff] }
 0x281   : > { %4243 = vmatprep.mubr.bf16.mxu1 %v9625_v62  ;;  %v9628_v13 = vld [vmem:[#allocation88_spill] sm:$0xff]  ;;  %v9632_v62 = vld [vmem:[#allocation47_spill] sm:$0xff] }
 0x282   : > { %6301 = vmatmul.mubr.bf16.gmra.mrb[176].mxu0 %v8202_v17 }
 0x283   : > { %6304 = vmatprep.mubr.bf16.mxu0 %v9623_v20  ;;  %v8311_v30 = vpop.f32.mrb[84].mxu1 }
 0x284   : > { %9627 = vst [vmem:[#allocation82_spill] sm:$0xff] %v8311_v30  ;;  %v3517_v36 = vpop.f32.mrb[85].mxu1 }
 0x285   : > { %v2849_v51 = vpop.f32.mrb[72].mxu0  ;;  %v8316_v54 = vpop.f32.mrb[86].mxu1 }
 0x286   : > { %v8309_v56 = vadd.f32 %v9626_v18, %v2849_v51  ;;  %v2851_v12 = vpop.f32.mrb[73].mxu0  ;;  %9629 = vst [vmem:[#allocation24_spill] sm:$0xff] %v8316_v54  ;;  %v3520_v11 = vpop.f32.mrb[87].mxu1  ;;  %v9633_v18 = vld [vmem:[#allocation48_spill] sm:$0xff] }
 0x287   : > { %v2852_v45 = vpop.f32.mrb[74].mxu0  ;;  %v9634_v12 = vld [vmem:[#allocation85_spill] sm:$0xff] }
 0x288   : > { %v8314_v53 = vadd.f32 %v9628_v13, %v2852_v45  ;;  %v2854_v5 = vpop.f32.mrb[75].mxu0  ;;  %4244 = vmatmul.mubr.bf16.gmra.mrb[192].mxu1 %v9632_v62 }
 0x289   : > { %4251 = vmatprep.mubr.bf16.mxu1 %v9633_v18  ;;  %v9635_v5 = vld [vmem:[#allocation87_spill] sm:$0xff] }
 0x28a   : > { %6305 = vmatmul.mubr.bf16.gmra.mrb[180].mxu0 %v9630_v46 }
 0x28b   : > { %6308 = vmatprep.mubr.bf16.mxu0 %v9631_v9  ;;  %v3523_v13 = vpop.f32.mrb[88].mxu1 }
 0x28c   : > { %v8329_v30 = vadd.f32 %v3523_v13, %v8225_v24  ;;  %v3525_v11 = vpop.f32.mrb[89].mxu1 }
 0x28d   : > { %v2857_v51 = vpop.f32.mrb[76].mxu0  ;;  %v3526_v61 = vpop.f32.mrb[90].mxu1  ;;  %v9643_v11 = vld [vmem:[#allocation96_spill] sm:$0xff] }
 0x28e   : > { %v8323_v26 = vadd.f32 %v9634_v12, %v2857_v51  ;;  %v2859_v55 = vpop.f32.mrb[77].mxu0  ;;  %9636 = vst [vmem:[#allocation45_spill] sm:$0xff] %v8329_v30  ;;  %v8333_v62 = vadd.f32 %v3526_v61, %v8230_v21  ;;  %v3528_v18 = vpop.f32.mrb[91].mxu1  ;;  %v9639_v51 = vld [vmem:[#allocation28_spill] sm:$0xff] }
 0x28f   : > { %v2860_v45 = vpop.f32.mrb[78].mxu0  ;;  %v9640_v55 = vld [vmem:[#allocation49_spill] sm:$0xff] }
 0x290   : > { %v8326_v36 = vadd.f32 %v9635_v5, %v2860_v45  ;;  %v2862_v54 = vpop.f32.mrb[79].mxu0  ;;  %9638 = vst [vmem:[#allocation46_spill] sm:$0xff] %v8333_v62  ;;  %4252 = vmatmul.mubr.bf16.gmra.mrb[196].mxu1 %v9640_v55  ;;  %v9642_v45 = vld [vmem:[#allocation94_spill] sm:$0xff]  ;;  %v9645_v62 = vld [vmem:[#allocation29_spill] sm:$0xff] }
 0x291   : > { %4259 = vmatprep.mubr.bf16.mxu1 %v9641_v38 }
 0x292   : > { %6309 = vmatmul.mubr.bf16.gmra.mrb[184].mxu0 %v9637_v31 }
 0x293   : > { %6312 = vmatprep.mubr.bf16.mxu0 %v9639_v51  ;;  %v3531_v5 = vpop.f32.mrb[92].mxu1 }
 0x294   : > { %v8345_v61 = vadd.f32 %v3531_v5, %v8239_v63  ;;  %v3533_v21 = vpop.f32.mrb[93].mxu1 }
 0x295   : > { %v2865_v12 = vpop.f32.mrb[80].mxu0  ;;  %v3534_v18 = vpop.f32.mrb[94].mxu1  ;;  %v9651_v21 = vld [vmem:[#allocation95_spill] sm:$0xff] }
 0x296   : > { %v8339_v54 = vadd.f32 %v9642_v45, %v2865_v12  ;;  %v2867_v24 = vpop.f32.mrb[81].mxu0  ;;  %9644 = vst [vmem:[#allocation86_spill] sm:$0xff] %v8345_v61  ;;  %v8349_v55 = vadd.f32 %v3534_v18, %v8244_v34  ;;  %v3536_v38 = vpop.f32.mrb[95].mxu1  ;;  %v9647_v12 = vld [vmem:[#allocation30_spill] sm:$0xff]  ;;  %v9648_v45 = vld [vmem:[#allocation51_spill] sm:$0xff] }
 0x297   : > { %v2868_v13 = vpop.f32.mrb[82].mxu0 }
 0x298   : > { %v8342_v30 = vadd.f32 %v9643_v11, %v2868_v13  ;;  %v2870_v25 = vpop.f32.mrb[83].mxu0  ;;  %9646 = vst [vmem:[#allocation88_spill] sm:$0xff] %v8349_v55  ;;  %4260 = vmatmul.mubr.bf16.gmra.mrb[200].mxu1 %v9648_v45  ;;  %v9650_v13 = vld [vmem:[#allocation93_spill] sm:$0xff]  ;;  %v9653_v55 = vld [vmem:[#allocation31_spill] sm:$0xff] }
 0x299   : > { %4267 = vmatprep.mubr.bf16.mxu1 %v9649_v40 }
 0x29a   : > { %6313 = vmatmul.mubr.bf16.gmra.mrb[188].mxu0 %v9645_v62 }
 0x29b   : > { %6316 = vmatprep.mubr.bf16.mxu0 %v9647_v12  ;;  %v3539_v11 = vpop.f32.mrb[96].mxu1 }
 0x29c   : > { %v8361_v34 = vadd.f32 %v3539_v11, %v8253_v37  ;;  %v3541_v18 = vpop.f32.mrb[97].mxu1 }
 0x29d   : > { %v2873_v24 = vpop.f32.mrb[84].mxu0  ;;  %v3542_v38 = vpop.f32.mrb[98].mxu1  ;;  %v9659_v18 = vld [vmem:[#allocation104_spill] sm:$0xff] }
 0x29e   : > { %v8355_v25 = vadd.f32 %v9650_v13, %v2873_v24  ;;  %v2875_v63 = vpop.f32.mrb[85].mxu0  ;;  %9652 = vst [vmem:[#allocation25_spill] sm:$0xff] %v8361_v34  ;;  %v8365_v45 = vadd.f32 %v3542_v38, %v8258_v14  ;;  %v3544_v40 = vpop.f32.mrb[99].mxu1  ;;  %v9655_v24 = vld [vmem:[#allocation32_spill] sm:$0xff]  ;;  %v9656_v13 = vld [vmem:[#allocation53_spill] sm:$0xff] }
 0x29f   : > { %v2876_v5 = vpop.f32.mrb[86].mxu0 }
 0x2a0   : > { %v8358_v61 = vadd.f32 %v9651_v21, %v2876_v5  ;;  %v2878_v33 = vpop.f32.mrb[87].mxu0  ;;  %9654 = vst [vmem:[#allocation26_spill] sm:$0xff] %v8365_v45  ;;  %4268 = vmatmul.mubr.bf16.gmra.mrb[204].mxu1 %v9656_v13  ;;  %v9658_v5 = vld [vmem:[#allocation102_spill] sm:$0xff]  ;;  %v9661_v45 = vld [vmem:[#allocation33_spill] sm:$0xff] }
 0x2a1   : > { %4275 = vmatprep.mubr.bf16.mxu1 %v9657_v28 }
 0x2a2   : > { %6317 = vmatmul.mubr.bf16.gmra.mrb[192].mxu0 %v9653_v55 }
 0x2a3   : > { %6320 = vmatprep.mubr.bf16.mxu0 %v9655_v24  ;;  %v3547_v21 = vpop.f32.mrb[100].mxu1  ;;  %v9687_v24 = vld [vmem:[#allocation39_spill] sm:$0xff] }
 0x2a4   : > { %v8377_v14 = vadd.f32 %v3547_v21, %v8267_v16  ;;  %v3549_v38 = vpop.f32.mrb[101].mxu1 }
 0x2a5   : > { %v2881_v63 = vpop.f32.mrb[88].mxu0  ;;  %v3550_v40 = vpop.f32.mrb[102].mxu1  ;;  %v9667_v38 = vld [vmem:[#allocation103_spill] sm:$0xff] }
 0x2a6   : > { %v8371_v33 = vadd.f32 %v9658_v5, %v2881_v63  ;;  %v2883_v37 = vpop.f32.mrb[89].mxu0  ;;  %9660 = vst [vmem:[#allocation47_spill] sm:$0xff] %v8377_v14  ;;  %v8381_v13 = vadd.f32 %v3550_v40, %v8272_v32  ;;  %v3552_v28 = vpop.f32.mrb[103].mxu1  ;;  %v9663_v63 = vld [vmem:[#allocation34_spill] sm:$0xff]  ;;  %v9664_v5 = vld [vmem:[#allocation55_spill] sm:$0xff] }
 0x2a7   : > { %v2884_v11 = vpop.f32.mrb[90].mxu0 }
 0x2a8   : > { %v8374_v34 = vadd.f32 %v9659_v18, %v2884_v11  ;;  %v2886_v15 = vpop.f32.mrb[91].mxu0  ;;  %9662 = vst [vmem:[#allocation48_spill] sm:$0xff] %v8381_v13  ;;  %4276 = vmatmul.mubr.bf16.gmra.mrb[208].mxu1 %v9664_v5  ;;  %v9666_v11 = vld [vmem:[#allocation101_spill] sm:$0xff]  ;;  %v9669_v5 = vld [vmem:[#allocation35_spill] sm:$0xff] }
 0x2a9   : > { %4283 = vmatprep.mubr.bf16.mxu1 %v9665_v29 }
 0x2aa   : > { %6321 = vmatmul.mubr.bf16.gmra.mrb[196].mxu0 %v9661_v45 }
 0x2ab   : > { %6324 = vmatprep.mubr.bf16.mxu0 %v9663_v63  ;;  %v3555_v18 = vpop.f32.mrb[104].mxu1 }
 0x2ac   : > { %v8393_v40 = vadd.f32 %v3555_v18, %v8281_v39  ;;  %v3557_v28 = vpop.f32.mrb[105].mxu1 }
 0x2ad   : > { %v2889_v37 = vpop.f32.mrb[92].mxu0  ;;  %v3558_v13 = vpop.f32.mrb[106].mxu1 }
 0x2ae   : > { %v8387_v15 = vadd.f32 %v9666_v11, %v2889_v37  ;;  %v2891_v16 = vpop.f32.mrb[93].mxu0  ;;  %9668 = vst [vmem:[#allocation85_spill] sm:$0xff] %v8393_v40  ;;  %v8397_v29 = vadd.f32 %v3558_v13, %v8286_v35  ;;  %v3560_v63 = vpop.f32.mrb[107].mxu1  ;;  %v9671_v37 = vld [vmem:[#allocation36_spill] sm:$0xff]  ;;  %v9672_v11 = vld [vmem:[#allocation57_spill] sm:$0xff]  ;;  %v9675_v40 = vld [vmem:[#allocation114_spill] sm:$0xff] }
 0x2af   : > { %v2892_v21 = vpop.f32.mrb[94].mxu0 }
 0x2b0   : > { %v8390_v14 = vadd.f32 %v9667_v38, %v2892_v21  ;;  %v2894_v32 = vpop.f32.mrb[95].mxu0  ;;  %9670 = vst [vmem:[#allocation87_spill] sm:$0xff] %v8397_v29  ;;  %4284 = vmatmul.mubr.bf16.gmra.mrb[212].mxu1 %v9672_v11  ;;  %v9673_v21 = vld [vmem:[#allocation58_spill] sm:$0xff]  ;;  %v9674_v38 = vld [vmem:[#allocation111_spill] sm:$0xff]  ;;  %v838_v29 = vstv %s837_s18  ;;  %s6818_s18 = scalar_lea.vmem %s6817_s10, 8192 }
 0x2b1   : > { %4291 = vmatprep.mubr.bf16.mxu1 %v9673_v21  ;;  %v808_v21 = vld [vmem:[%s7348_s16] sm:$0xf]  ;;  %vm8414_vm4 = vcmp.eq.s32.totalorder %v838_v29, 1  ;;  %p6820_p6 = scmp.lt.s32.totalorder %s6818_s18, %s6812_s12 }
 0x2b2   : > { %6325 = vmatmul.mubr.bf16.gmra.mrb[200].mxu0 %v9669_v5  ;;  %v9677_v5 = vld [vmem:[#allocation37_spill] sm:$0xff]  ;;  %v9683_v29 = vld [vmem:[#allocation60_spill] sm:$0xff] }
 0x2b3   : > { %6328 = vmatprep.mubr.bf16.mxu0 %v9671_v37  ;;  %v3563_v28 = vpop.f32.mrb[108].mxu1  ;;  %p6821_p3 = por %p6820_p6, %p6819_p8 }
 0x2b4   : > { %v8410_v63 = vadd.f32 %v3563_v28, %v8295_v4  ;;  %v3565_v11 = vpop.f32.mrb[109].mxu1  ;;  %v840_v4 = vsel %vm8414_vm4, 0, %v808_v21  ;;  %v9682_v28 = vld [vmem:[#allocation59_spill] sm:$0xff] }
 0x2b5   : > { %v2897_v16 = vpop.f32.mrb[96].mxu0  ;;  %v3566_v37 = vpop.f32.mrb[110].mxu1  ;;  %v9684_v11 = vld [vmem:[#allocation109_spill] sm:$0xff]  ;;  %p6822_p7 = pnand %p6821_p3, %p6815_p4 }
 0x2b6   : > { %v8404_v39 = vadd.f32 %v9674_v38, %v2897_v16  ;;  %v2899_v18 = vpop.f32.mrb[97].mxu0  ;;  %9676 = vst [vmem:[#allocation27_spill] sm:$0xff] %v8410_v63  ;;  %v8419_v38 = vadd.f32 %v3566_v37, %v8300_v52 }
 0x2b7   : > { %v2900_v32 = vpop.f32.mrb[98].mxu0  ;;  %v3568_v18 = vpop.f32.mrb[111].mxu1 }
 0x2b8   : > { %v8407_v35 = vadd.f32 %v9675_v40, %v2900_v32  ;;  %v2902_v13 = vpop.f32.mrb[99].mxu0  ;;  %9680 = vst [vmem:[#allocation28_spill] sm:$0xff] %v8419_v38  ;;  %v9681_v40 = vld [vmem:[#allocation38_spill] sm:$0xff]  ;;  %v5653_v32 = vcombine.low %v840_v4, %v840_v4  ;;  %4292 = vmatmul.mubr.bf16.gmra.mrb[216].mxu1 %v9682_v28  ;;  %v9685_v38 = vld [vmem:[#allocation113_spill] sm:$0xff] }
 0x2b9   : > { %4299 = vmatprep.mubr.bf16.mxu1 %v9683_v29  ;;  %v811_v28 = vld [vmem:[%s7348_s16 + $0xc] sm:$0xf]  ;;  %v809_v29 = vld [vmem:[%s7348_s16 + $0x4] sm:$0xf]  ;;  %s5389_s16 = scalar_lea.sflag [#allocation6], %s7329_s14 }
 0x2ba   : > { %6329 = vmatmul.mubr.bf16.gmra.mrb[204].mxu0 %v9677_v5  ;;  %859 = vst [vmem:[#allocation2 + $0x198] sm:$0xf0] %v5653_v32 }
 0x2bb   : > { %6332 = vmatprep.mubr.bf16.mxu0 %v9681_v40  ;;  %v3571_v18 = vpop.f32.mrb[112].mxu1 }
 0x2bc   : > { %v8433_v21 = vadd.f32 %v3571_v18, %v8309_v56  ;;  %v3573_v4 = vpop.f32.mrb[113].mxu1  ;;  %v841_v56 = vsel %vm8414_vm4, 0, %v809_v29  ;;  %v9690_v18 = vld [vmem:[#allocation61_spill] sm:$0xff] }
 0x2bd   : > { %v2905_v13 = vpop.f32.mrb[100].mxu0  ;;  %v3574_v45 = vpop.f32.mrb[114].mxu1 }
 0x2be   : > { %v8427_v63 = vadd.f32 %v9684_v11, %v2905_v13  ;;  %v2907_v52 = vpop.f32.mrb[101].mxu0  ;;  %9686 = vst [vmem:[#allocation49_spill] sm:$0xff] %v8433_v21  ;;  %v843_v13 = vsel %vm8414_vm4, 0, %v811_v28  ;;  %v8442_v32 = vadd.f32 %v3574_v45, %v8314_v53  ;;  %v3576_v11 = vpop.f32.mrb[115].mxu1  ;;  %v9691_v28 = vld [vmem:[#allocation62_spill] sm:$0xff]  ;;  %v9692_v21 = vld [vmem:[#allocation121_spill] sm:$0xff] }
 0x2bf   : > { %v2908_v37 = vpop.f32.mrb[102].mxu0  ;;  %v5655_v52 = vcombine.low %v843_v13, %v843_v13 }
 0x2c0   : > { %v8430_v40 = vadd.f32 %v9685_v38, %v2908_v37  ;;  %v2910_v5 = vpop.f32.mrb[103].mxu0  ;;  %9688 = vst [vmem:[#allocation50_spill] sm:$0xff] %v8442_v32  ;;  %v9689_v38 = vld [vmem:[#allocation40_spill] sm:$0xff]  ;;  %4300 = vmatmul.mubr.bf16.gmra.mrb[220].mxu1 %v9690_v18 }
 0x2c1   : > { %v842_v5 = vsel %vm8414_vm4, 0, %v810_v49  ;;  %861 = vst [vmem:[#allocation2 + $0x1a8] sm:$0xf] %v5655_v52  ;;  %4307 = vmatprep.mubr.bf16.mxu1 %v9691_v28  ;;  %v9696_v28 = vld [vmem:[#allocation64_spill] sm:$0xff] }
 0x2c2   : > { %6333 = vmatmul.mubr.bf16.gmra.mrb[208].mxu0 %v9687_v24  ;;  %v8449_v37 = vcombine.low %v841_v56, %v842_v5  ;;  %v9694_v5 = vld [vmem:[#allocation41_spill] sm:$0xff] }
 0x2c3   : > { %6336 = vmatprep.mubr.bf16.mxu0 %v9689_v38  ;;  %v3579_v32 = vpop.f32.mrb[116].mxu1 }
 0x2c4   : > { %v8460_v49 = vadd.f32 %v3579_v32, %v8323_v26  ;;  %v3581_v13 = vpop.f32.mrb[117].mxu1 }
 0x2c5   : > { %v2913_v4 = vpop.f32.mrb[104].mxu0  ;;  %v3582_v56 = vpop.f32.mrb[118].mxu1 }
 0x2c6   : > { %v8454_v53 = vadd.f32 %v8071_v2, %v2913_v4  ;;  %v2915_v45 = vpop.f32.mrb[105].mxu0  ;;  %9693 = vst [vmem:[#allocation94_spill] sm:$0xff] %v8460_v49  ;;  %v8464_v52 = vadd.f32 %v3582_v56, %v8326_v36  ;;  %v3584_v18 = vpop.f32.mrb[119].mxu1  ;;  %v9695_v2 = vld [vmem:[#allocation63_spill] sm:$0xff] }
 0x2c7   : > { %v2916_v11 = vpop.f32.mrb[106].mxu0 }
 0x2c8   : > { %v8457_v29 = vadd.f32 %v9692_v21, %v2916_v11  ;;  %v2918_v16 = vpop.f32.mrb[107].mxu0  ;;  %4308 = vmatmul.mubr.bf16.gmra.mrb[224].mxu1 %v9695_v2  ;;  %v9697_v21 = vld [vmem:[#allocation117_spill] sm:$0xff] }
 0x2c9   : > { %4315 = vmatprep.mubr.bf16.mxu1 %v9696_v28  ;;  %v9698_v16 = vld [vmem:[#allocation120_spill] sm:$0xff] }
 0x2ca   : > { %6337 = vmatmul.mubr.bf16.gmra.mrb[212].mxu0 %v9694_v5 }
 0x2cb   : > { %6356 = vmatprep.mubr.bf16.mxu0 %v8116_v19  ;;  %v3587_v11 = vpop.f32.mrb[120].mxu1 }
 0x2cc   : > { %v8476_v36 = vadd.f32 %v3587_v11, %v8339_v54  ;;  %v3589_v56 = vpop.f32.mrb[121].mxu1 }
 0x2cd   : > { %v2921_v4 = vpop.f32.mrb[108].mxu0  ;;  %v3590_v19 = vpop.f32.mrb[122].mxu1 }
 0x2ce   : > { %v8470_v45 = vadd.f32 %v9697_v21, %v2921_v4  ;;  %v2923_v26 = vpop.f32.mrb[109].mxu0  ;;  %v8480_v18 = vadd.f32 %v3590_v19, %v8342_v30  ;;  %v3592_v2 = vpop.f32.mrb[123].mxu1  ;;  %v9699_v4 = vld [vmem:[#allocation65_spill] sm:$0xff]  ;;  %v9700_v21 = vld [vmem:[#allocation66_spill] sm:$0xff] }
 0x2cf   : > { %v2924_v32 = vpop.f32.mrb[110].mxu0 }
 0x2d0   : > { %v8473_v13 = vadd.f32 %v9698_v16, %v2924_v32  ;;  %v2926_v49 = vpop.f32.mrb[111].mxu0  ;;  %4316 = vmatmul.mubr.bf16.gmra.mrb[228].mxu1 %v9699_v4  ;;  %v9702_v4 = vld [vmem:[#allocation68_spill] sm:$0xff] }
 0x2d1   : > { %4323 = vmatprep.mubr.bf16.mxu1 %v9700_v21 }
 0x2d2   : > { %6357 = vmatmul.mubr.bf16.vlgmr.msra.gmra.mrb[216].mxu0 %v8134_v1 }
 0x2d3   : > { %6360 = vmatprep.mubr.bf16.mxu0 %v8137_v6  ;;  %v3595_v32 = vpop.f32.mrb[124].mxu1 }
 0x2d4   : > { %v8492_v30 = vadd.f32 %v3595_v32, %v8355_v25  ;;  %v3597_v16 = vpop.f32.mrb[125].mxu1 }
 0x2d5   : > { %v2929_v28 = vpop.f32.mrb[112].mxu0  ;;  %v3598_v6 = vpop.f32.mrb[126].mxu1 }
 0x2d6   : > { %v8486_v49 = vadd.f32 %v8096_v22, %v2929_v28  ;;  %v2931_v54 = vpop.f32.mrb[113].mxu0  ;;  %v8496_v56 = vadd.f32 %v3598_v6, %v8358_v61  ;;  %v3600_v19 = vpop.f32.mrb[127].mxu1  ;;  %v9701_v22 = vld [vmem:[#allocation67_spill] sm:$0xff] }
 0x2d7   : > { %v2932_v26 = vpop.f32.mrb[114].mxu0  ;;  %v9705_v19 = vld [vmem:[#allocation69_spill] sm:$0xff] }
 0x2d8   : > { %v8489_v11 = vadd.f32 %v8101_v8, %v2932_v26  ;;  %v2934_v1 = vpop.f32.mrb[115].mxu0  ;;  %4324 = vmatmul.mubr.bf16.gmra.mrb[232].mxu1 %v9701_v22  ;;  %v9703_v8 = vld [vmem:[#allocation125_spill] sm:$0xff]  ;;  %v9704_v26 = vld [vmem:[#allocation126_spill] sm:$0xff] }
 0x2d9   : > { %4331 = vmatprep.mubr.bf16.mxu1 %v9702_v4  ;;  %v9707_v4 = vld [vmem:[#allocation130_spill] sm:$0xff] }
 0x2da   : > { %6361 = vmatmul.mubr.bf16.gmra.mrb[220].mxu0 %v8146_v60 }
 0x2db   : > { %6364 = vmatprep.mubr.bf16.mxu0 %v8153_v42  ;;  %v3603_v54 = vpop.f32.mrb[128].mxu1 }
 0x2dc   : > { %v8508_v61 = vadd.f32 %v3603_v54, %v8371_v33  ;;  %v3605_v1 = vpop.f32.mrb[129].mxu1  ;;  %v9708_v54 = vld [vmem:[#allocation132_spill] sm:$0xff] }
 0x2dd   : > { %v2937_v2 = vpop.f32.mrb[116].mxu0  ;;  %v3606_v42 = vpop.f32.mrb[130].mxu1 }
 0x2de   : > { %v8502_v28 = vadd.f32 %v9703_v8, %v2937_v2  ;;  %v2939_v25 = vpop.f32.mrb[117].mxu0  ;;  %v8512_v16 = vadd.f32 %v3606_v42, %v8374_v34  ;;  %v3608_v6 = vpop.f32.mrb[131].mxu1  ;;  %v9706_v2 = vld [vmem:[#allocation70_spill] sm:$0xff] }
 0x2df   : > { %v2940_v21 = vpop.f32.mrb[118].mxu0  ;;  %v9709_v6 = vld [vmem:[#allocation71_spill] sm:$0xff] }
 0x2e0   : > { %v8505_v32 = vadd.f32 %v9704_v26, %v2940_v21  ;;  %v2942_v60 = vpop.f32.mrb[119].mxu0  ;;  %4332 = vmatmul.mubr.bf16.gmra.mrb[236].mxu1 %v9705_v19 }
 0x2e1   : > { %4339 = vmatprep.mubr.bf16.mxu1 %v9706_v2  ;;  %v9711_v2 = vld [vmem:[#allocation129_spill] sm:$0xff] }
 0x2e2   : > { %6365 = vmatmul.mubr.bf16.gmra.mrb[224].mxu0 %v8164_v58 }
 0x2e3   : > { %6368 = vmatprep.mubr.bf16.mxu0 %v8171_v41  ;;  %v3611_v21 = vpop.f32.mrb[132].mxu1 }
 0x2e4   : > { %v8524_v34 = vadd.f32 %v3611_v21, %v8387_v15  ;;  %v3613_v60 = vpop.f32.mrb[133].mxu1  ;;  %v9712_v21 = vld [vmem:[#allocation131_spill] sm:$0xff] }
 0x2e5   : > { %v2945_v22 = vpop.f32.mrb[120].mxu0  ;;  %v3614_v41 = vpop.f32.mrb[134].mxu1 }
 0x2e6   : > { %v8518_v8 = vadd.f32 %v9707_v4, %v2945_v22  ;;  %v2947_v33 = vpop.f32.mrb[121].mxu0  ;;  %v8528_v1 = vadd.f32 %v3614_v41, %v8390_v14  ;;  %v3616_v42 = vpop.f32.mrb[135].mxu1  ;;  %v9710_v22 = vld [vmem:[#allocation72_spill] sm:$0xff] }
 0x2e7   : > { %v2948_v25 = vpop.f32.mrb[122].mxu0  ;;  %v9714_v42 = vld [vmem:[#allocation73_spill] sm:$0xff] }
 0x2e8   : > { %v8521_v26 = vadd.f32 %v9708_v54, %v2948_v25  ;;  %v2950_v58 = vpop.f32.mrb[123].mxu0  ;;  %4340 = vmatmul.mubr.bf16.gmra.mrb[240].mxu1 %v9709_v6 }
 0x2e9   : > { %4347 = vmatprep.mubr.bf16.mxu1 %v9710_v22  ;;  %v9716_v22 = vld [vmem:[#allocation97_spill] sm:$0xff] }
 0x2ea   : > { %6369 = vmatmul.mubr.bf16.gmra.mrb[228].mxu0 %v8184_v3 }
 0x2eb   : > { %6372 = vmatprep.mubr.bf16.mxu0 %v8187_v23  ;;  %v3619_v25 = vpop.f32.mrb[136].mxu1 }
 0x2ec   : > { %v8540_v14 = vadd.f32 %v3619_v25, %v8404_v39  ;;  %v3621_v58 = vpop.f32.mrb[137].mxu1  ;;  %v9717_v39 = vld [vmem:[#allocation89_spill] sm:$0xff] }
 0x2ed   : > { %v2953_v19 = vpop.f32.mrb[124].mxu0  ;;  %v3622_v23 = vpop.f32.mrb[138].mxu1 }
 0x2ee   : > { %v8534_v4 = vadd.f32 %v9711_v2, %v2953_v19  ;;  %v2955_v15 = vpop.f32.mrb[125].mxu0  ;;  %v8544_v60 = vadd.f32 %v3622_v23, %v8407_v35  ;;  %v3624_v41 = vpop.f32.mrb[139].mxu1  ;;  %v9715_v19 = vld [vmem:[#allocation74_spill] sm:$0xff] }
 0x2ef   : > { %v2956_v33 = vpop.f32.mrb[126].mxu0  ;;  %v9719_v41 = vld [vmem:[#allocation91_spill] sm:$0xff] }
 0x2f0   : > { %v8537_v54 = vadd.f32 %v9712_v21, %v2956_v33  ;;  %v2958_v3 = vpop.f32.mrb[127].mxu0  ;;  %9713 = vst [vmem:[#allocation96_spill] sm:$0xff] %v8544_v60  ;;  %4348 = vmatmul.mubr.bf16.gmra.mrb[244].mxu1 %v9714_v42 }
 0x2f1   : > { %4355 = vmatprep.mubr.bf16.mxu1 %v9715_v19  ;;  %v9718_v3 = vld [vmem:[#allocation99_spill] sm:$0xff]  ;;  %v9720_v19 = vld [vmem:[#allocation137_spill] sm:$0xff] }
 0x2f2   : > { %6373 = vmatmul.mubr.bf16.gmra.mrb[232].mxu0 %v8202_v17 }
 0x2f3   : > { %6376 = vmatprep.mubr.bf16.mxu0 %v9623_v20  ;;  %v3627_v21 = vpop.f32.mrb[140].mxu1 }
 0x2f4   : > { %v8556_v20 = vadd.f32 %v3627_v21, %v8427_v63  ;;  %v3629_v23 = vpop.f32.mrb[141].mxu1  ;;  %v9722_v63 = vld [vmem:[#allocation138_spill] sm:$0xff] }
 0x2f5   : > { %v6198_v6 = vpop.f32.mrb[128].mxu0  ;;  %v9726_v23 = vld [vmem:[#allocation105_spill] sm:$0xff] }
 0x2f6   : > { %v3003_v2 = vadd.f32 %v6198_v6, %v9716_v22  ;;  %v2994_v15 = vpop.f32.mrb[129].mxu0  ;;  %v3630_v6 = vpop.f32.mrb[142].mxu1  ;;  %v9721_v22 = vld [vmem:[#allocation141_spill] sm:$0xff] }
 0x2f7   : > { %v2995_v33 = vadd.f32 %v2994_v15, %v9717_v39  ;;  %v6199_v25 = vpop.f32.mrb[130].mxu0  ;;  %v8567_v39 = vadd.f32 %v3630_v6, %v8430_v40  ;;  %v9727_v40 = vld [vmem:[#allocation116_spill] sm:$0xff] }
 0x2f8   : > { %v3006_v17 = vadd.f32 %v6199_v25, %v9718_v3  ;;  %v2997_v58 = vpop.f32.mrb[131].mxu0  ;;  %v8553_v35 = vadd.f32 %v8168_v7, %v3003_v2  ;;  %v3632_v7 = vpop.f32.mrb[143].mxu1  ;;  %v9723_v25 = vld [vmem:[#allocation75_spill] sm:$0xff] }
 0x2f9   : > { %v2998_v42 = vadd.f32 %v2997_v58, %v9719_v41  ;;  %v8560_v60 = vadd.f32 %v9720_v19, %v2995_v33  ;;  %4356 = vmatmul.mubr.bf16.gmra.mrb[248].mxu1 %v9723_v25  ;;  %v9724_v33 = vld [vmem:[#allocation76_spill] sm:$0xff]  ;;  %v9725_v3 = vld [vmem:[#allocation115_spill] sm:$0xff] }
 0x2fa   : > { %6377 = vmatmul.mubr.bf16.gmra.mrb[236].mxu0 %v9630_v46  ;;  %v8564_v15 = vadd.f32 %v9721_v22, %v3006_v17  ;;  %4363 = vmatprep.mubr.bf16.mxu1 %v9724_v33 }
 0x2fb   : > { %6380 = vmatprep.mubr.bf16.mxu0 %v9631_v9  ;;  %v8571_v2 = vadd.f32 %v9722_v63, %v2998_v42  ;;  %v3635_v19 = vpop.f32.mrb[144].mxu1  ;;  %v9728_v63 = vld [vmem:[#allocation107_spill] sm:$0xff] }
 0x2fc   : > { %v8582_v42 = vadd.f32 %v3635_v19, %v8454_v53  ;;  %v3637_v7 = vpop.f32.mrb[145].mxu1  ;;  %v9732_v19 = vld [vmem:[#allocation122_spill] sm:$0xff] }
 0x2fd   : > { %v6202_v21 = vpop.f32.mrb[132].mxu0 }
 0x2fe   : > { %v3019_v58 = vadd.f32 %v6202_v21, %v9725_v3  ;;  %v3010_v46 = vpop.f32.mrb[133].mxu0  ;;  %v3638_v21 = vpop.f32.mrb[146].mxu1 }
 0x2ff   : > { %v3011_v17 = vadd.f32 %v3010_v46, %v9726_v23  ;;  %v6203_v41 = vpop.f32.mrb[134].mxu0  ;;  %v8593_v46 = vadd.f32 %v3638_v21, %v8457_v29  ;;  %v9733_v29 = vld [vmem:[#allocation128_spill] sm:$0xff] }
 0x300   : > { %v3022_v6 = vadd.f32 %v6203_v41, %v9727_v40  ;;  %v3013_v22 = vpop.f32.mrb[135].mxu0  ;;  %v8579_v9 = vadd.f32 %v8204_v44, %v3019_v58  ;;  %v3640_v44 = vpop.f32.mrb[147].mxu1  ;;  %v9729_v58 = vld [vmem:[#allocation77_spill] sm:$0xff] }
 0x301   : > { %v3014_v25 = vadd.f32 %v3013_v22, %v9728_v63  ;;  %v8586_v33 = vadd.f32 %v8189_v27, %v3011_v17  ;;  %4364 = vmatmul.mubr.bf16.gmra.mrb[252].mxu1 %v9729_v58  ;;  %v9730_v27 = vld [vmem:[#allocation78_spill] sm:$0xff]  ;;  %v9731_v17 = vld [vmem:[#allocation127_spill] sm:$0xff] }
 0x302   : > { %6381 = vmatmul.mubr.bf16.gmra.mrb[240].mxu0 %v9637_v31  ;;  %v8590_v3 = vadd.f32 %v8207_v59, %v3022_v6  ;;  %4371 = vmatprep.mubr.bf16.mxu1 %v9730_v27 }
 0x303   : > { %6384 = vmatprep.mubr.bf16.mxu0 %v9639_v51  ;;  %v8597_v53 = vadd.f32 %v8191_v47, %v3014_v25  ;;  %v3643_v6 = vpop.f32.mrb[148].mxu1  ;;  %v9734_v25 = vld [vmem:[#allocation123_spill] sm:$0xff] }
 0x304   : > { %v8608_v47 = vadd.f32 %v3643_v6, %v8470_v45  ;;  %v3645_v63 = vpop.f32.mrb[149].mxu1 }
 0x305   : > { %v6206_v23 = vpop.f32.mrb[136].mxu0  ;;  %v3646_v58 = vpop.f32.mrb[150].mxu1  ;;  %v9741_v63 = vld [vmem:[#allocation134_spill] sm:$0xff] }
 0x306   : > { %v3035_v41 = vadd.f32 %v6206_v23, %v9731_v17  ;;  %v3026_v31 = vpop.f32.mrb[137].mxu0  ;;  %v8619_v27 = vadd.f32 %v3646_v58, %v8473_v13  ;;  %v9735_v17 = vld [vmem:[#allocation79_spill] sm:$0xff]  ;;  %v9739_v13 = vld [vmem:[#allocation136_spill] sm:$0xff] }
 0x307   : > { %v3027_v59 = vadd.f32 %v3026_v31, %v9732_v19  ;;  %v6207_v40 = vpop.f32.mrb[138].mxu0  ;;  %v9737_v31 = vld [vmem:[#allocation135_spill] sm:$0xff] }
 0x308   : > { %v3038_v22 = vadd.f32 %v6207_v40, %v9733_v29  ;;  %v3029_v7 = vpop.f32.mrb[139].mxu0  ;;  %v8605_v51 = vadd.f32 %v8227_v50, %v3035_v41  ;;  %v3648_v50 = vpop.f32.mrb[151].mxu1 }
 0x309   : > { %v3030_v21 = vadd.f32 %v3029_v7, %v9734_v25  ;;  %v8612_v44 = vadd.f32 %v8217_v57, %v3027_v59  ;;  %4372 = vmatmul.mubr.bf16.gmra.mrb[0].mxu1 %v9735_v17  ;;  %v9736_v57 = vld [vmem:[#allocation80_spill] sm:$0xff]  ;;  %v9738_v59 = vld [vmem:[#allocation133_spill] sm:$0xff] }
 0x30a   : > { %6385 = vmatmul.mubr.bf16.gmra.mrb[244].mxu0 %v9645_v62  ;;  %v8616_v23 = vadd.f32 %v8232_v48, %v3038_v22  ;;  %4379 = vmatprep.mubr.bf16.mxu1 %v9736_v57  ;;  %v9742_v50 = vld [vmem:[#allocation149_spill] sm:$0xff]  ;;  %v9744_v57 = vld [vmem:[#allocation32_spill] sm:$0xff] }
 0x30b   : > { %6388 = vmatprep.mubr.bf16.mxu0 %v9647_v12  ;;  %v8623_v45 = vadd.f32 %v8219_v10, %v3030_v21  ;;  %v3651_v6 = vpop.f32.mrb[152].mxu1 }
 0x30c   : > { %v8634_v10 = vadd.f32 %v3651_v6, %v8486_v49  ;;  %v3653_v7 = vpop.f32.mrb[153].mxu1  ;;  %v9745_v49 = vld [vmem:[#allocation148_spill] sm:$0xff] }
 0x30d   : > { %v6210_v41 = vpop.f32.mrb[140].mxu0  ;;  %v3654_v58 = vpop.f32.mrb[154].mxu1 }
 0x30e   : > { %v3051_v19 = vadd.f32 %v6210_v41, %v9737_v31  ;;  %v3042_v62 = vpop.f32.mrb[141].mxu0  ;;  %9740 = vst [vmem:[#allocation29_spill] sm:$0xff] %v8634_v10  ;;  %v8645_v41 = vadd.f32 %v3654_v58, %v8489_v11  ;;  %v9750_v11 = vld [vmem:[#allocation143_spill] sm:$0xff] }
 0x30f   : > { %v3043_v48 = vadd.f32 %v3042_v62, %v9738_v59  ;;  %v6211_v40 = vpop.f32.mrb[142].mxu0  ;;  %v9748_v59 = vld [vmem:[#allocation142_spill] sm:$0xff] }
 0x310   : > { %v3054_v29 = vadd.f32 %v6211_v40, %v9739_v13  ;;  %v3045_v22 = vpop.f32.mrb[143].mxu0  ;;  %v8631_v12 = vadd.f32 %v8255_v0, %v3051_v19  ;;  %9743 = vst [vmem:[#allocation30_spill] sm:$0xff] %v8645_v41  ;;  %v3656_v0 = vpop.f32.mrb[155].mxu1  ;;  %v9746_v19 = vld [vmem:[#allocation83_spill] sm:$0xff]  ;;  %v9764_v41 = vld [vmem:[#allocation82_spill] sm:$0xff] }
 0x311   : > { %v3046_v25 = vadd.f32 %v3045_v22, %v9741_v63  ;;  %v8638_v21 = vadd.f32 %v8241_v43, %v3043_v48  ;;  %4380 = vmatmul.mubr.bf16.gmra.mrb[4].mxu1 %v9746_v19  ;;  %v9747_v43 = vld [vmem:[#allocation84_spill] sm:$0xff]  ;;  %v9749_v40 = vld [vmem:[#allocation139_spill] sm:$0xff] }
 0x312   : > { %6389 = vmatmul.mubr.bf16.gmra.mrb[248].mxu0 %v9653_v55  ;;  %v8642_v17 = vadd.f32 %v9742_v50, %v3054_v29  ;;  %4387 = vmatprep.mubr.bf16.mxu1 %v9747_v43  ;;  %v9751_v63 = vld [vmem:[#allocation152_spill] sm:$0xff]  ;;  %v9754_v43 = vld [vmem:[#allocation33_spill] sm:$0xff] }
 0x313   : > { %6392 = vmatprep.mubr.bf16.mxu0 %v9744_v57  ;;  %v8649_v31 = vadd.f32 %v9745_v49, %v3046_v25  ;;  %v3659_v29 = vpop.f32.mrb[156].mxu1  ;;  %v9752_v0 = vld [vmem:[#allocation140_spill] sm:$0xff]  ;;  %v9753_v49 = vld [vmem:[#allocation150_spill] sm:$0xff] }
 0x314   : > { %v8660_v25 = vadd.f32 %v3659_v29, %v8502_v28  ;;  %v3661_v50 = vpop.f32.mrb[157].mxu1  ;;  %v9758_v28 = vld [vmem:[#allocation151_spill] sm:$0xff] }
 0x315   : > { %v6214_v62 = vpop.f32.mrb[144].mxu0 }
 0x316   : > { %v3067_v48 = vadd.f32 %v6214_v62, %v9748_v59  ;;  %v3058_v55 = vpop.f32.mrb[145].mxu0  ;;  %v3662_v62 = vpop.f32.mrb[158].mxu1  ;;  %v9755_v59 = vld [vmem:[#allocation153_spill] sm:$0xff] }
 0x317   : > { %v3059_v6 = vadd.f32 %v3058_v55, %v9749_v40  ;;  %v6215_v13 = vpop.f32.mrb[146].mxu0  ;;  %v8671_v40 = vadd.f32 %v3662_v62, %v8505_v32  ;;  %v9763_v32 = vld [vmem:[#allocation147_spill] sm:$0xff] }
 0x318   : > { %v3070_v22 = vadd.f32 %v6215_v13, %v9750_v11  ;;  %v3061_v7 = vpop.f32.mrb[147].mxu0  ;;  %v8657_v58 = vadd.f32 %v9751_v63, %v3067_v48  ;;  %v3664_v48 = vpop.f32.mrb[159].mxu1  ;;  %v9757_v13 = vld [vmem:[#allocation34_spill] sm:$0xff] }
 0x319   : > { %v3062_v57 = vadd.f32 %v3061_v7, %v9752_v0  ;;  %v8664_v19 = vadd.f32 %v9753_v49, %v3059_v6  ;;  %9756 = vst [vmem:[#allocation51_spill] sm:$0xff] %v8671_v40  ;;  %v9759_v11 = vld [vmem:[#allocation90_spill] sm:$0xff]  ;;  %v9760_v6 = vld [vmem:[#allocation92_spill] sm:$0xff] }
 0x31a   : > { %6393 = vmatmul.mubr.bf16.gmra.mrb[252].mxu0 %v9754_v43  ;;  %v8668_v55 = vadd.f32 %v9755_v59, %v3070_v22  ;;  %4388 = vmatmul.mubr.bf16.gmra.mrb[8].mxu1 %v9759_v11  ;;  %v9761_v63 = vld [vmem:[#allocation146_spill] sm:$0xff]  ;;  %v9762_v49 = vld [vmem:[#allocation144_spill] sm:$0xff]  ;;  %v9765_v11 = vld [vmem:[#allocation145_spill] sm:$0xff] }
 0x31b   : > { %6396 = vmatprep.mubr.bf16.mxu0 %v9757_v13  ;;  %v8675_v29 = vadd.f32 %v9758_v28, %v3062_v57  ;;  %4395 = vmatprep.mubr.bf16.mxu1 %v9760_v6  ;;  %v3667_v59 = vpop.f32.mrb[160].mxu1  ;;  %v9766_v6 = vld [vmem:[#allocation44_spill] sm:$0xff] }
 0x31c   : > { %v8686_v57 = vadd.f32 %v3667_v59, %v8518_v8  ;;  %v3669_v28 = vpop.f32.mrb[161].mxu1  ;;  %v9770_v8 = vld [vmem:[#allocation81_spill] sm:$0xff] }
 0x31d   : > { %v6218_v7 = vpop.f32.mrb[148].mxu0 }
 0x31e   : > { %v3083_v50 = vadd.f32 %v6218_v7, %v9761_v63  ;;  %v3074_v0 = vpop.f32.mrb[149].mxu0  ;;  %v3670_v7 = vpop.f32.mrb[162].mxu1  ;;  %v9767_v63 = vld [vmem:[#allocation35_spill] sm:$0xff] }
 0x31f   : > { %v3075_v22 = vadd.f32 %v3074_v0, %v9762_v49  ;;  %v6219_v43 = vpop.f32.mrb[150].mxu0  ;;  %v9768_v0 = vld [vmem:[#allocation24_spill] sm:$0xff] }
 0x320   : > { %v3086_v62 = vadd.f32 %v6219_v43, %v9763_v32  ;;  %v3077_v48 = vpop.f32.mrb[151].mxu0  ;;  %v8683_v13 = vadd.f32 %v9764_v41, %v3083_v50  ;;  %v8697_v43 = vadd.f32 %v3670_v7, %v8521_v26  ;;  %v3672_v41 = vpop.f32.mrb[163].mxu1  ;;  %v9769_v50 = vld [vmem:[#allocation36_spill] sm:$0xff]  ;;  %v9771_v32 = vld [vmem:[#allocation98_spill] sm:$0xff] }
 0x321   : > { %v3078_v40 = vadd.f32 %v3077_v48, %v9765_v11  ;;  %v8690_v10 = vadd.f32 %v9766_v6, %v3075_v22  ;;  %v9772_v22 = vld [vmem:[#allocation100_spill] sm:$0xff] }
 0x322   : > { %6397 = vmatmul.mubr.bf16.gmra.mrb[0].mxu0 %v9767_v63  ;;  %v8694_v49 = vadd.f32 %v9768_v0, %v3086_v62  ;;  %4396 = vmatmul.mubr.bf16.gmra.mrb[12].mxu1 %v9771_v32  ;;  %v9775_v32 = vld [vmem:[#allocation38_spill] sm:$0xff] }
 0x323   : > { %6400 = vmatprep.mubr.bf16.mxu0 %v9769_v50  ;;  %v8701_v59 = vadd.f32 %v9770_v8, %v3078_v40  ;;  %4403 = vmatprep.mubr.bf16.mxu1 %v9772_v22  ;;  %v3675_v6 = vpop.f32.mrb[164].mxu1  ;;  %v9777_v22 = vld [vmem:[#allocation108_spill] sm:$0xff] }
 0x324   : > { %v8715_v40 = vadd.f32 %v3675_v6, %v8534_v4  ;;  %v3677_v0 = vpop.f32.mrb[165].mxu1 }
 0x325   : > { %v6278_v48 = vpop.f32.mrb[152].mxu0  ;;  %v3678_v50 = vpop.f32.mrb[166].mxu1  ;;  %v1779_v0 = vld [vmem:[#allocation2 + $0x198] sm:$0xf0] }
 0x326   : > { %v8706_v28 = vadd.f32 %v6278_v48, %v8553_v35  ;;  %v3716_v11 = vpop.f32.mrb[153].mxu0  ;;  %v9774_v35 = vld [vmem:[#allocation37_spill] sm:$0xff]  ;;  %v8722_v8 = vadd.f32 %v3678_v50, %v8537_v54  ;;  %v9776_v48 = vld [vmem:[#allocation106_spill] sm:$0xff] }
 0x327   : > { %v8709_v62 = vadd.f32 %v3716_v11, %v8560_v60  ;;  %v6279_v26 = vpop.f32.mrb[154].mxu0  ;;  %v3680_v60 = vpop.f32.mrb[167].mxu1 }
 0x328   : > { %v8712_v7 = vadd.f32 %v6279_v26, %v8564_v15  ;;  %v3719_v63 = vpop.f32.mrb[155].mxu0 }
 0x329   : > { %v8718_v41 = vadd.f32 %v3719_v63, %v8571_v2 }
 0x32a   : > { %6401 = vmatmul.mubr.bf16.gmra.mrb[4].mxu0 %v9774_v35  ;;  %4404 = vmatmul.mubr.bf16.gmra.mrb[16].mxu1 %v9776_v48  ;;  %v9782_v48 = vld [vmem:[#allocation110_spill] sm:$0xff] }
 0x32b   : > { %9773 = vst [vmem:[#allocation52_spill] sm:$0xff] %v8718_v41  ;;  %6404 = vmatprep.mubr.bf16.mxu0 %v9775_v32  ;;  %4411 = vmatprep.mubr.bf16.mxu1 %v9777_v22  ;;  %v8733_v6 = vpop.f32.mrb[168].mxu1  ;;  %v2229_v32 = vshll.u32 %v1779_v0, 16 }
 0x32c   : > { %v4199_v50 = vpop.f32.mrb[169].mxu1 }
 0x32d   : > { %v6282_v15 = vpop.f32.mrb[156].mxu0  ;;  %v8741_v60 = vpop.f32.mrb[170].mxu1 }
 0x32e   : > { %v8728_v4 = vadd.f32 %v6282_v15, %v8579_v9  ;;  %v3732_v11 = vpop.f32.mrb[157].mxu0  ;;  %v4202_v9 = vpop.f32.mrb[171].mxu1 }
 0x32f   : > { %v8731_v2 = vadd.f32 %v3732_v11, %v8586_v33  ;;  %v6283_v26 = vpop.f32.mrb[158].mxu0  ;;  %v2226_v33 = vshrl.u32 %v1779_v0, 16 }
 0x330   : > { %9778 = vst [vmem:[#allocation93_spill] sm:$0xff] %v8728_v4  ;;  %v8736_v54 = vadd.f32 %v6283_v26, %v8590_v3  ;;  %v3735_v63 = vpop.f32.mrb[159].mxu0  ;;  %v9783_v3 = vld [vmem:[#allocation112_spill] sm:$0xff]  ;;  %v1371_v26 = vshll.u32 %v8449_v37, 16 }
 0x331   : > { %9779 = vst [vmem:[#allocation95_spill] sm:$0xff] %v8731_v2  ;;  %v8739_v35 = vadd.f32 %v3735_v63, %v8597_v53  ;;  %v1368_v53 = vshrl.u32 %v8449_v37, 16  ;;  %v2228_v50 = vrot.slane %v2226_v33, 4  ;;  %v9788_v33 = vld [vmem:[#allocation42_spill] sm:$0xff] }
 0x332   : > { %9780 = vst [vmem:[#allocation31_spill] sm:$0xff] %v8736_v54  ;;  %6405 = vmatmul.mubr.bf16.gmra.mrb[8].mxu0 %v9687_v24  ;;  %4412 = vmatmul.mubr.bf16.gmra.mrb[20].mxu1 %v9782_v48 }
 0x333   : > { %9781 = vst [vmem:[#allocation53_spill] sm:$0xff] %v8739_v35  ;;  %6408 = vmatprep.mubr.bf16.mxu0 %v9689_v38  ;;  %4419 = vmatprep.mubr.bf16.mxu1 %v9783_v3  ;;  %v1781_v38 = vld [vmem:[#allocation2 + $0x1a8] sm:$0x1f]  ;;  %v8755_v0 = vpop.f32.mrb[172].mxu1  ;;  %v2231_v3 = vrot.slane %v2229_v32, 5  ;;  %v9789_v32 = vld [vmem:[#allocation118_spill] sm:$0xff] }
 0x334   : > { %v2243_v2 = vshrl.u32 %v1781_v38, 16 }
 0x335   : > { %v6286_v15 = vpop.f32.mrb[160].mxu0 }
 0x336   : > { %v8748_v22 = vadd.f32 %v6286_v15, %v8605_v51  ;;  %v3748_v11 = vpop.f32.mrb[161].mxu0  ;;  %v2236_v51 = vrot.slane %v1368_v53, 4  ;;  %v2239_v15 = vrot.slane %v1371_v26, 5 }
 0x337   : > { %v8753_v24 = vadd.f32 %v3748_v11, %v8612_v44  ;;  %v6287_v63 = vpop.f32.mrb[162].mxu0  ;;  %v913_v44 = vld [vmem:[#allocation2 + $0x198] sm:$0xf8] }
 0x338   : > { %9784 = vst [vmem:[#allocation54_spill] sm:$0xff] %v8748_v22  ;;  %v8758_v9 = vadd.f32 %v6287_v63, %v8616_v23  ;;  %v3751_v48 = vpop.f32.mrb[163].mxu0  ;;  %v4207_v22 = vpop.f32.mrb[173].mxu1  ;;  %v2246_v23 = vshll.u32 %v1781_v38, 16  ;;  %v2232_v63 = vor.u32 %v2231_v3, %v2228_v50  ;;  %v1363_v41 = vshll.u32 %v913_v44, 16 }
 0x339   : > { %9785 = vst [vmem:[#allocation102_spill] sm:$0xff] %v8753_v24  ;;  %v8761_v35 = vadd.f32 %v3751_v48, %v8623_v45  ;;  %v8763_v54 = vpop.f32.mrb[174].mxu1  ;;  %v1508_v24 = vld [vmem:[#allocation2 + $0x198] sm:$0xf0]  ;;  %v1360_v22 = vshrl.u32 %v913_v44, 16  ;;  %v9790_v45 = vld [vmem:[#allocation119_spill] sm:$0xff] }
 0x33a   : > { %9786 = vst [vmem:[#allocation104_spill] sm:$0xff] %v8758_v9  ;;  %6409 = vmatmul.mubr.bf16.gmra.mrb[12].mxu0 %v9694_v5  ;;  %v4210_v11 = vpop.f32.mrb[175].mxu1  ;;  %v2240_v9 = vor.u32 %v2239_v15, %v2236_v51  ;;  %4420 = vmatmul.mubr.bf16.gmra.mrb[24].mxu1 %v9789_v32  ;;  %v1652_v38 = vrot.slane %v8449_v37, 4  ;;  %v2245_v50 = vrot.slane %v2243_v2, 4  ;;  %v2248_v3 = vrot.slane %v2246_v23, 5 }
 0x33b   : > { %9787 = vst [vmem:[#allocation55_spill] sm:$0xff] %v8761_v35  ;;  %6412 = vmatprep.mubr.bf16.mxu0 %v9788_v33  ;;  %4427 = vmatprep.mubr.bf16.mxu1 %v9790_v45  ;;  %v1651_v35 = vrot.slane %v1508_v24, 4  ;;  %v8776_v51 = vpop.f32.mrb[176].mxu1  ;;  %v1362_v24 = vrot.slane %v1360_v22, 3  ;;  %v1370_v37 = vrot.slane %v1368_v53, 3  ;;  %v1373_v2 = vrot.slane %v1371_v26, 4 }
 0x33c   : > { %v2241_v32 = vsel %vm1782_vm0, %v2232_v63, %v2240_v9  ;;  %v9794_v63 = vld [vmem:[#allocation124_spill] sm:$0xff] }
 0x33d   : > { %v6290_v4 = vpop.f32.mrb[164].mxu0  ;;  %v1374_v22 = vor.u32 %v1373_v2, %v1370_v37 }
 0x33e   : > { %v8770_v48 = vadd.f32 %v6290_v4, %v8631_v12  ;;  %v3764_v5 = vpop.f32.mrb[165].mxu0  ;;  %v4215_v12 = vpop.f32.mrb[177].mxu1 }
 0x33f   : > { %v8773_v11 = vadd.f32 %v3764_v5, %v8638_v21  ;;  %v6291_v33 = vpop.f32.mrb[166].mxu0  ;;  %v1365_v21 = vrot.slane %v1363_v41, 4  ;;  %v8785_v45 = vpop.f32.mrb[178].mxu1  ;;  %v9793_v5 = vld [vmem:[#allocation43_spill] sm:$0xff] }
 0x340   : > { %v8779_v15 = vadd.f32 %v6291_v33, %v8642_v17  ;;  %v3767_v44 = vpop.f32.mrb[167].mxu0  ;;  %v4218_v23 = vpop.f32.mrb[179].mxu1  ;;  %v2249_v17 = vor.u32 %v2248_v3, %v2245_v50  ;;  %v915_v33 = vld [vmem:[#allocation2 + $0x1a8] sm:$0xf] }
 0x341   : > { %9791 = vst [vmem:[#allocation56_spill] sm:$0xff] %v8773_v11  ;;  %v8783_v4 = vadd.f32 %v3767_v44, %v8649_v31  ;;  %v1653_v11 = vsel %vm1565_vm1, %v1651_v35, %v1652_v38  ;;  %v1366_v12 = vor.u32 %v1365_v21, %v1362_v24  ;;  %v1380_v53 = vshll.u32 %v915_v33, 16 }
 0x342   : > { %9792 = vst [vmem:[#allocation101_spill] sm:$0xff] %v8779_v15  ;;  %6413 = vmatmul.mubr.bf16.gmra.mrb[16].mxu0 %v9793_v5  ;;  %v1510_v15 = vld [vmem:[#allocation2 + $0x1a8] sm:$0xf]  ;;  %4428 = vmatmul.mubr.bf16.gmra.mrb[28].mxu1 %v9794_v63  ;;  %v1377_v5 = vshrl.u32 %v915_v33, 16  ;;  %v2250_v50 = vsel %vm1782_vm0, %v2240_v9, %v2249_v17 }
 0x343   : > { %6416 = vmatprep.mubr.bf16.mxu0 %v2241_v32  ;;  %4435 = vmatprep.mubr.bf16.mxu1 %v1653_v11  ;;  %v1654_v3 = vrot.slane %v1510_v15, 4  ;;  %v8797_v32 = vpop.f32.mrb[180].mxu1  ;;  %v1375_v2 = vsel %vm916_vm2, %v1366_v12, %v1374_v22  ;;  %v1382_v23 = vrot.slane %v1380_v53, 4 }
 0x344   : > { %v4223_v21 = vpop.f32.mrb[181].mxu1 }
 0x345   : > { %v6294_v31 = vpop.f32.mrb[168].mxu0  ;;  %v8805_v37 = vpop.f32.mrb[182].mxu1  ;;  %v1655_v9 = vsel %vm1565_vm1, %v1652_v38, %v1654_v3 }
 0x346   : > { %v8791_v41 = vadd.f32 %v6294_v31, %v8657_v58  ;;  %v3780_v44 = vpop.f32.mrb[169].mxu0  ;;  %v4226_v33 = vpop.f32.mrb[183].mxu1 }
 0x347   : > { %v8794_v26 = vadd.f32 %v3780_v44, %v8664_v19  ;;  %v6295_v35 = vpop.f32.mrb[170].mxu0  ;;  %v1379_v19 = vrot.slane %v1377_v5, 3  ;;  %v9801_v33 = vld [vmem:[#allocation88_spill] sm:$0xff] }
 0x348   : > { %v8800_v24 = vadd.f32 %v6295_v35, %v8668_v55  ;;  %v3783_v11 = vpop.f32.mrb[171].mxu0 }
 0x349   : > { %v8803_v58 = vadd.f32 %v3783_v11, %v8675_v29  ;;  %v1383_v55 = vor.u32 %v1382_v23, %v1379_v19 }
 0x34a   : > { %6417 = vmatmul.mubr.bf16.gmra.mrb[20].mxu0 %v2250_v50  ;;  %4436 = vmatmul.mubr.bf16.gmra.mrb[32].mxu1 %v1375_v2  ;;  %v9799_v2 = vld [vmem:[#allocation45_spill] sm:$0xff] }
 0x34b   : > { %4443 = vmatprep.mubr.bf16.mxu1 %v1655_v9  ;;  %v8815_v44 = vpop.f32.mrb[184].mxu1 }
 0x34c   : > { %v4231_v53 = vpop.f32.mrb[185].mxu1 }
 0x34d   : > { %v6298_v15 = vpop.f32.mrb[172].mxu0  ;;  %v8823_v35 = vpop.f32.mrb[186].mxu1  ;;  %v9805_v53 = vld [vmem:[#allocation47_spill] sm:$0xff] }
 0x34e   : > { %v8810_v17 = vadd.f32 %v6298_v15, %v8683_v13  ;;  %v3796_v63 = vpop.f32.mrb[173].mxu0  ;;  %v1384_v13 = vsel %vm916_vm2, %v1374_v22, %v1383_v55  ;;  %v4234_v50 = vpop.f32.mrb[187].mxu1 }
 0x34f   : > { %v8813_v29 = vadd.f32 %v3796_v63, %v8690_v10  ;;  %v6299_v31 = vpop.f32.mrb[174].mxu0  ;;  %v9797_v10 = vld [vmem:[#allocation86_spill] sm:$0xff] }
 0x350   : > { %v8818_v12 = vadd.f32 %v6299_v31, %v8694_v49  ;;  %v3799_v5 = vpop.f32.mrb[175].mxu0  ;;  %v9803_v63 = vld [vmem:[#allocation46_spill] sm:$0xff] }
 0x351   : > { %v8821_v38 = vadd.f32 %v3799_v5, %v8701_v59 }
 0x352   : > { %9795 = vst [vmem:[#allocation103_spill] sm:$0xff] %v8818_v12  ;;  %4444 = vmatmul.mubr.bf16.gmra.mrb[36].mxu1 %v1384_v13 }
 0x353   : > { %9796 = vst [vmem:[#allocation57_spill] sm:$0xff] %v8821_v38  ;;  %v8832_v23 = vpop.f32.mrb[188].mxu1 }
 0x354   : > { %v4239_v15 = vpop.f32.mrb[189].mxu1 }
 0x355   : > { %v6302_v3 = vpop.f32.mrb[176].mxu0  ;;  %v8840_v55 = vpop.f32.mrb[190].mxu1 }
 0x356   : > { %v8827_v11 = vadd.f32 %v6302_v3, %v9797_v10  ;;  %v3812_v21 = vpop.f32.mrb[177].mxu0  ;;  %v4242_v31 = vpop.f32.mrb[191].mxu1  ;;  %v9807_v3 = vld [vmem:[#allocation25_spill] sm:$0xff] }
 0x357   : > { %v8830_v19 = vadd.f32 %v3812_v21, %v9799_v2  ;;  %v6303_v49 = vpop.f32.mrb[178].mxu0 }
 0x358   : > { %9798 = vst [vmem:[#allocation58_spill] sm:$0xff] %v8827_v11  ;;  %v8835_v59 = vadd.f32 %v6303_v49, %v9801_v33  ;;  %v3815_v9 = vpop.f32.mrb[179].mxu0  ;;  %v9809_v49 = vld [vmem:[#allocation48_spill] sm:$0xff] }
 0x359   : > { %9800 = vst [vmem:[#allocation111_spill] sm:$0xff] %v8830_v19  ;;  %v8838_v22 = vadd.f32 %v3815_v9, %v9803_v63  ;;  %v9811_v63 = vld [vmem:[#allocation26_spill] sm:$0xff] }
 0x35a   : > { %9802 = vst [vmem:[#allocation114_spill] sm:$0xff] %v8835_v59 }
 0x35b   : > { %9804 = vst [vmem:[#allocation59_spill] sm:$0xff] %v8838_v22  ;;  %v8848_v2 = vpop.f32.mrb[192].mxu1 }
 0x35c   : > { %v4247_v9 = vpop.f32.mrb[193].mxu1 }
 0x35d   : > { %v6306_v5 = vpop.f32.mrb[180].mxu0  ;;  %v8856_v31 = vpop.f32.mrb[194].mxu1 }
 0x35e   : > { %v8843_v13 = vadd.f32 %v6306_v5, %v9805_v53  ;;  %v3828_v50 = vpop.f32.mrb[181].mxu0  ;;  %v4250_v59 = vpop.f32.mrb[195].mxu1  ;;  %v9813_v53 = vld [vmem:[#allocation27_spill] sm:$0xff] }
 0x35f   : > { %v8846_v10 = vadd.f32 %v3828_v50, %v9807_v3  ;;  %v6307_v21 = vpop.f32.mrb[182].mxu0  ;;  %v9815_v3 = vld [vmem:[#allocation85_spill] sm:$0xff] }
 0x360   : > { %9806 = vst [vmem:[#allocation60_spill] sm:$0xff] %v8843_v13  ;;  %v8851_v33 = vadd.f32 %v6307_v21, %v9809_v49  ;;  %v3831_v15 = vpop.f32.mrb[183].mxu0  ;;  %v9817_v21 = vld [vmem:[#allocation28_spill] sm:$0xff] }
 0x361   : > { %9808 = vst [vmem:[#allocation109_spill] sm:$0xff] %v8846_v10  ;;  %v8854_v22 = vadd.f32 %v3831_v15, %v9811_v63  ;;  %v9818_v63 = vld [vmem:[#allocation87_spill] sm:$0xff] }
 0x362   : > { %9810 = vst [vmem:[#allocation113_spill] sm:$0xff] %v8851_v33 }
 0x363   : > { %9812 = vst [vmem:[#allocation39_spill] sm:$0xff] %v8854_v22  ;;  %v8864_v11 = vpop.f32.mrb[196].mxu1 }
 0x364   : > { %v4255_v15 = vpop.f32.mrb[197].mxu1 }
 0x365   : > { %v6310_v5 = vpop.f32.mrb[184].mxu0  ;;  %v8872_v59 = vpop.f32.mrb[198].mxu1  ;;  %v9824_v15 = vld [vmem:[#allocation50_spill] sm:$0xff] }
 0x366   : > { %v8859_v13 = vadd.f32 %v6310_v5, %v9813_v53  ;;  %v3844_v50 = vpop.f32.mrb[185].mxu0  ;;  %v4258_v33 = vpop.f32.mrb[199].mxu1  ;;  %v9820_v53 = vld [vmem:[#allocation94_spill] sm:$0xff] }
 0x367   : > { %v8862_v10 = vadd.f32 %v3844_v50, %v9815_v3  ;;  %v6311_v19 = vpop.f32.mrb[186].mxu0  ;;  %v9822_v3 = vld [vmem:[#allocation49_spill] sm:$0xff] }
 0x368   : > { %9814 = vst [vmem:[#allocation40_spill] sm:$0xff] %v8859_v13  ;;  %v8867_v49 = vadd.f32 %v6311_v19, %v9817_v21  ;;  %v3847_v9 = vpop.f32.mrb[187].mxu0 }
 0x369   : > { %9816 = vst [vmem:[#allocation61_spill] sm:$0xff] %v8862_v10  ;;  %v8870_v22 = vadd.f32 %v3847_v9, %v9818_v63 }
 0x36b   : > { %9819 = vst [vmem:[#allocation62_spill] sm:$0xff] %v8870_v22  ;;  %v8880_v12 = vpop.f32.mrb[200].mxu1 }
 0x36c   : > { %v4263_v9 = vpop.f32.mrb[201].mxu1 }
 0x36d   : > { %v6314_v5 = vpop.f32.mrb[188].mxu0  ;;  %v8888_v33 = vpop.f32.mrb[202].mxu1 }
 0x36e   : > { %v8875_v13 = vadd.f32 %v6314_v5, %v9820_v53  ;;  %v3860_v50 = vpop.f32.mrb[189].mxu0  ;;  %v4266_v22 = vpop.f32.mrb[203].mxu1 }
 0x36f   : > { %v8878_v10 = vadd.f32 %v3860_v50, %v9822_v3  ;;  %v6315_v38 = vpop.f32.mrb[190].mxu0 }
 0x370   : > { %9821 = vst [vmem:[#allocation121_spill] sm:$0xff] %v8875_v13  ;;  %v8883_v19 = vadd.f32 %v6315_v38, %v8464_v52  ;;  %v3863_v21 = vpop.f32.mrb[191].mxu0 }
 0x371   : > { %9823 = vst [vmem:[#allocation41_spill] sm:$0xff] %v8878_v10  ;;  %v8886_v63 = vadd.f32 %v3863_v21, %v9824_v15 }
 0x373   : > { %v8896_v13 = vpop.f32.mrb[204].mxu1 }
 0x374   : > { %v4271_v21 = vpop.f32.mrb[205].mxu1 }
 0x375   : > { %v6318_v5 = vpop.f32.mrb[192].mxu0  ;;  %v8904_v22 = vpop.f32.mrb[206].mxu1 }
 0x376   : > { %v8891_v53 = vadd.f32 %v6318_v5, %v8492_v30  ;;  %v3876_v50 = vpop.f32.mrb[193].mxu0  ;;  %v4274_v15 = vpop.f32.mrb[207].mxu1 }
 0x377   : > { %v8894_v3 = vadd.f32 %v3876_v50, %v8476_v36  ;;  %v6319_v10 = vpop.f32.mrb[194].mxu0 }
 0x378   : > { %9825 = vst [vmem:[#allocation63_spill] sm:$0xff] %v8891_v53  ;;  %v8899_v52 = vadd.f32 %v6319_v10, %v8496_v56  ;;  %v3879_v38 = vpop.f32.mrb[195].mxu0 }
 0x379   : > { %9826 = vst [vmem:[#allocation64_spill] sm:$0xff] %v8894_v3  ;;  %v8902_v9 = vadd.f32 %v3879_v38, %v8480_v18 }
 0x37a   : > { %9827 = vst [vmem:[#allocation117_spill] sm:$0xff] %v8899_v52 }
 0x37b   : > { %9828 = vst [vmem:[#allocation120_spill] sm:$0xff] %v8902_v9  ;;  %v8912_v53 = vpop.f32.mrb[208].mxu1 }
 0x37c   : > { %v4279_v18 = vpop.f32.mrb[209].mxu1 }
 0x37d   : > { %v6322_v30 = vpop.f32.mrb[196].mxu0  ;;  %v8920_v21 = vpop.f32.mrb[210].mxu1 }
 0x37e   : > { %v8907_v5 = vadd.f32 %v6322_v30, %v8524_v34  ;;  %v3892_v36 = vpop.f32.mrb[197].mxu0  ;;  %v4282_v15 = vpop.f32.mrb[211].mxu1 }
 0x37f   : > { %v8910_v50 = vadd.f32 %v3892_v36, %v8508_v61  ;;  %v6323_v3 = vpop.f32.mrb[198].mxu0 }
 0x380   : > { %9829 = vst [vmem:[#allocation65_spill] sm:$0xff] %v8907_v5  ;;  %v8915_v56 = vadd.f32 %v6323_v3, %v8528_v1  ;;  %v3895_v10 = vpop.f32.mrb[199].mxu0 }
 0x381   : > { %9830 = vst [vmem:[#allocation66_spill] sm:$0xff] %v8910_v50  ;;  %v8918_v38 = vadd.f32 %v3895_v10, %v8512_v16  ;;  %v9836_v10 = vld [vmem:[#allocation96_spill] sm:$0xff] }
 0x382   : > { %9831 = vst [vmem:[#allocation67_spill] sm:$0xff] %v8915_v56 }
 0x383   : > { %9832 = vst [vmem:[#allocation68_spill] sm:$0xff] %v8918_v38  ;;  %v8928_v5 = vpop.f32.mrb[212].mxu1 }
 0x384   : > { %v4287_v16 = vpop.f32.mrb[213].mxu1 }
 0x385   : > { %v6326_v34 = vpop.f32.mrb[200].mxu0  ;;  %v8936_v15 = vpop.f32.mrb[214].mxu1 }
 0x386   : > { %v8923_v30 = vadd.f32 %v6326_v34, %v8556_v20  ;;  %v3908_v61 = vpop.f32.mrb[201].mxu0  ;;  %v4290_v38 = vpop.f32.mrb[215].mxu1 }
 0x387   : > { %v8926_v36 = vadd.f32 %v3908_v61, %v8540_v14  ;;  %v6327_v50 = vpop.f32.mrb[202].mxu0 }
 0x388   : > { %9833 = vst [vmem:[#allocation125_spill] sm:$0xff] %v8923_v30  ;;  %v8931_v1 = vadd.f32 %v6327_v50, %v8567_v39  ;;  %v3911_v3 = vpop.f32.mrb[203].mxu0 }
 0x389   : > { %9834 = vst [vmem:[#allocation126_spill] sm:$0xff] %v8926_v36  ;;  %v8934_v18 = vadd.f32 %v3911_v3, %v9836_v10 }
 0x38a   : > { %9835 = vst [vmem:[#allocation69_spill] sm:$0xff] %v8931_v1 }
 0x38b   : > { %9837 = vst [vmem:[#allocation70_spill] sm:$0xff] %v8934_v18  ;;  %v8944_v30 = vpop.f32.mrb[216].mxu1 }
 0x38c   : > { %v4295_v3 = vpop.f32.mrb[217].mxu1 }
 0x38d   : > { %v6330_v20 = vpop.f32.mrb[204].mxu0  ;;  %v8952_v38 = vpop.f32.mrb[218].mxu1 }
 0x38e   : > { %v8939_v34 = vadd.f32 %v6330_v20, %v8608_v47  ;;  %v3924_v14 = vpop.f32.mrb[205].mxu0  ;;  %v4298_v10 = vpop.f32.mrb[219].mxu1 }
 0x38f   : > { %v8942_v61 = vadd.f32 %v3924_v14, %v8582_v42  ;;  %v6331_v36 = vpop.f32.mrb[206].mxu0  ;;  %v9843_v14 = vld [vmem:[#allocation29_spill] sm:$0xff] }
 0x390   : > { %9838 = vst [vmem:[#allocation130_spill] sm:$0xff] %v8939_v34  ;;  %v8947_v39 = vadd.f32 %v6331_v36, %v8619_v27  ;;  %v3927_v50 = vpop.f32.mrb[207].mxu0  ;;  %v9845_v27 = vld [vmem:[#allocation51_spill] sm:$0xff] }
 0x391   : > { %9839 = vst [vmem:[#allocation132_spill] sm:$0xff] %v8942_v61  ;;  %v8950_v16 = vadd.f32 %v3927_v50, %v8593_v46  ;;  %v9847_v50 = vld [vmem:[#allocation30_spill] sm:$0xff] }
 0x392   : > { %9840 = vst [vmem:[#allocation71_spill] sm:$0xff] %v8947_v39 }
 0x393   : > { %9841 = vst [vmem:[#allocation72_spill] sm:$0xff] %v8950_v16  ;;  %v8960_v18 = vpop.f32.mrb[220].mxu1 }
 0x394   : > { %v4303_v46 = vpop.f32.mrb[221].mxu1 }
 0x395   : > { %v6334_v47 = vpop.f32.mrb[208].mxu0  ;;  %v8968_v10 = vpop.f32.mrb[222].mxu1 }
 0x396   : > { %v8955_v20 = vadd.f32 %v6334_v47, %v8660_v25  ;;  %v3940_v42 = vpop.f32.mrb[209].mxu0  ;;  %v4306_v39 = vpop.f32.mrb[223].mxu1 }
 0x397   : > { %v8958_v61 = vadd.f32 %v3940_v42, %v9843_v14  ;;  %v6335_v34 = vpop.f32.mrb[210].mxu0 }
 0x398   : > { %9842 = vst [vmem:[#allocation129_spill] sm:$0xff] %v8955_v20  ;;  %v8963_v36 = vadd.f32 %v6335_v34, %v9845_v27  ;;  %v3943_v3 = vpop.f32.mrb[211].mxu0 }
 0x399   : > { %9844 = vst [vmem:[#allocation131_spill] sm:$0xff] %v8958_v61  ;;  %v8966_v16 = vadd.f32 %v3943_v3, %v9847_v50 }
 0x39a   : > { %9846 = vst [vmem:[#allocation73_spill] sm:$0xff] %v8963_v36  ;;  %v9854_v36 = vld [vmem:[#allocation52_spill] sm:$0xff] }
 0x39b   : > { %9848 = vst [vmem:[#allocation74_spill] sm:$0xff] %v8966_v16  ;;  %v8976_v61 = vpop.f32.mrb[224].mxu1 }
 0x39c   : > { %v4311_v3 = vpop.f32.mrb[225].mxu1 }
 0x39d   : > { %v6338_v25 = vpop.f32.mrb[212].mxu0  ;;  %v8984_v39 = vpop.f32.mrb[226].mxu1 }
 0x39e   : > { %v8971_v47 = vadd.f32 %v6338_v25, %v8715_v40  ;;  %v3956_v42 = vpop.f32.mrb[213].mxu0  ;;  %v4314_v50 = vpop.f32.mrb[227].mxu1 }
 0x39f   : > { %v8974_v14 = vadd.f32 %v3956_v42, %v8686_v57  ;;  %v6339_v20 = vpop.f32.mrb[214].mxu0  ;;  %v8990_v57 = vld [vmem:[%s9853_s17] ss:$0 sm:$0xff] }
 0x3a0   : > { %9849 = vst [vmem:[#allocation97_spill] sm:$0xff] %v8971_v47  ;;  %v8979_v34 = vadd.f32 %v6339_v20, %v8722_v8  ;;  %v3959_v27 = vpop.f32.mrb[215].mxu0 }
 0x3a1   : > { %9850 = vst [vmem:[#allocation89_spill] sm:$0xff] %v8974_v14  ;;  %v8982_v46 = vadd.f32 %v3959_v27, %v8697_v43 }
 0x3a2   : > { %9851 = vst [vmem:[#allocation99_spill] sm:$0xff] %v8979_v34 }
 0x3a3   : > { %9852 = vst [vmem:[#allocation91_spill] sm:$0xff] %v8982_v46  ;;  %v8993_v42 = vpop.f32.mrb[228].mxu1 }
 0x3a4   : > { %v4319_v50 = vpop.f32.mrb[229].mxu1 }
 0x3a5   : > { %v6358_v40 = vpop.f32.mrb[216].mxu0 }
 0x3a6   : > { %v4495_v25 = vadd.f32 %v6358_v40, %v8755_v0  ;;  %v4486_v47 = vpop.f32.mrb[217].mxu0  ;;  %v8999_v40 = vpop.f32.mrb[230].mxu1 }
 0x3a7   : > { %v4487_v8 = vadd.f32 %v4486_v47, %v8733_v6  ;;  %v6359_v20 = vpop.f32.mrb[218].mxu0  ;;  %v4322_v6 = vpop.f32.mrb[231].mxu1 }
 0x3a8   : > { %v4743_v43 = vadd.f32 %v4495_v25, %v8706_v28  ;;  %v4498_v27 = vadd.f32 %v6359_v20, %v8763_v54  ;;  %v4489_v3 = vpop.f32.mrb[219].mxu0 }
 0x3a9   : > { %v4741_v34 = vadd.f32 %v4487_v8, %v8709_v62  ;;  %v4490_v0 = vadd.f32 %v4489_v3, %v8741_v60 }
 0x3aa   : > { %v4814_v46 = vadd.f32 %v8990_v57, %v4743_v43  ;;  %v4744_v14 = vadd.f32 %v4498_v27, %v8712_v7 }
 0x3ab   : > { %v4812_v47 = vadd.f32 %v8990_v57, %v4741_v34  ;;  %v4742_v16 = vadd.f32 %v4490_v0, %v9854_v36  ;;  %v9009_v3 = vpop.f32.mrb[232].mxu1  ;;  %v9855_v0 = vld [vmem:[#allocation93_spill] sm:$0xff] }
 0x3ac   : > { %vm4878_vm5 = vcmp.gt.f32.partialorder %v4814_v46, 0.0  ;;  %v4942_v28 = vmul.f32 0.01, %v4814_v46  ;;  %v4815_v54 = vadd.f32 %v8990_v57, %v4744_v14  ;;  %v4327_v56 = vpop.f32.mrb[233].mxu1 }
 0x3ad   : > { %vm4876_vm6 = vcmp.gt.f32.partialorder %v4812_v47, 0.0  ;;  %v4940_v25 = vmul.f32 0.01, %v4812_v47  ;;  %v4813_v62 = vadd.f32 %v8990_v57, %v4742_v16  ;;  %v6362_v60 = vpop.f32.mrb[220].mxu0 }
 0x3ae   : > { %vm4879_vm7 = vcmp.gt.f32.partialorder %v4815_v54, 0.0  ;;  %v4943_v8 = vmul.f32 0.01, %v4815_v54  ;;  %v4511_v20 = vadd.f32 %v6362_v60, %v8797_v32  ;;  %v4502_v43 = vpop.f32.mrb[221].mxu0  ;;  %v5006_v7 = vsel %vm4878_vm5, %v4814_v46, %v4942_v28  ;;  %v9856_v46 = vld [vmem:[#allocation95_spill] sm:$0xff] }
 0x3af   : > { %vm4877_vm8 = vcmp.gt.f32.partialorder %v4813_v62, 0.0  ;;  %v4941_v27 = vmul.f32 0.01, %v4813_v62  ;;  %v4503_v34 = vadd.f32 %v4502_v43, %v8776_v51  ;;  %v6363_v36 = vpop.f32.mrb[222].mxu0  ;;  %v5004_v14 = vsel %vm4876_vm6, %v4812_v47, %v4940_v25  ;;  %v9015_v51 = vpop.f32.mrb[234].mxu1  ;;  %v9857_v47 = vld [vmem:[#allocation31_spill] sm:$0xff] }
 0x3b0   : > { %v5007_v50 = vsel %vm4879_vm7, %v4815_v54, %v4943_v8  ;;  %v4747_v6 = vadd.f32 %v4511_v20, %v9855_v0  ;;  %v4514_v16 = vadd.f32 %v6363_v36, %v8805_v37  ;;  %v4505_v1 = vpop.f32.mrb[223].mxu0  ;;  %v4330_v25 = vpop.f32.mrb[235].mxu1  ;;  %v9858_v37 = vld [vmem:[#allocation53_spill] sm:$0xff] }
 0x3b1   : > { %v5877_v32 = vpack.c.bf16 %v5007_v50, %v5006_v7  ;;  %v5005_v60 = vsel %vm4877_vm8, %v4813_v62, %v4941_v27  ;;  %v4745_v28 = vadd.f32 %v4503_v34, %v9856_v46  ;;  %v4506_v9 = vadd.f32 %v4505_v1, %v8785_v45 }
 0x3b2   : > { %v5872_v43 = vpack.c.bf16 %v5005_v60, %v5004_v14  ;;  %v4818_v52 = vadd.f32 %v8990_v57, %v4747_v6  ;;  %v4748_v54 = vadd.f32 %v4514_v16, %v9857_v47  ;;  %v9859_v60 = vld [vmem:[#allocation54_spill] sm:$0xff] }
 0x3b3   : > { %6029 = vst [vmem:[%s7359_s13 + $0x8] sm:$0xff] %v5877_v32   ;;  %v4816_v8 = vadd.f32 %v8990_v57, %v4745_v28  ;;  %v4746_v20 = vadd.f32 %v4506_v9, %v9858_v37  ;;  %v9027_v6 = vpop.f32.mrb[236].mxu1 }
 0x3b4   : > { %5873 = vst [vmem:[%s7359_s13] sm:$0xff] %v5872_v43   ;;  %vm4882_vm9 = vcmp.gt.f32.partialorder %v4818_v52, 0.0  ;;  %v4946_v56 = vmul.f32 0.01, %v4818_v52  ;;  %v4819_v62 = vadd.f32 %v8990_v57, %v4748_v54  ;;  %v4335_v47 = vpop.f32.mrb[237].mxu1 }
 0x3b5   : > { %vm4880_vm10 = vcmp.gt.f32.partialorder %v4816_v8, 0.0  ;;  %v4944_v45 = vmul.f32 0.01, %v4816_v8  ;;  %v4817_v1 = vadd.f32 %v8990_v57, %v4746_v20  ;;  %v6366_v7 = vpop.f32.mrb[224].mxu0 }
 0x3b6   : > { %vm4883_vm11 = vcmp.gt.f32.partialorder %v4819_v62, 0.0  ;;  %v4947_v27 = vmul.f32 0.01, %v4819_v62  ;;  %v4527_v34 = vadd.f32 %v6366_v7, %v8832_v23  ;;  %v4518_v36 = vpop.f32.mrb[225].mxu0  ;;  %v5010_v14 = vsel %vm4882_vm9, %v4818_v52, %v4946_v56  ;;  %v9860_v52 = vld [vmem:[#allocation102_spill] sm:$0xff] }
 0x3b7   : > { %vm4881_vm12 = vcmp.gt.f32.partialorder %v4817_v1, 0.0  ;;  %v4945_v50 = vmul.f32 0.01, %v4817_v1  ;;  %v4519_v9 = vadd.f32 %v4518_v36, %v8815_v44  ;;  %v6367_v0 = vpop.f32.mrb[226].mxu0  ;;  %v5008_v16 = vsel %vm4880_vm10, %v4816_v8, %v4944_v45  ;;  %v9033_v44 = vpop.f32.mrb[238].mxu1  ;;  %v9861_v8 = vld [vmem:[#allocation104_spill] sm:$0xff] }
 0x3b8   : > { %v5011_v32 = vsel %vm4883_vm11, %v4819_v62, %v4947_v27  ;;  %v4751_v46 = vadd.f32 %v4527_v34, %v9859_v60  ;;  %v4530_v28 = vadd.f32 %v6367_v0, %v8840_v55  ;;  %v4521_v43 = vpop.f32.mrb[227].mxu0  ;;  %v4338_v45 = vpop.f32.mrb[239].mxu1  ;;  %v9862_v55 = vld [vmem:[#allocation55_spill] sm:$0xff] }
 0x3b9   : > { %v5887_v23 = vpack.c.bf16 %v5011_v32, %v5010_v14  ;;  %v5009_v54 = vsel %vm4881_vm12, %v4817_v1, %v4945_v50  ;;  %v4749_v25 = vadd.f32 %v4519_v9, %v9860_v52  ;;  %v4522_v37 = vadd.f32 %v4521_v43, %v8823_v35 }
 0x3ba   : > { %v5882_v20 = vpack.c.bf16 %v5009_v54, %v5008_v16  ;;  %v4822_v56 = vadd.f32 %v8990_v57, %v4751_v46  ;;  %v4752_v62 = vadd.f32 %v4530_v28, %v9861_v8 }
 0x3bb   : > { %6031 = vst [vmem:[%s7359_s13 + $0x18] sm:$0xff] %v5887_v23   ;;  %v4820_v7 = vadd.f32 %v8990_v57, %v4749_v25  ;;  %v4750_v27 = vadd.f32 %v4522_v37, %v9862_v55  ;;  %v9045_v28 = vpop.f32.mrb[240].mxu1 }
 0x3bc   : > { %6030 = vst [vmem:[%s7359_s13 + $0x10] sm:$0xff] %v5882_v20   ;;  %vm4886_vm13 = vcmp.gt.f32.partialorder %v4822_v56, 0.0  ;;  %v4950_v1 = vmul.f32 0.01, %v4822_v56  ;;  %v4823_v34 = vadd.f32 %v8990_v57, %v4752_v62  ;;  %v4343_v25 = vpop.f32.mrb[241].mxu1  ;;  %v9863_v20 = vld [vmem:[#allocation56_spill] sm:$0xff] }
 0x3bd   : > { %vm4884_vm14 = vcmp.gt.f32.partialorder %v4820_v7, 0.0  ;;  %v4948_v35 = vmul.f32 0.01, %v4820_v7  ;;  %v4821_v36 = vadd.f32 %v8990_v57, %v4750_v27  ;;  %v6370_v14 = vpop.f32.mrb[228].mxu0 }
 0x3be   : > { %vm4887_vm15 = vcmp.gt.f32.partialorder %v4823_v34, 0.0  ;;  %v4951_v50 = vmul.f32 0.01, %v4823_v34  ;;  %v4543_v9 = vadd.f32 %v6370_v14, %v8864_v11  ;;  %v4534_v0 = vpop.f32.mrb[229].mxu0  ;;  %v5014_v16 = vsel %vm4886_vm13, %v4822_v56, %v4950_v1 }
 0x3bf   : > { %vm4885_vm0 = vcmp.gt.f32.partialorder %v4821_v36, 0.0  ;;  %v4949_v32 = vmul.f32 0.01, %v4821_v36  ;;  %v4535_v60 = vadd.f32 %v4534_v0, %v8848_v2  ;;  %v6371_v46 = vpop.f32.mrb[230].mxu0  ;;  %v5012_v43 = vsel %vm4884_vm14, %v4820_v7, %v4948_v35  ;;  %v9051_v2 = vpop.f32.mrb[242].mxu1  ;;  %v9864_v7 = vld [vmem:[#allocation101_spill] sm:$0xff] }
 0x3c0   : > { %v5015_v47 = vsel %vm4887_vm15, %v4823_v34, %v4951_v50  ;;  %v4755_v23 = vadd.f32 %v4543_v9, %v8770_v48  ;;  %v4546_v54 = vadd.f32 %v6371_v46, %v8872_v59  ;;  %v4537_v52 = vpop.f32.mrb[231].mxu0  ;;  %v4346_v48 = vpop.f32.mrb[243].mxu1 }
 0x3c1   : > { %v5897_v11 = vpack.c.bf16 %v5015_v47, %v5014_v16  ;;  %v5013_v37 = vsel %vm4885_vm0, %v4821_v36, %v4949_v32  ;;  %v4753_v56 = vadd.f32 %v4535_v60, %v9863_v20  ;;  %v4538_v8 = vadd.f32 %v4537_v52, %v8856_v31 }
 0x3c2   : > { %v5892_v62 = vpack.c.bf16 %v5013_v37, %v5012_v43  ;;  %v4826_v45 = vadd.f32 %v8990_v57, %v4755_v23  ;;  %v4756_v55 = vadd.f32 %v4546_v54, %v9864_v7 }
 0x3c3   : > { %6033 = vst [vmem:[%s7359_s13 + $0x28] sm:$0xff] %v5897_v11   ;;  %v4824_v27 = vadd.f32 %v8990_v57, %v4753_v56  ;;  %v4754_v59 = vadd.f32 %v4538_v8, %v8783_v4  ;;  %v9063_v60 = vpop.f32.mrb[244].mxu1 }
 0x3c4   : > { %6032 = vst [vmem:[%s7359_s13 + $0x20] sm:$0xff] %v5892_v62   ;;  %vm4890_vm1 = vcmp.gt.f32.partialorder %v4826_v45, 0.0  ;;  %v4954_v1 = vmul.f32 0.01, %v4826_v45  ;;  %v4827_v34 = vadd.f32 %v8990_v57, %v4756_v55  ;;  %v4351_v52 = vpop.f32.mrb[245].mxu1 }
 0x3c5   : > { %vm4888_vm2 = vcmp.gt.f32.partialorder %v4824_v27, 0.0  ;;  %v4952_v31 = vmul.f32 0.01, %v4824_v27  ;;  %v4825_v35 = vadd.f32 %v8990_v57, %v4754_v59  ;;  %v6374_v36 = vpop.f32.mrb[232].mxu0 }
 0x3c6   : > { %vm4891_vm3 = vcmp.gt.f32.partialorder %v4827_v34, 0.0  ;;  %v4955_v14 = vmul.f32 0.01, %v4827_v34  ;;  %v4559_v50 = vadd.f32 %v6374_v36, %v8896_v13  ;;  %v4550_v9 = vpop.f32.mrb[233].mxu0  ;;  %v5018_v0 = vsel %vm4890_vm1, %v4826_v45, %v4954_v1 }
 0x3c7   : > { %vm4889_vm4 = vcmp.gt.f32.partialorder %v4825_v35, 0.0  ;;  %v4953_v16 = vmul.f32 0.01, %v4825_v35  ;;  %v4551_v4 = vadd.f32 %v4550_v9, %v8880_v12  ;;  %v6375_v32 = vpop.f32.mrb[234].mxu0  ;;  %v5016_v46 = vsel %vm4888_vm2, %v4824_v27, %v4952_v31  ;;  %v9069_v12 = vpop.f32.mrb[246].mxu1 }
 0x3c8   : > { %v5019_v43 = vsel %vm4891_vm3, %v4827_v34, %v4955_v14  ;;  %v4759_v47 = vadd.f32 %v4559_v50, %v8791_v41  ;;  %v4562_v23 = vadd.f32 %v6375_v32, %v8904_v22  ;;  %v4553_v54 = vpop.f32.mrb[235].mxu0  ;;  %v4354_v41 = vpop.f32.mrb[247].mxu1 }
 0x3c9   : > { %v5907_v13 = vpack.c.bf16 %v5019_v43, %v5018_v0  ;;  %v5017_v25 = vsel %vm4889_vm4, %v4825_v35, %v4953_v16  ;;  %v4757_v11 = vadd.f32 %v4551_v4, %v8794_v26  ;;  %v4554_v37 = vadd.f32 %v4553_v54, %v8888_v33 }
 0x3ca   : > { %v5902_v20 = vpack.c.bf16 %v5017_v25, %v5016_v46  ;;  %v4830_v56 = vadd.f32 %v8990_v57, %v4759_v47  ;;  %v4760_v8 = vadd.f32 %v4562_v23, %v8800_v24  ;;  %v9865_v47 = vld [vmem:[#allocation103_spill] sm:$0xff] }
 0x3cb   : > { %6035 = vst [vmem:[%s7359_s13 + $0x38] sm:$0xff] %v5907_v13   ;;  %v4828_v62 = vadd.f32 %v8990_v57, %v4757_v11  ;;  %v4758_v22 = vadd.f32 %v4554_v37, %v8803_v58 }
 0x3cc   : > { %6034 = vst [vmem:[%s7359_s13 + $0x30] sm:$0xff] %v5902_v20   ;;  %vm4894_vm5 = vcmp.gt.f32.partialorder %v4830_v56, 0.0  ;;  %v4958_v45 = vmul.f32 0.01, %v4830_v56  ;;  %v4831_v26 = vadd.f32 %v8990_v57, %v4760_v8  ;;  %v9081_v31 = vpop.f32.mrb[248].mxu1 }
 0x3cd   : > { %vm4892_vm6 = vcmp.gt.f32.partialorder %v4828_v62, 0.0  ;;  %v4956_v33 = vmul.f32 0.01, %v4828_v62  ;;  %v4829_v7 = vadd.f32 %v8990_v57, %v4758_v22  ;;  %v6378_v55 = vpop.f32.mrb[236].mxu0  ;;  %v4359_v0 = vpop.f32.mrb[249].mxu1 }
 0x3ce   : > { %vm4895_vm7 = vcmp.gt.f32.partialorder %v4831_v26, 0.0  ;;  %v4959_v48 = vmul.f32 0.01, %v4831_v26  ;;  %v4575_v24 = vadd.f32 %v6378_v55, %v8928_v5  ;;  %v4566_v27 = vpop.f32.mrb[237].mxu0  ;;  %v5022_v59 = vsel %vm4894_vm5, %v4830_v56, %v4958_v45 }
 0x3cf   : > { %vm4893_vm8 = vcmp.gt.f32.partialorder %v4829_v7, 0.0  ;;  %v4957_v1 = vmul.f32 0.01, %v4829_v7  ;;  %v4567_v58 = vadd.f32 %v4566_v27, %v8912_v53  ;;  %v6379_v34 = vpop.f32.mrb[238].mxu0  ;;  %v5020_v35 = vsel %vm4892_vm6, %v4828_v62, %v4956_v33  ;;  %v9087_v53 = vpop.f32.mrb[250].mxu1 }
 0x3d0   : > { %v5023_v36 = vsel %vm4895_vm7, %v4831_v26, %v4959_v48  ;;  %v4763_v14 = vadd.f32 %v4575_v24, %v8810_v17  ;;  %v4578_v50 = vadd.f32 %v6379_v34, %v8936_v15  ;;  %v4569_v9 = vpop.f32.mrb[239].mxu0  ;;  %v4362_v17 = vpop.f32.mrb[251].mxu1  ;;  %v9866_v15 = vld [vmem:[#allocation57_spill] sm:$0xff] }
 0x3d1   : > { %v5917_v5 = vpack.c.bf16 %v5023_v36, %v5022_v59  ;;  %v5021_v16 = vsel %vm4893_vm8, %v4829_v7, %v4957_v1  ;;  %v4761_v4 = vadd.f32 %v4567_v58, %v8813_v29  ;;  %v4570_v32 = vadd.f32 %v4569_v9, %v8920_v21  ;;  %v9867_v7 = vld [vmem:[#allocation58_spill] sm:$0xff]  ;;  %v9868_v1 = vld [vmem:[#allocation111_spill] sm:$0xff] }
 0x3d2   : > { %v5912_v46 = vpack.c.bf16 %v5021_v16, %v5020_v35  ;;  %v4834_v43 = vadd.f32 %v8990_v57, %v4763_v14  ;;  %v4764_v23 = vadd.f32 %v4578_v50, %v9865_v47  ;;  %v9869_v14 = vld [vmem:[#allocation114_spill] sm:$0xff] }
 0x3d3   : > { %6037 = vst [vmem:[%s7359_s13 + $0x48] sm:$0xff] %v5917_v5   ;;  %v4832_v54 = vadd.f32 %v8990_v57, %v4761_v4  ;;  %v4762_v52 = vadd.f32 %v4570_v32, %v9866_v15 }
 0x3d4   : > { %6036 = vst [vmem:[%s7359_s13 + $0x40] sm:$0xff] %v5912_v46   ;;  %vm4898_vm9 = vcmp.gt.f32.partialorder %v4834_v43, 0.0  ;;  %v4962_v13 = vmul.f32 0.01, %v4834_v43  ;;  %v4835_v29 = vadd.f32 %v8990_v57, %v4764_v23  ;;  %v9099_v45 = vpop.f32.mrb[252].mxu1 }
 0x3d5   : > { %vm4896_vm10 = vcmp.gt.f32.partialorder %v4832_v54, 0.0  ;;  %v4960_v21 = vmul.f32 0.01, %v4832_v54  ;;  %v4833_v25 = vadd.f32 %v8990_v57, %v4762_v52  ;;  %v6382_v11 = vpop.f32.mrb[240].mxu0  ;;  %v4367_v27 = vpop.f32.mrb[253].mxu1 }
 0x3d6   : > { %vm4899_vm11 = vcmp.gt.f32.partialorder %v4835_v29, 0.0  ;;  %v4963_v37 = vmul.f32 0.01, %v4835_v29  ;;  %v4591_v20 = vadd.f32 %v6382_v11, %v8960_v18  ;;  %v4582_v56 = vpop.f32.mrb[241].mxu0  ;;  %v5026_v8 = vsel %vm4898_vm9, %v4834_v43, %v4962_v13 }
 0x3d7   : > { %vm4897_vm12 = vcmp.gt.f32.partialorder %v4833_v25, 0.0  ;;  %v4961_v41 = vmul.f32 0.01, %v4833_v25  ;;  %v4583_v62 = vadd.f32 %v4582_v56, %v8944_v30  ;;  %v6383_v22 = vpop.f32.mrb[242].mxu0  ;;  %v5024_v26 = vsel %vm4896_vm10, %v4832_v54, %v4960_v21  ;;  %v9105_v30 = vpop.f32.mrb[254].mxu1 }
 0x3d8   : > { %v5027_v33 = vsel %vm4899_vm11, %v4835_v29, %v4963_v37  ;;  %v4767_v55 = vadd.f32 %v4591_v20, %v9867_v7  ;;  %v4594_v48 = vadd.f32 %v6383_v22, %v8968_v10  ;;  %v4585_v24 = vpop.f32.mrb[243].mxu0  ;;  %v4370_v9 = vpop.f32.mrb[255].mxu1  ;;  %v9870_v10 = vld [vmem:[#allocation59_spill] sm:$0xff]  ;;  %v9873_v7 = vld [vmem:[#allocation113_spill] sm:$0xff] }
 0x3d9   : > { %v5927_v18 = vpack.c.bf16 %v5027_v33, %v5026_v8  ;;  %v5025_v59 = vsel %vm4897_vm12, %v4833_v25, %v4961_v41  ;;  %v4765_v58 = vadd.f32 %v4583_v62, %v9868_v1  ;;  %v4586_v34 = vadd.f32 %v4585_v24, %v8952_v38  ;;  %v9871_v25 = vld [vmem:[#allocation60_spill] sm:$0xff]  ;;  %v9872_v41 = vld [vmem:[#allocation109_spill] sm:$0xff] }
 0x3da   : > { %v5922_v35 = vpack.c.bf16 %v5025_v59, %v5024_v26  ;;  %v4838_v36 = vadd.f32 %v8990_v57, %v4767_v55  ;;  %v4768_v50 = vadd.f32 %v4594_v48, %v9869_v14 }
 0x3db   : > { %6039 = vst [vmem:[%s7359_s13 + $0x58] sm:$0xff] %v5927_v18   ;;  %v4836_v0 = vadd.f32 %v8990_v57, %v4765_v58  ;;  %v4766_v5 = vadd.f32 %v4586_v34, %v9870_v10 }
 0x3dc   : > { %6038 = vst [vmem:[%s7359_s13 + $0x50] sm:$0xff] %v5922_v35   ;;  %vm4902_vm13 = vcmp.gt.f32.partialorder %v4838_v36, 0.0  ;;  %v4966_v16 = vmul.f32 0.01, %v4838_v36  ;;  %v4839_v4 = vadd.f32 %v8990_v57, %v4768_v50  ;;  %v9117_v13 = vpop.f32.mrb[0].mxu1 }
 0x3dd   : > { %vm4900_vm14 = vcmp.gt.f32.partialorder %v4836_v0, 0.0  ;;  %v4964_v38 = vmul.f32 0.01, %v4836_v0  ;;  %v4837_v32 = vadd.f32 %v8990_v57, %v4766_v5  ;;  %v6386_v46 = vpop.f32.mrb[244].mxu0  ;;  %v4375_v56 = vpop.f32.mrb[1].mxu1 }
 0x3de   : > { %vm4903_vm15 = vcmp.gt.f32.partialorder %v4839_v4, 0.0  ;;  %v4967_v43 = vmul.f32 0.01, %v4839_v4  ;;  %v4607_v47 = vadd.f32 %v6386_v46, %v8993_v42  ;;  %v4598_v23 = vpop.f32.mrb[245].mxu0  ;;  %v5030_v17 = vsel %vm4902_vm13, %v4838_v36, %v4966_v16 }
 0x3df   : > { %vm4901_vm0 = vcmp.gt.f32.partialorder %v4837_v32, 0.0  ;;  %v4965_v54 = vmul.f32 0.01, %v4837_v32  ;;  %v4599_v15 = vadd.f32 %v4598_v23, %v8976_v61  ;;  %v6387_v52 = vpop.f32.mrb[246].mxu0  ;;  %v5028_v29 = vsel %vm4900_vm14, %v4836_v0, %v4964_v38  ;;  %v9123_v61 = vpop.f32.mrb[2].mxu1  ;;  %v9876_v23 = vld [vmem:[#allocation61_spill] sm:$0xff] }
 0x3e0   : > { %v5031_v21 = vsel %vm4903_vm15, %v4839_v4, %v4967_v43  ;;  %v4771_v11 = vadd.f32 %v4607_v47, %v9871_v25  ;;  %v4610_v37 = vadd.f32 %v6387_v52, %v8999_v40  ;;  %v4601_v20 = vpop.f32.mrb[247].mxu0  ;;  %v4378_v48 = vpop.f32.mrb[3].mxu1  ;;  %v9874_v40 = vld [vmem:[#allocation39_spill] sm:$0xff]  ;;  %v9875_v4 = vld [vmem:[#allocation40_spill] sm:$0xff] }
 0x3e1   : > { %v5937_v42 = vpack.c.bf16 %v5031_v21, %v5030_v17  ;;  %v5029_v8 = vsel %vm4901_vm0, %v4837_v32, %v4965_v54  ;;  %v4769_v62 = vadd.f32 %v4599_v15, %v9872_v41  ;;  %v4602_v22 = vadd.f32 %v4601_v20, %v8984_v39 }
 0x3e2   : > { %v5932_v26 = vpack.c.bf16 %v5029_v8, %v5028_v29  ;;  %v4842_v33 = vadd.f32 %v8990_v57, %v4771_v11  ;;  %v4772_v55 = vadd.f32 %v4610_v37, %v9873_v7 }
 0x3e3   : > { %6041 = vst [vmem:[%s7359_s13 + $0x68] sm:$0xff] %v5937_v42   ;;  %v4840_v24 = vadd.f32 %v8990_v57, %v4769_v62  ;;  %v4770_v27 = vadd.f32 %v4602_v22, %v9874_v40 }
 0x3e4   : > { %6040 = vst [vmem:[%s7359_s13 + $0x60] sm:$0xff] %v5932_v26   ;;  %vm4906_vm1 = vcmp.gt.f32.partialorder %v4842_v33, 0.0  ;;  %v4970_v18 = vmul.f32 0.01, %v4842_v33  ;;  %v4843_v59 = vadd.f32 %v8990_v57, %v4772_v55  ;;  %v9135_v10 = vpop.f32.mrb[4].mxu1 }
 0x3e5   : > { %vm4904_vm2 = vcmp.gt.f32.partialorder %v4840_v24, 0.0  ;;  %v4968_v39 = vmul.f32 0.01, %v4840_v24  ;;  %v4841_v1 = vadd.f32 %v8990_v57, %v4770_v27  ;;  %v6390_v58 = vpop.f32.mrb[248].mxu0  ;;  %v4383_v43 = vpop.f32.mrb[5].mxu1 }
 0x3e6   : > { %vm4907_vm3 = vcmp.gt.f32.partialorder %v4843_v59, 0.0  ;;  %v4971_v34 = vmul.f32 0.01, %v4843_v59  ;;  %v4623_v35 = vadd.f32 %v6390_v58, %v9027_v6  ;;  %v4614_v36 = vpop.f32.mrb[249].mxu0  ;;  %v5034_v14 = vsel %vm4906_vm1, %v4842_v33, %v4970_v18 }
 0x3e7   : > { %vm4905_vm4 = vcmp.gt.f32.partialorder %v4841_v1, 0.0  ;;  %v4969_v50 = vmul.f32 0.01, %v4841_v1  ;;  %v4615_v9 = vadd.f32 %v4614_v36, %v9009_v3  ;;  %v6391_v0 = vpop.f32.mrb[250].mxu0  ;;  %v5032_v5 = vsel %vm4904_vm2, %v4840_v24, %v4968_v39  ;;  %v9141_v3 = vpop.f32.mrb[6].mxu1  ;;  %v9878_v24 = vld [vmem:[#allocation121_spill] sm:$0xff] }
 0x3e8   : > { %v5035_v16 = vsel %vm4907_vm3, %v4843_v59, %v4971_v34  ;;  %v4775_v38 = vadd.f32 %v4623_v35, %v9875_v4  ;;  %v4626_v32 = vadd.f32 %v6391_v0, %v9033_v44  ;;  %v4617_v46 = vpop.f32.mrb[251].mxu0  ;;  %v4386_v21 = vpop.f32.mrb[7].mxu1  ;;  %v9877_v44 = vld [vmem:[#allocation62_spill] sm:$0xff] }
 0x3e9   : > { %v5947_v6 = vpack.c.bf16 %v5035_v16, %v5034_v14  ;;  %v5033_v47 = vsel %vm4905_vm4, %v4841_v1, %v4969_v50  ;;  %v4773_v17 = vadd.f32 %v4615_v9, %v9876_v23  ;;  %v4618_v54 = vadd.f32 %v4617_v46, %v9015_v51  ;;  %v9879_v1 = vld [vmem:[#allocation41_spill] sm:$0xff] }
 0x3ea   : > { %v5942_v15 = vpack.c.bf16 %v5033_v47, %v5032_v5  ;;  %v4846_v52 = vadd.f32 %v8990_v57, %v4775_v38  ;;  %v4776_v29 = vadd.f32 %v4626_v32, %v8867_v49 }
 0x3eb   : > { %6043 = vst [vmem:[%s7359_s13 + $0x78] sm:$0xff] %v5947_v6   ;;  %v4844_v25 = vadd.f32 %v8990_v57, %v4773_v17  ;;  %v4774_v11 = vadd.f32 %v4618_v54, %v9877_v44  ;;  %v9880_v54 = vld [vmem:[#allocation63_spill] sm:$0xff]  ;;  %v9881_v44 = vld [vmem:[#allocation64_spill] sm:$0xff] }
 0x3ec   : > { %6042 = vst [vmem:[%s7359_s13 + $0x70] sm:$0xff] %v5942_v15   ;;  %vm4910_vm5 = vcmp.gt.f32.partialorder %v4846_v52, 0.0  ;;  %v4974_v37 = vmul.f32 0.01, %v4846_v52  ;;  %v4847_v20 = vadd.f32 %v8990_v57, %v4776_v29 }
 0x3ed   : > { %vm4908_vm6 = vcmp.gt.f32.partialorder %v4844_v25, 0.0  ;;  %v4972_v51 = vmul.f32 0.01, %v4844_v25  ;;  %v4845_v56 = vadd.f32 %v8990_v57, %v4774_v11  ;;  %v6394_v42 = vpop.f32.mrb[252].mxu0  ;;  %v9153_v7 = vpop.f32.mrb[8].mxu1 }
 0x3ee   : > { %vm4911_vm7 = vcmp.gt.f32.partialorder %v4847_v20, 0.0  ;;  %v4975_v8 = vmul.f32 0.01, %v4847_v20  ;;  %v4639_v49 = vadd.f32 %v6394_v42, %v9063_v60  ;;  %v4630_v41 = vpop.f32.mrb[253].mxu0  ;;  %v5038_v62 = vsel %vm4910_vm5, %v4846_v52, %v4974_v37  ;;  %v4391_v59 = vpop.f32.mrb[9].mxu1 }
 0x3ef   : > { %vm4909_vm8 = vcmp.gt.f32.partialorder %v4845_v56, 0.0  ;;  %v4973_v22 = vmul.f32 0.01, %v4845_v56  ;;  %v4631_v26 = vadd.f32 %v4630_v41, %v9045_v28  ;;  %v6395_v33 = vpop.f32.mrb[254].mxu0  ;;  %v5036_v55 = vsel %vm4908_vm6, %v4844_v25, %v4972_v51  ;;  %v9159_v28 = vpop.f32.mrb[10].mxu1 }
 0x3f0   : > { %v5039_v48 = vsel %vm4911_vm7, %v4847_v20, %v4975_v8  ;;  %v4779_v40 = vadd.f32 %v4639_v49, %v9878_v24  ;;  %v4642_v27 = vadd.f32 %v6395_v33, %v9069_v12  ;;  %v4633_v18 = vpop.f32.mrb[255].mxu0  ;;  %v4394_v50 = vpop.f32.mrb[11].mxu1 }
 0x3f1   : > { %v5957_v60 = vpack.c.bf16 %v5039_v48, %v5038_v62  ;;  %v5037_v39 = vsel %vm4909_vm8, %v4845_v56, %v4973_v22  ;;  %v4777_v58 = vadd.f32 %v4631_v26, %v9879_v1  ;;  %v4634_v34 = vadd.f32 %v4633_v18, %v9051_v2  ;;  %v9882_v56 = vld [vmem:[#allocation117_spill] sm:$0xff] }
 0x3f2   : > { %v5952_v35 = vpack.c.bf16 %v5037_v39, %v5036_v55  ;;  %v4850_v36 = vadd.f32 %v8990_v57, %v4779_v40  ;;  %v4780_v14 = vadd.f32 %v4642_v27, %v8883_v19 }
 0x3f3   : > { %6045 = vst [vmem:[%s7359_s13 + $0x88] sm:$0xff] %v5957_v60   ;;  %v4848_v9 = vadd.f32 %v8990_v57, %v4777_v58  ;;  %v4778_v12 = vadd.f32 %v4634_v34, %v8886_v63  ;;  %v9884_v58 = vld [vmem:[#allocation65_spill] sm:$0xff] }
 0x3f4   : > { %6044 = vst [vmem:[%s7359_s13 + $0x80] sm:$0xff] %v5952_v35   ;;  %vm4914_vm9 = vcmp.gt.f32.partialorder %v4850_v36, 0.0  ;;  %v4978_v0 = vmul.f32 0.01, %v4850_v36  ;;  %v4851_v5 = vadd.f32 %v8990_v57, %v4780_v14 }
 0x3f5   : > { %vm4912_vm10 = vcmp.gt.f32.partialorder %v4848_v9, 0.0  ;;  %v4976_v2 = vmul.f32 0.01, %v4848_v9  ;;  %v4849_v16 = vadd.f32 %v8990_v57, %v4778_v12  ;;  %v6398_v4 = vpop.f32.mrb[0].mxu0  ;;  %v9171_v47 = vpop.f32.mrb[12].mxu1 }
 0x3f6   : > { %vm4915_vm11 = vcmp.gt.f32.partialorder %v4851_v5, 0.0  ;;  %v4979_v38 = vmul.f32 0.01, %v4851_v5  ;;  %v4655_v19 = vadd.f32 %v6398_v4, %v9099_v45  ;;  %v4646_v32 = vpop.f32.mrb[1].mxu0  ;;  %v5042_v46 = vsel %vm4914_vm9, %v4850_v36, %v4978_v0  ;;  %v4399_v21 = vpop.f32.mrb[13].mxu1 }
 0x3f7   : > { %vm4913_vm12 = vcmp.gt.f32.partialorder %v4849_v16, 0.0  ;;  %v4977_v43 = vmul.f32 0.01, %v4849_v16  ;;  %v4647_v63 = vadd.f32 %v4646_v32, %v9081_v31  ;;  %v6399_v6 = vpop.f32.mrb[2].mxu0  ;;  %v5040_v23 = vsel %vm4912_vm10, %v4848_v9, %v4976_v2  ;;  %v9177_v31 = vpop.f32.mrb[14].mxu1  ;;  %v9885_v9 = vld [vmem:[#allocation66_spill] sm:$0xff] }
 0x3f8   : > { %v5043_v17 = vsel %vm4915_vm11, %v4851_v5, %v4979_v38  ;;  %v4783_v15 = vadd.f32 %v4655_v19, %v9880_v54  ;;  %v4658_v52 = vadd.f32 %v6399_v6, %v9105_v30  ;;  %v4649_v29 = vpop.f32.mrb[3].mxu0  ;;  %v4402_v8 = vpop.f32.mrb[15].mxu1  ;;  %v9883_v30 = vld [vmem:[#allocation120_spill] sm:$0xff] }
 0x3f9   : > { %v5967_v45 = vpack.c.bf16 %v5043_v17, %v5042_v46  ;;  %v5041_v25 = vsel %vm4913_vm12, %v4849_v16, %v4977_v43  ;;  %v4781_v11 = vadd.f32 %v4647_v63, %v9881_v44  ;;  %v4650_v37 = vadd.f32 %v4649_v29, %v9087_v53  ;;  %v9886_v16 = vld [vmem:[#allocation67_spill] sm:$0xff]  ;;  %v9889_v8 = vld [vmem:[#allocation126_spill] sm:$0xff] }
 0x3fa   : > { %v5962_v20 = vpack.c.bf16 %v5041_v25, %v5040_v23  ;;  %v4854_v51 = vadd.f32 %v8990_v57, %v4783_v15  ;;  %v4784_v42 = vadd.f32 %v4658_v52, %v9882_v56 }
 0x3fb   : > { %6047 = vst [vmem:[%s7359_s13 + $0x98] sm:$0xff] %v5967_v45   ;;  %v4852_v49 = vadd.f32 %v8990_v57, %v4781_v11  ;;  %v4782_v41 = vadd.f32 %v4650_v37, %v9883_v30  ;;  %v9888_v11 = vld [vmem:[#allocation125_spill] sm:$0xff] }
 0x3fc   : > { %6046 = vst [vmem:[%s7359_s13 + $0x90] sm:$0xff] %v5962_v20   ;;  %vm4918_vm13 = vcmp.gt.f32.partialorder %v4854_v51, 0.0  ;;  %v4982_v62 = vmul.f32 0.01, %v4854_v51  ;;  %v4855_v22 = vadd.f32 %v8990_v57, %v4784_v42 }
 0x3fd   : > { %vm4916_vm14 = vcmp.gt.f32.partialorder %v4852_v49, 0.0  ;;  %v4980_v53 = vmul.f32 0.01, %v4852_v49  ;;  %v4853_v26 = vadd.f32 %v8990_v57, %v4782_v41  ;;  %v6402_v33 = vpop.f32.mrb[4].mxu0  ;;  %v9189_v60 = vpop.f32.mrb[16].mxu1 }
 0x3fe   : > { %vm4919_vm15 = vcmp.gt.f32.partialorder %v4855_v22, 0.0  ;;  %v4983_v55 = vmul.f32 0.01, %v4855_v22  ;;  %v4671_v48 = vadd.f32 %v6402_v33, %v9135_v10  ;;  %v4662_v24 = vpop.f32.mrb[5].mxu0  ;;  %v5046_v40 = vsel %vm4918_vm13, %v4854_v51, %v4982_v62  ;;  %v4407_v14 = vpop.f32.mrb[17].mxu1 }
 0x3ff   : > { %vm4917_vm0 = vcmp.gt.f32.partialorder %v4853_v26, 0.0  ;;  %v4981_v27 = vmul.f32 0.01, %v4853_v26  ;;  %v4663_v18 = vadd.f32 %v4662_v24, %v9117_v13  ;;  %v6403_v59 = vpop.f32.mrb[6].mxu0  ;;  %v5044_v39 = vsel %vm4916_vm14, %v4852_v49, %v4980_v53  ;;  %v9195_v13 = vpop.f32.mrb[18].mxu1 }
 0x400   : > { %v5047_v1 = vsel %vm4919_vm15, %v4855_v22, %v4983_v55  ;;  %v4787_v34 = vadd.f32 %v4671_v48, %v9884_v58  ;;  %v4674_v35 = vadd.f32 %v6403_v59, %v9141_v3  ;;  %v4665_v36 = vpop.f32.mrb[7].mxu0  ;;  %v4410_v38 = vpop.f32.mrb[19].mxu1  ;;  %v9887_v3 = vld [vmem:[#allocation68_spill] sm:$0xff]  ;;  %v9890_v22 = vld [vmem:[#allocation69_spill] sm:$0xff]  ;;  %v9891_v55 = vld [vmem:[#allocation70_spill] sm:$0xff] }
 0x401   : > { %v5977_v10 = vpack.c.bf16 %v5047_v1, %v5046_v40  ;;  %v5045_v50 = vsel %vm4917_vm0, %v4853_v26, %v4981_v27  ;;  %v4785_v12 = vadd.f32 %v4663_v18, %v9885_v9  ;;  %v4666_v0 = vadd.f32 %v4665_v36, %v9123_v61 }
 0x402   : > { %v5972_v5 = vpack.c.bf16 %v5045_v50, %v5044_v39  ;;  %v4858_v2 = vadd.f32 %v8990_v57, %v4787_v34  ;;  %v4788_v4 = vadd.f32 %v4674_v35, %v9886_v16  ;;  %v9892_v50 = vld [vmem:[#allocation130_spill] sm:$0xff] }
 0x403   : > { %6049 = vst [vmem:[%s7359_s13 + $0xa8] sm:$0xff] %v5977_v10   ;;  %v4856_v19 = vadd.f32 %v8990_v57, %v4785_v12  ;;  %v4786_v32 = vadd.f32 %v4666_v0, %v9887_v3 }
 0x404   : > { %6048 = vst [vmem:[%s7359_s13 + $0xa0] sm:$0xff] %v5972_v5   ;;  %vm4922_vm1 = vcmp.gt.f32.partialorder %v4858_v2, 0.0  ;;  %v4986_v46 = vmul.f32 0.01, %v4858_v2  ;;  %v4859_v43 = vadd.f32 %v8990_v57, %v4788_v4  ;;  %v9893_v4 = vld [vmem:[#allocation132_spill] sm:$0xff] }
 0x405   : > { %vm4920_vm2 = vcmp.gt.f32.partialorder %v4856_v19, 0.0  ;;  %v4984_v61 = vmul.f32 0.01, %v4856_v19  ;;  %v4857_v63 = vadd.f32 %v8990_v57, %v4786_v32  ;;  %v6406_v6 = vpop.f32.mrb[8].mxu0  ;;  %v4413_v45 = vpop.f32.mrb[20].mxu1 }
 0x406   : > { %vm4923_vm3 = vcmp.gt.f32.partialorder %v4859_v43, 0.0  ;;  %v4987_v23 = vmul.f32 0.01, %v4859_v43  ;;  %v4687_v17 = vadd.f32 %v6406_v6, %v9171_v47  ;;  %v4678_v54 = vpop.f32.mrb[9].mxu0  ;;  %v5050_v15 = vsel %vm4922_vm1, %v4858_v2, %v4986_v46  ;;  %v4415_v56 = vpop.f32.mrb[21].mxu1  ;;  %v9894_v46 = vld [vmem:[#allocation71_spill] sm:$0xff] }
 0x407   : > { %vm4921_vm4 = vcmp.gt.f32.partialorder %v4857_v63, 0.0  ;;  %v4985_v52 = vmul.f32 0.01, %v4857_v63  ;;  %v4679_v29 = vadd.f32 %v4678_v54, %v9153_v7  ;;  %v6407_v21 = vpop.f32.mrb[10].mxu0  ;;  %v5048_v25 = vsel %vm4920_vm2, %v4856_v19, %v4984_v61  ;;  %v4416_v41 = vpop.f32.mrb[22].mxu1  ;;  %v9895_v6 = vld [vmem:[#allocation72_spill] sm:$0xff] }
 0x408   : > { %v5051_v44 = vsel %vm4923_vm3, %v4859_v43, %v4987_v23  ;;  %v4791_v37 = vadd.f32 %v4687_v17, %v9888_v11  ;;  %v4690_v20 = vadd.f32 %v6407_v21, %v9177_v31  ;;  %v4681_v51 = vpop.f32.mrb[11].mxu0  ;;  %v4418_v26 = vpop.f32.mrb[23].mxu1 }
 0x409   : > { %v5987_v42 = vpack.c.bf16 %v5051_v44, %v5050_v15  ;;  %v5049_v47 = vsel %vm4921_vm4, %v4857_v63, %v4985_v52  ;;  %v4789_v49 = vadd.f32 %v4679_v29, %v9889_v8  ;;  %v4682_v30 = vadd.f32 %v4681_v51, %v9159_v28 }
 0x40a   : > { %v5982_v7 = vpack.c.bf16 %v5049_v47, %v5048_v25  ;;  %v4862_v62 = vadd.f32 %v8990_v57, %v4791_v37  ;;  %v4792_v53 = vadd.f32 %v4690_v20, %v9890_v22 }
 0x40b   : > { %6051 = vst [vmem:[%s7359_s13 + $0xb8] sm:$0xff] %v5987_v42   ;;  %v4860_v33 = vadd.f32 %v8990_v57, %v4789_v49  ;;  %v4790_v31 = vadd.f32 %v4682_v30, %v9891_v55 }
 0x40c   : > { %6050 = vst [vmem:[%s7359_s13 + $0xb0] sm:$0xff] %v5982_v7   ;;  %vm4926_vm5 = vcmp.gt.f32.partialorder %v4862_v62, 0.0  ;;  %v4990_v48 = vmul.f32 0.01, %v4862_v62  ;;  %v4863_v24 = vadd.f32 %v8990_v57, %v4792_v53  ;;  %v9897_v53 = vld [vmem:[#allocation129_spill] sm:$0xff] }
 0x40d   : > { %vm4924_vm6 = vcmp.gt.f32.partialorder %v4860_v33, 0.0  ;;  %v4988_v40 = vmul.f32 0.01, %v4860_v33  ;;  %v4861_v28 = vadd.f32 %v8990_v57, %v4790_v31  ;;  %v6410_v27 = vpop.f32.mrb[12].mxu0  ;;  %v4421_v36 = vpop.f32.mrb[24].mxu1 }
 0x40e   : > { %vm4927_vm7 = vcmp.gt.f32.partialorder %v4863_v24, 0.0  ;;  %v4991_v18 = vmul.f32 0.01, %v4863_v24  ;;  %v4703_v59 = vadd.f32 %v6410_v27, %v4413_v45  ;;  %v4694_v39 = vpop.f32.mrb[13].mxu0  ;;  %v5054_v1 = vsel %vm4926_vm5, %v4862_v62, %v4990_v48  ;;  %v4423_v5 = vpop.f32.mrb[25].mxu1  ;;  %v9898_v48 = vld [vmem:[#allocation74_spill] sm:$0xff] }
 0x40f   : > { %vm4925_vm8 = vcmp.gt.f32.partialorder %v4861_v28, 0.0  ;;  %v4989_v58 = vmul.f32 0.01, %v4861_v28  ;;  %v4695_v34 = vadd.f32 %v4694_v39, %v9189_v60  ;;  %v6411_v35 = vpop.f32.mrb[14].mxu0  ;;  %v5052_v14 = vsel %vm4924_vm6, %v4860_v33, %v4988_v40  ;;  %v4424_v3 = vpop.f32.mrb[26].mxu1 }
 0x410   : > { %v5055_v10 = vsel %vm4927_vm7, %v4863_v24, %v4991_v18  ;;  %v4795_v9 = vadd.f32 %v4703_v59, %v9892_v50  ;;  %v4706_v12 = vadd.f32 %v6411_v35, %v4416_v41  ;;  %v4697_v0 = vpop.f32.mrb[15].mxu0  ;;  %v4426_v61 = vpop.f32.mrb[27].mxu1  ;;  %v6693_v33 = vld [vmem:[%s9853_s17] ss:$0 sm:$0xff] }
 0x411   : > { %v5997_v2 = vpack.c.bf16 %v5055_v10, %v5054_v1  ;;  %v5053_v16 = vsel %vm4925_vm8, %v4861_v28, %v4989_v58  ;;  %v4793_v38 = vadd.f32 %v4695_v34, %v9893_v4  ;;  %v4698_v19 = vadd.f32 %v4697_v0, %v9195_v13  ;;  %v9899_v28 = vld [vmem:[#allocation73_spill] sm:$0xff]  ;;  %v9901_v61 = vld [vmem:[#allocation91_spill] sm:$0xff] }
 0x412   : > { %v5992_v32 = vpack.c.bf16 %v5053_v16, %v5052_v14  ;;  %v4866_v60 = vadd.f32 %v8990_v57, %v4795_v9  ;;  %v4796_v43 = vadd.f32 %v4706_v12, %v9894_v46 }
 0x413   : > { %6053 = vst [vmem:[%s7359_s13 + $0xc8] sm:$0xff] %v5997_v2   ;;  %v4864_v63 = vadd.f32 %v8990_v57, %v4793_v38  ;;  %v4794_v23 = vadd.f32 %v4698_v19, %v9895_v6 }
 0x414   : > { %6052 = vst [vmem:[%s7359_s13 + $0xc0] sm:$0xff] %v5992_v32   ;;  %v4994_v17 = vmul.f32 0.01, %v4866_v60  ;;  %v4867_v54 = vadd.f32 %v8990_v57, %v4796_v43  ;;  %vm4930_vm9 = vcmp.gt.f32.partialorder %v4866_v60, 0.0 }
 0x415   : > { %vm4928_vm10 = vcmp.gt.f32.partialorder %v4864_v63, 0.0  ;;  %v4992_v15 = vmul.f32 0.01, %v4864_v63  ;;  %v4865_v13 = vadd.f32 %v8990_v57, %v4794_v23  ;;  %v6414_v52 = vpop.f32.mrb[16].mxu0  ;;  %v4429_v37 = vpop.f32.mrb[28].mxu1  ;;  %v9896_v57 = vld [vmem:[#allocation131_spill] sm:$0xff] }
 0x416   : > { %vm4931_vm11 = vcmp.gt.f32.partialorder %v4867_v54, 0.0  ;;  %v4995_v29 = vmul.f32 0.01, %v4867_v54  ;;  %v4710_v21 = vpop.f32.mrb[17].mxu0  ;;  %v5058_v11 = vsel %vm4930_vm9, %v4866_v60, %v4994_v17  ;;  %v4431_v42 = vpop.f32.mrb[29].mxu1  ;;  %v4719_v49 = vadd.f32 %v6414_v52, %v4429_v37 }
 0x417   : > { %vm4929_vm12 = vcmp.gt.f32.partialorder %v4865_v13, 0.0  ;;  %v4993_v45 = vmul.f32 0.01, %v4865_v13  ;;  %v4711_v25 = vadd.f32 %v4710_v21, %v4421_v36  ;;  %v6415_v44 = vpop.f32.mrb[18].mxu0  ;;  %v5056_v20 = vsel %vm4928_vm10, %v4864_v63, %v4992_v15  ;;  %v4432_v41 = vpop.f32.mrb[30].mxu1 }
 0x418   : > { %v5059_v51 = vsel %vm4931_vm11, %v4867_v54, %v4995_v29  ;;  %v4713_v56 = vpop.f32.mrb[19].mxu0  ;;  %v4434_v22 = vpop.f32.mrb[31].mxu1  ;;  %v4799_v26 = vadd.f32 %v4719_v49, %v9897_v53  ;;  %v4722_v31 = vadd.f32 %v6415_v44, %v4432_v41  ;;  %v9902_v29 = vld [vmem:[#allocation97_spill] sm:$0xff] }
 0x419   : > { %v6007_v47 = vpack.c.bf16 %v5059_v51, %v5058_v11  ;;  %v5057_v8 = vsel %vm4929_vm12, %v4865_v13, %v4993_v45  ;;  %v4797_v30 = vadd.f32 %v4711_v25, %v9896_v57  ;;  %v4714_v62 = vadd.f32 %v4713_v56, %v4424_v3  ;;  %v9900_v3 = vld [vmem:[#allocation89_spill] sm:$0xff]  ;;  %v9903_v51 = vld [vmem:[#allocation99_spill] sm:$0xff] }
 0x41a   : > { %v6002_v7 = vpack.c.bf16 %v5057_v8, %v5056_v20  ;;  %v4870_v40 = vadd.f32 %v6693_v33, %v4799_v26  ;;  %v4800_v27 = vadd.f32 %v4722_v31, %v9899_v28 }
 0x41b   : > { %6055 = vst [vmem:[%s7359_s13 + $0xd8] sm:$0xff] %v6007_v47   ;;  %v4868_v55 = vadd.f32 %v6693_v33, %v4797_v30  ;;  %v4798_v24 = vadd.f32 %v4714_v62, %v9898_v48 }
 0x41c   : > { %6054 = vst [vmem:[%s7359_s13 + $0xd0] sm:$0xff] %v6002_v7   ;;  %vm4934_vm13 = vcmp.gt.f32.partialorder %v4870_v40, 0.0  ;;  %v4998_v58 = vmul.f32 0.01, %v4870_v40  ;;  %v4871_v34 = vadd.f32 %v6693_v33, %v4800_v27 }
 0x41d   : > { %v6418_v18 = vpop.f32.mrb[20].mxu0  ;;  %v4996_v59 = vmul.f32 0.01, %v4868_v55  ;;  %v4869_v39 = vadd.f32 %v6693_v33, %v4798_v24  ;;  %vm4932_vm14 = vcmp.gt.f32.partialorder %v4868_v55, 0.0  ;;  %v4437_v36 = vpop.f32.mrb[32].mxu1 }
 0x41e   : > { %v4726_v1 = vpop.f32.mrb[21].mxu0  ;;  %v4439_v50 = vpop.f32.mrb[33].mxu1  ;;  %vm4935_vm0 = vcmp.gt.f32.partialorder %v4871_v34, 0.0  ;;  %v4999_v9 = vmul.f32 0.01, %v4871_v34  ;;  %v5062_v0 = vsel %vm4934_vm13, %v4870_v40, %v4998_v58 }
 0x41f   : > { %v6419_v35 = vpop.f32.mrb[22].mxu0  ;;  %vm4933_vm15 = vcmp.gt.f32.partialorder %v4869_v39, 0.0  ;;  %v4997_v14 = vmul.f32 0.01, %v4869_v39  ;;  %v4727_v12 = vadd.f32 %v4726_v1, %v4437_v36  ;;  %v5060_v5 = vsel %vm4932_vm14, %v4868_v55, %v4996_v59  ;;  %v4440_v2 = vpop.f32.mrb[34].mxu1 }
 0x420   : > { %v4729_v10 = vpop.f32.mrb[23].mxu0  ;;  %v5063_v4 = vsel %vm4935_vm0, %v4871_v34, %v4999_v9  ;;  %v4442_v19 = vpop.f32.mrb[35].mxu1 }
 0x421   : > { %v5061_v16 = vsel %vm4933_vm15, %v4869_v39, %v4997_v14  ;;  %v4801_v32 = vadd.f32 %v4727_v12, %v9900_v3  ;;  %v4730_v60 = vadd.f32 %v4729_v10, %v4440_v2  ;;  %v6017_v46 = vpack.c.bf16 %v5063_v4, %v5062_v0 }
 0x422   : > { %v6012_v38 = vpack.c.bf16 %v5061_v16, %v5060_v5 }
 0x423   : > { %v4872_v43 = vadd.f32 %v6693_v33, %v4801_v32  ;;  %v4802_v63 = vadd.f32 %v4730_v60, %v9901_v61  ;;  %6057 = vst [vmem:[%s7359_s13 + $0xe8] sm:$0xff] %v6017_v46  }
 0x424   : > { %6056 = vst [vmem:[%s7359_s13 + $0xe0] sm:$0xff] %v6012_v38  }
 0x425   : > { %v5000_v6 = vmul.f32 0.01, %v4872_v43  ;;  %v4873_v23 = vadd.f32 %v6693_v33, %v4802_v63  ;;  %v4445_v17 = vpop.f32.mrb[36].mxu1  ;;  %vm4936_vm1 = vcmp.gt.f32.partialorder %v4872_v43, 0.0 }
 0x426   : > { %v4735_v54 = vadd.f32 %v6418_v18, %v4445_v17  ;;  %v4447_v15 = vpop.f32.mrb[37].mxu1 }
 0x427   : > { %vm4937_vm2 = vcmp.gt.f32.partialorder %v4873_v23, 0.0  ;;  %v5001_v13 = vmul.f32 0.01, %v4873_v23  ;;  %v4448_v52 = vpop.f32.mrb[38].mxu1  ;;  %v5064_v45 = vsel %vm4936_vm1, %v4872_v43, %v5000_v6 }
 0x428   : > { %v4803_v21 = vadd.f32 %v4735_v54, %v9902_v29  ;;  %v4738_v25 = vadd.f32 %v6419_v35, %v4448_v52  ;;  %v4450_v11 = vpop.f32.mrb[39].mxu1 }
 0x429   : > { %v5065_v44 = vsel %vm4937_vm2, %v4873_v23, %v5001_v13 }
 0x42a   : > { %v6022_v37 = vpack.c.bf16 %v5065_v44, %v5064_v45  ;;  %v4874_v20 = vadd.f32 %v6693_v33, %v4803_v21  ;;  %v4804_v56 = vadd.f32 %v4738_v25, %v9903_v51 }
 0x42c   : > { %6058 = vst [vmem:[%s7359_s13 + $0xf0] sm:$0xff] %v6022_v37   ;;  %v5002_v42 = vmul.f32 0.01, %v4874_v20  ;;  %v4875_v47 = vadd.f32 %v6693_v33, %v4804_v56  ;;  %vm4938_vm3 = vcmp.gt.f32.partialorder %v4874_v20, 0.0 }
 0x42e   : > { %vm4939_vm4 = vcmp.gt.f32.partialorder %v4875_v47, 0.0  ;;  %v5003_v8 = vmul.f32 0.01, %v4875_v47  ;;  %v5066_v49 = vsel %vm4938_vm3, %v4874_v20, %v5002_v42 }
 0x430   : > { %v5067_v57 = vsel %vm4939_vm4, %v4875_v47, %v5003_v8 }
 0x431   : > { %v6027_v30 = vpack.c.bf16 %v5067_v57, %v5066_v49 }
 0x433   : > { %6059 = vst [vmem:[%s7359_s13 + $0xf8] sm:$0xff] %v6027_v30  }
 0x434   : > { %6825 = shalt.err (!%p6822_p7)
}
 0x435   : > { %s6826_s13 = scalar_lea.hbm %s9252_s21, 4096  ;;  %s6830_s28 = scalar_lea.hbm %s9905_s15, 8192 }
 0x436   : > { %p6827_p10 = scmp.ne.s32.totalorder %s9252_s21, %s6826_s13  ;;  %p6831_p9 = scmp.lt.u32.totalorder %s9252_s21, %s9905_s15 }
 0x437   : > { %p6832_p11 = scmp.lt.u32.totalorder %s6830_s28, %s6826_s13  ;;  %p6834_p12 = scmp.lt.u32.totalorder %s6826_s13, %s9252_s21 }
 0x438   : > { %p6828_p2 = pnand %p6827_p10, %p9906_p5 }
 0x439   : > { %p6833_p13 = por %p6832_p11, %p6831_p9 }
 0x43a   : > { %p6829_p1 = pneg %p6828_p2 }
 0x43b   : > { %p6835_p0 = por %p6834_p12, %p6833_p13 }
 0x43d   : > { %p6836_p4 = pnand %p6835_p0, %p6829_p1 }
 0x43f   : > { %6839 = shalt.err (!%p6836_p4)
}
 0x440   : > { %s6965_s4 = smov 64   ;;  %s6966_s27 = smov 4  }
 0x441   : > { %6446 = dma.vmem_to_hbm [thread:$0]  (%p9906_p5), %s9254_s8, 4096, %s9252_s21, %s5389_s16, %s6965_s4, %s6965_s4, %s6966_s27  }
 0x442 PF: > { %s5421_s26 = sand.u32 1, %s6934_s24   ;;  %p9907_p8 = scmp.ne.s32.totalorder %s9465_s11, 0 }
 0x443   : > { %p9908_p6 = scmp.ge.s32.totalorder %s6954_s29, 2  ;;  %s5422_s12 = scalar_lea.sflag [#allocation6], %s5421_s26 }
 0x445   : > { %p6463_p3 = pnand %p9908_p6, %p9907_p8 }
 0x447   : > { %6905 = dma.done.wait (!%p6463_p3), %s5422_s12, 4096  }
 0x448   : > { %6907 = vsyncadd (!%p6463_p3), %s5422_s12, 4294963200  ;;  %s25_s29 = sadd.s32 1, %s6954_s29   ;;  %s9909_s5 = sld [smem:[#allocation22_spill]] }
 0x449   : > { %p22_p7 = scmp.ge.s32.totalorder %s25_s29, 4   ;;  %s9910_s14 = sld [smem:[#allocation18_spill]] }
 0x44a   : > { %s9911_s26 = sld [smem:[#allocation23_spill]]  ;;  %s9912_s27 = sld [smem:[#allocation20_spill]] }
 0x44b   : > { %s9913_s28 = sld [smem:[#allocation21_spill]]  ;;  %s9914_s18 = smov %s6914_s19 }
 0x44c   : > { %s9915_s19 = smov %s6918_s20  ;;  %s9916_s20 = smov %s7282_s3 }
 0x44d   : > { %s9917_s21 = smov %s6926_s22  ;;  %s9918_s22 = smov %s6930_s23 }
 0x44e   : > { %s9919_s23 = smov %s9909_s5  ;;  %s9920_s24 = smov %s6938_s25 }
 0x44f   : > { %s9921_s25 = smov %s9910_s14  ;;  %24 = sbr.rel (!%p22_p7) target bundleno = 18 (0x12), region = 123 }
 0x456   :  { %5427 = vsyncpa [#allocation5], 1 }
 0x457   :  { %5429 = vsyncpa [#allocation5 + $0x1], 1 }
 0x458   :  { %5430 = vsyncpa [#allocation8], 1 }
 0x459   :  { %5432 = vsyncpa [#allocation8 + $0x1], 1 }
 0x45a   :  { %5433 = vsyncpa [#allocation11], 1 }
 0x45b   :  { %5434 = vsyncpa [#allocation6], 1 }
 0x45c   :  { %5436 = vsyncpa [#allocation6 + $0x1], 1 }

</bundles_post_ra>
